<compile_context>
chip_gen: v6e
topology: v6e:2x2x1
jax: 0.10.0
libtpu: 0.0.40
codegen_flags: <defaults>
</compile_context>

<pallas_src>
import math

import jax
import jax.numpy as jnp
from jax import lax
from jax.experimental import pallas as pl
from jax.experimental.pallas import tpu as pltpu


def _vmem_limit_bytes():
    # Derive the scoped-VMEM budget from the chip (v7x: 64 MiB physical per TC,
    # v5e/v6e: 128 MiB).  Half of physical is always a safe ceiling here.
    try:
        cap = getattr(pltpu.get_tpu_info(), "vmem_capacity_bytes", None)
        if cap:
            return int(cap) // 2
    except Exception:
        pass
    return 32 * 1024 * 1024


_VMEM_LIMIT = _vmem_limit_bytes()


# ----------------------------- tiling helpers ------------------------------

def _pick_tile(dim, target, align):
    """Largest tile <= target that divides `dim` and is `align`-aligned.
    Falls back to the full dimension (always legal: block == array dim)."""
    if dim <= target:
        return dim
    t = (target // align) * align
    while t >= align:
        if dim % t == 0:
            return t
        t -= align
    return dim


def _pick_m_tile(M, target=256):
    tm = _pick_tile(M, target, 8)
    # v7x has 2 TensorCores: prefer >= 2 steps along the "parallel" M axis
    # whenever the problem is big enough to split (neutral on v5e/v6e).
    if tm == M and M >= 16:
        half = _pick_tile(M, M // 2, 8)
        if half < M:
            tm = half
    return tm


# ------------------------------ Pallas kernels ------------------------------

def _make_linear_single_kernel(has_res):
    """out = x @ W + b [+ residual]; whole K in one block (no accumulator)."""
    def kernel(*args):
        if has_res:
            x_ref, w_ref, bias_ref, res_ref, o_ref = args
        else:
            x_ref, w_ref, bias_ref, o_ref = args
        out = jnp.dot(x_ref[...].astype(jnp.bfloat16),
                      w_ref[...].astype(jnp.bfloat16),
                      preferred_element_type=jnp.float32)
        out = out + bias_ref[...]
        if has_res:
            out = out + res_ref[...].astype(jnp.float32)
        o_ref[...] = out.astype(o_ref.dtype)
    return kernel


def _make_linear_acc_kernel(has_res):
    """K-tiled matmul with f32 VMEM accumulator: out = x @ W + b [+ residual]."""
    def kernel(*args):
        if has_res:
            x_ref, w_ref, bias_ref, res_ref, o_ref, acc_ref = args
        else:
            x_ref, w_ref, bias_ref, o_ref, acc_ref = args
        k = pl.program_id(2)

        @pl.when(k == 0)
        def _():
            acc_ref[...] = jnp.zeros_like(acc_ref)

        acc_ref[...] += jnp.dot(x_ref[...].astype(jnp.bfloat16),
                                w_ref[...].astype(jnp.bfloat16),
                                preferred_element_type=jnp.float32)

        @pl.when(k == pl.num_programs(2) - 1)
        def _():
            out = acc_ref[...] + bias_ref[...]
            if has_res:
                out = out + res_ref[...].astype(jnp.float32)
            o_ref[...] = out.astype(o_ref.dtype)
    return kernel


def _make_ln_linear_kernel(relu):
    """Fused LayerNorm + matmul: out = LN(x) @ W + b, optional ReLU.
    LN / bias math stays in f32; only the matmul operands go to bf16."""
    def kernel(x_ref, g_ref, b_ref, w_ref, bias_ref, o_ref):
        x = x_ref[...].astype(jnp.float32)
        mean = jnp.mean(x, axis=-1, keepdims=True)
        var = jnp.mean(jnp.square(x - mean), axis=-1, keepdims=True)
        y = (x - mean) * lax.rsqrt(var + 1e-5)
        y = y * g_ref[...] + b_ref[...]
        out = jnp.dot(y.astype(jnp.bfloat16), w_ref[...].astype(jnp.bfloat16),
                      preferred_element_type=jnp.float32)
        out = out + bias_ref[...]
        if relu:
            out = jnp.maximum(out, 0.0)
        o_ref[...] = out.astype(o_ref.dtype)
    return kernel


def _make_attn_kernel(H, Dh, causal, has_mask, cross):
    """All H heads of one batch element per grid step.

    Self-attention: reads the packed (L, 3D) QKV projection block.
    Cross-attention: reads the (Lq, D) Q block and the packed (Lk, 2D) KV block.
    Per-head q/k/v are sliced straight from the refs; each head's output is
    stored into its own lane slice of the (Lq, D) output block."""
    D = H * Dh
    scale = 1.0 / math.sqrt(Dh)
    nt_dims = (((1,), (1,)), ((), ()))  # q @ k^T without materializing k.T

    def kernel(*refs):
        if cross:
            if has_mask:
                q_ref, kv_ref, m_ref, o_ref = refs
            else:
                q_ref, kv_ref, o_ref = refs
            Lq, Lk = q_ref.shape[0], kv_ref.shape[0]
        else:
            if has_mask:
                qkv_ref, m_ref, o_ref = refs
            else:
                qkv_ref, o_ref = refs
            Lq = qkv_ref.shape[0]
            Lk = Lq

        if causal:
            row = lax.broadcasted_iota(jnp.int32, (Lq, Lk), 0)
            col = lax.broadcasted_iota(jnp.int32, (Lq, Lk), 1)
            causal_bias = jnp.where(col <= row, 0.0, -1e9).astype(jnp.float32)
        if has_mask:
            add_mask = m_ref[...].astype(jnp.float32)

        for h in range(H):  # static unroll over heads
            if cross:
                q = q_ref[:, pl.ds(h * Dh, Dh)].astype(jnp.float32)
                k = kv_ref[:, pl.ds(h * Dh, Dh)].astype(jnp.bfloat16)
                v = kv_ref[:, pl.ds(D + h * Dh, Dh)].astype(jnp.bfloat16)
            else:
                q = qkv_ref[:, pl.ds(h * Dh, Dh)].astype(jnp.float32)
                k = qkv_ref[:, pl.ds(D + h * Dh, Dh)].astype(jnp.bfloat16)
                v = qkv_ref[:, pl.ds(2 * D + h * Dh, Dh)].astype(jnp.bfloat16)
            q = (q * scale).astype(jnp.bfloat16)   # fold 1/sqrt(Dh) into q

            s = lax.dot_general(q, k, dimension_numbers=nt_dims,
                                preferred_element_type=jnp.float32)
            if has_mask:
                s = s + add_mask
            if causal:
                s = s + causal_bias
            s = s - jnp.max(s, axis=-1, keepdims=True)      # stable softmax
            p = jnp.exp(s)
            p = p * pl.reciprocal(jnp.sum(p, axis=-1, keepdims=True), approx=True)
            out_h = jnp.dot(p.astype(jnp.bfloat16), v,
                            preferred_element_type=jnp.float32)
            o_ref[:, pl.ds(h * Dh, Dh)] = out_h.astype(o_ref.dtype)

    return kernel


# ------------------------------ Pallas wrappers -----------------------------

def linear(x2d, w, b, residual=None):
    """Tiled (M,K)@(K,N)+b [+residual]."""
    M, K = x2d.shape
    N = w.shape[1]
    tm = _pick_m_tile(M)
    tn = _pick_tile(N, 256, 128)
    tk = _pick_tile(K, 512, 128)
    has_res = residual is not None
    bias2d = b.reshape(1, N)

    if tk == K:
        # Single K block: direct dot, no accumulator scratch / pl.when regions.
        in_specs = [pl.BlockSpec((tm, K), lambda i, j: (i, 0)),
                    pl.BlockSpec((K, tn), lambda i, j: (0, j)),
                    pl.BlockSpec((1, tn), lambda i, j: (0, j))]
        args = [x2d, w, bias2d]
        if has_res:
            in_specs.append(pl.BlockSpec((tm, tn), lambda i, j: (i, j)))
            args.append(residual)
        return pl.pallas_call(
            _make_linear_single_kernel(has_res),
            out_shape=jax.ShapeDtypeStruct((M, N), x2d.dtype),
            grid=(M // tm, N // tn),
            in_specs=in_specs,
            out_specs=pl.BlockSpec((tm, tn), lambda i, j: (i, j)),
            compiler_params=pltpu.CompilerParams(
                dimension_semantics=("parallel", "parallel"),
                vmem_limit_bytes=_VMEM_LIMIT),
        )(*args)

    k_steps = K // tk
    # Deeper weight buffering only pays when the reduction loop is long.
    if k_steps >= 4:
        w_spec = pl.BlockSpec((tk, tn), lambda i, j, k: (k, j),
                              pipeline_mode=pl.Buffered(3))
    else:
        w_spec = pl.BlockSpec((tk, tn), lambda i, j, k: (k, j))

    in_specs = [pl.BlockSpec((tm, tk), lambda i, j, k: (i, k)),
                w_spec,
                pl.BlockSpec((1, tn), lambda i, j, k: (0, j))]
    args = [x2d, w, bias2d]
    if has_res:
        in_specs.append(pl.BlockSpec((tm, tn), lambda i, j, k: (i, j)))
        args.append(residual)

    return pl.pallas_call(
        _make_linear_acc_kernel(has_res),
        out_shape=jax.ShapeDtypeStruct((M, N), x2d.dtype),
        grid=(M // tm, N // tn, k_steps),
        in_specs=in_specs,
        out_specs=pl.BlockSpec((tm, tn), lambda i, j, k: (i, j)),
        scratch_shapes=[pltpu.VMEM((tm, tn), jnp.float32)],
        compiler_params=pltpu.CompilerParams(
            dimension_semantics=("parallel", "parallel", "arbitrary"),
            vmem_limit_bytes=_VMEM_LIMIT),
    )(*args)


def ln_linear(x2d, gamma, beta, w, b, relu=False):
    """Fused LayerNorm + projection: LN(x) @ W + b (full-K blocks)."""
    M, K = x2d.shape
    N = w.shape[1]
    tm = _pick_m_tile(M)
    # Large tn target: the fused QKV projection (N = 3D) should run in one
    # j step so the LN statistics are computed only once per row tile.
    tn = _pick_tile(N, 1024, 128)
    grid = (M // tm, N // tn)

    return pl.pallas_call(
        _make_ln_linear_kernel(relu),
        out_shape=jax.ShapeDtypeStruct((M, N), x2d.dtype),
        grid=grid,
        in_specs=[pl.BlockSpec((tm, K), lambda i, j: (i, 0)),
                  pl.BlockSpec((1, K), lambda i, j: (0, 0)),
                  pl.BlockSpec((1, K), lambda i, j: (0, 0)),
                  pl.BlockSpec((K, tn), lambda i, j: (0, j)),
                  pl.BlockSpec((1, tn), lambda i, j: (0, j))],
        out_specs=pl.BlockSpec((tm, tn), lambda i, j: (i, j)),
        compiler_params=pltpu.CompilerParams(
            dimension_semantics=("parallel", "parallel"),
            vmem_limit_bytes=_VMEM_LIMIT),
    )(x2d, gamma.reshape(1, K), beta.reshape(1, K), w, b.reshape(1, N))


def self_attention(qkv2d, B, L, H, Dh, causal=False, mask=None):
    """qkv2d: (B*L, 3D) packed [Q|K|V] projections. Returns (B*L, D)."""
    D = H * Dh
    has_mask = mask is not None
    in_specs = [pl.BlockSpec((L, 3 * D), lambda b: (b, 0))]
    args = [qkv2d]
    if has_mask:
        # NOTE: a single 2-D additive mask broadcast over batches and heads.
        in_specs.append(pl.BlockSpec(mask.shape, lambda b: (0, 0)))
        args.append(mask)
    return pl.pallas_call(
        _make_attn_kernel(H, Dh, causal, has_mask, cross=False),
        out_shape=jax.ShapeDtypeStruct((B * L, D), qkv2d.dtype),
        grid=(B,),
        in_specs=in_specs,
        out_specs=pl.BlockSpec((L, D), lambda b: (b, 0)),
        compiler_params=pltpu.CompilerParams(
            dimension_semantics=("parallel",),
            vmem_limit_bytes=_VMEM_LIMIT),
    )(*args)


def cross_attention(q2d, kv2d, B, Lq, Lk, H, Dh):
    """q2d: (B*Lq, D) queries, kv2d: (B*Lk, 2D) packed [K|V]. Returns (B*Lq, D)."""
    D = H * Dh
    return pl.pallas_call(
        _make_attn_kernel(H, Dh, causal=False, has_mask=False, cross=True),
        out_shape=jax.ShapeDtypeStruct((B * Lq, D), q2d.dtype),
        grid=(B,),
        in_specs=[pl.BlockSpec((Lq, D), lambda b: (b, 0)),
                  pl.BlockSpec((Lk, 2 * D), lambda b: (b, 0))],
        out_specs=pl.BlockSpec((Lq, D), lambda b: (b, 0)),
        compiler_params=pltpu.CompilerParams(
            dimension_semantics=("parallel",),
            vmem_limit_bytes=_VMEM_LIMIT),
    )(q2d, kv2d)


# ------------------------------- model pieces -------------------------------

def _norm_mask(mask):
    """Returns (causal_flag, additive_mask_array_or_None)."""
    if mask is None:
        return False, None
    if isinstance(mask, str) and mask == "causal":
        return True, None
    return False, jnp.asarray(mask, jnp.float32)


def _encoder_block(p, x2d, B, L, H, Dh, causal, mask):
    # x = x + self_attention(norm1(x)); QKV fused, residual fused into w_out.
    qkv = ln_linear(x2d, p["norm1"]["g"], p["norm1"]["b"],
                    p["wqkv"]["w"], p["wqkv"]["b"])
    att = self_attention(qkv, B, L, H, Dh, causal=causal, mask=mask)
    x2d = linear(att, p["wo"]["w"], p["wo"]["b"], residual=x2d)
    # x = x + ff2(relu(ff1(norm2(x))));  dropout = identity.
    h = ln_linear(x2d, p["norm2"]["g"], p["norm2"]["b"],
                  p["ff1"]["w"], p["ff1"]["b"], relu=True)
    x2d = linear(h, p["ff2"]["w"], p["ff2"]["b"], residual=x2d)
    return x2d


def _decoder_block(p, x2d, enc2d, B, Lq, Lk, H, Dh, causal, mask):
    # self-attention
    qkv = ln_linear(x2d, p["norm1"]["g"], p["norm1"]["b"],
                    p["wqkv"]["w"], p["wqkv"]["b"])
    att = self_attention(qkv, B, Lq, H, Dh, causal=causal, mask=mask)
    x2d = linear(att, p["wo_self"]["w"], p["wo_self"]["b"], residual=x2d)
    # cross-attention (no mask per reference; K/V from raw encoder output)
    q = ln_linear(x2d, p["norm2"]["g"], p["norm2"]["b"],
                  p["wq_cross"]["w"], p["wq_cross"]["b"])
    kv = linear(enc2d, p["wkv_cross"]["w"], p["wkv_cross"]["b"])
    att = cross_attention(q, kv, B, Lq, Lk, H, Dh)
    x2d = linear(att, p["wo_cross"]["w"], p["wo_cross"]["b"], residual=x2d)
    # feed-forward
    h = ln_linear(x2d, p["norm3"]["g"], p["norm3"]["b"],
                  p["ff1"]["w"], p["ff1"]["b"], relu=True)
    x2d = linear(h, p["ff2"]["w"], p["ff2"]["b"], residual=x2d)
    return x2d


def transformer_forward(params, encoder_in, decoder_in, nhead,
                        encoder_attn_mask=None, decoder_attn_mask=None):
    B, Le, D = encoder_in.shape
    Ld = decoder_in.shape[1]
    H = nhead
    Dh = D // H
    enc_causal, enc_mask = _norm_mask(encoder_attn_mask)
    dec_causal, dec_mask = _norm_mask(decoder_attn_mask)

    x = encoder_in.reshape(B * Le, D)
    for lp in params["enc"]:
        x = _encoder_block(lp, x, B, Le, H, Dh, enc_causal, enc_mask)
    enc2d = x

    x = decoder_in.reshape(B * Ld, D)
    for lp in params["dec"]:
        x = _decoder_block(lp, x, enc2d, B, Ld, Le, H, Dh, dec_causal, dec_mask)

    # Final LN fused into the output projection.  The vocab projection is
    # padded to a 128-lane multiple so the kernel writes lane-dense tiles
    # (unmasked vst); sliced back to V outside the kernel.
    w_out, b_out = params["out"]["w"], params["out"]["b"]
    V = w_out.shape[1]
    Vp = max(128, ((V + 127) // 128) * 128)
    if Vp != V:
        w_out = jnp.pad(w_out, ((0, 0), (0, Vp - V)))
        b_out = jnp.pad(b_out, (0, Vp - V))
    logits = ln_linear(x, params["final_norm"]["g"], params["final_norm"]["b"],
                       w_out, b_out)
    return logits[:, :V].reshape(B, Ld, V)


# ------------------------------ parameter init ------------------------------

def init_transformer_params(key, vocab, nlayer, ndim, ndim_ff):
    keys = iter(jax.random.split(key, 256))

    def lin(din, dout):   # nn.Linear init from _ini_para: N(0, 0.02), bias 0
        return {"w": 0.02 * jax.random.normal(next(keys), (din, dout), jnp.float32),
                "b": jnp.zeros((dout,), jnp.float32)}

    def lin_cat(din, douts):  # fused projections: independent inits concatenated
        ws = [0.02 * jax.random.normal(next(keys), (din, d), jnp.float32)
              for d in douts]
        return {"w": jnp.concatenate(ws, axis=1),
                "b": jnp.zeros((sum(douts),), jnp.float32)}

    def ln(d):            # nn.LayerNorm init from _ini_para: weight N(0,0.02), bias 0
        return {"g": 0.02 * jax.random.normal(next(keys), (d,), jnp.float32),
                "b": jnp.zeros((d,), jnp.float32)}

    enc = [{"norm1": ln(ndim),
            "wqkv": lin_cat(ndim, [ndim, ndim, ndim]),
            "wo": lin(ndim, ndim),
            "norm2": ln(ndim),
            "ff1": lin(ndim, ndim_ff), "ff2": lin(ndim_ff, ndim)}
           for _ in range(nlayer[0])]
    dec = [{"norm1": ln(ndim),
            "wqkv": lin_cat(ndim, [ndim, ndim, ndim]),
            "wo_self": lin(ndim, ndim),
            "norm2": ln(ndim),
            "wq_cross": lin(ndim, ndim),
            "wkv_cross": lin_cat(ndim, [ndim, ndim]),
            "wo_cross": lin(ndim, ndim),
            "norm3": ln(ndim),
            "ff1": lin(ndim, ndim_ff), "ff2": lin(ndim_ff, ndim)}
           for _ in range(nlayer[1])]
    return {"enc": enc, "dec": dec, "final_norm": ln(ndim),
            "out": lin(ndim, vocab)}


# --------------------------- pure-JAX reference ------------------------------

def reference_forward(params, enc_in, dec_in, nhead, dec_causal=True):
    HP = lax.Precision.HIGHEST

    def lin(x, p):
        return jnp.einsum("...i,io->...o", x, p["w"], precision=HP) + p["b"]

    def ln_ref(x, p):
        m = x.mean(-1, keepdims=True)
        v = ((x - m) ** 2).mean(-1, keepdims=True)
        return (x - m) * lax.rsqrt(v + 1e-5) * p["g"] + p["b"]

    def attn(q, k, v, causal):
        B, Lq, D = q.shape
        Lk = k.shape[1]
        Dh = D // nhead
        qh = q.reshape(B, Lq, nhead, Dh).transpose(0, 2, 1, 3)
        kh = k.reshape(B, Lk, nhead, Dh).transpose(0, 2, 1, 3)
        vh = v.reshape(B, Lk, nhead, Dh).transpose(0, 2, 1, 3)
        s = jnp.einsum("bhqd,bhkd->bhqk", qh, kh, precision=HP) / math.sqrt(Dh)
        if causal:
            row = jnp.arange(Lq)[:, None]
            col = jnp.arange(Lk)[None, :]
            s = s + jnp.where(col <= row, 0.0, -1e9)
        p = jax.nn.softmax(s, axis=-1)
        o = jnp.einsum("bhqk,bhkd->bhqd", p, vh, precision=HP)
        return o.transpose(0, 2, 1, 3).reshape(B, Lq, D)

    D = enc_in.shape[-1]
    x = enc_in
    for p in params["enc"]:
        y = ln_ref(x, p["norm1"])
        qkv = lin(y, p["wqkv"])
        x = x + lin(attn(qkv[..., :D], qkv[..., D:2 * D], qkv[..., 2 * D:],
                         False), p["wo"])
        y = ln_ref(x, p["norm2"])
        x = x + lin(jax.nn.relu(lin(y, p["ff1"])), p["ff2"])
    enc_out = x

    x = dec_in
    for p in params["dec"]:
        y = ln_ref(x, p["norm1"])
        qkv = lin(y, p["wqkv"])
        x = x + lin(attn(qkv[..., :D], qkv[..., D:2 * D], qkv[..., 2 * D:],
                         dec_causal), p["wo_self"])
        y = ln_ref(x, p["norm2"])
        q = lin(y, p["wq_cross"])
        kv = lin(enc_out, p["wkv_cross"])
        x = x + lin(attn(q, kv[..., :D], kv[..., D:], False), p["wo_cross"])
        y = ln_ref(x, p["norm3"])
        x = x + lin(jax.nn.relu(lin(y, p["ff1"])), p["ff2"])

    x = ln_ref(x, params["final_norm"])
    return lin(x, params["out"])


# ----------------------------------- main -----------------------------------

if __name__ == "__main__":
    VOCAB = 16
    NLAYER = (2, 2)
    NHEAD = 4
    NDIM = 128
    NDIM_FF = 256
    B, L = 2, 16

    key = jax.random.PRNGKey(0)
    kp, ke, kd = jax.random.split(key, 3)
    params = init_transformer_params(kp, VOCAB, NLAYER, NDIM, NDIM_FF)

    encoder_in = jax.random.normal(ke, (B, L, NDIM), jnp.float32)
    decoder_in = jax.random.normal(kd, (B, L, NDIM), jnp.float32)

    @jax.jit
    def fwd(p, ei, di):
        # Decoder self-attention uses an in-kernel causal additive mask.
        return transformer_forward(p, ei, di, NHEAD,
                                   encoder_attn_mask=None,
                                   decoder_attn_mask="causal")

    logits = fwd(params, encoder_in, decoder_in)
    jax.block_until_ready(logits)
    assert logits.shape == (B, L, VOCAB), logits.shape
    assert bool(jnp.all(jnp.isfinite(logits)))

    # Correctness check against a pure-JAX f32 reference of the same forward
    # pass.  Tolerance accounts for bf16 MXU operands (f32 accumulation) and
    # the approximate-reciprocal softmax normalization.
    ref = reference_forward(params, encoder_in, decoder_in, NHEAD, dec_causal=True)
    err = float(jnp.max(jnp.abs(logits - ref)))
    scale = float(jnp.max(jnp.abs(ref)))
    assert err <= 1e-3 + 3e-2 * scale, (err, scale)

    print("KERNEL_OK")
</pallas_src>

<mosaic_0001>
module attributes {stable_mosaic.version = 11 : i64} {
  func.func @kernel(%arg0: i32, %arg1: i32, %arg2: memref<16x128xf32, #tpu.memory_space<vmem>>, %arg3: memref<1x128xf32, #tpu.memory_space<vmem>>, %arg4: memref<1x128xf32, #tpu.memory_space<vmem>>, %arg5: memref<128x384xf32, #tpu.memory_space<vmem>>, %arg6: memref<1x384xf32, #tpu.memory_space<vmem>>, %arg7: memref<16x384xf32, #tpu.memory_space<vmem>>) attributes {dimension_semantics = [#tpu.dimension_semantics<parallel>, #tpu.dimension_semantics<parallel>], iteration_bounds = array<i64: 2, 1>, scalar_prefetch = 0 : i64, scratch_operands = 0 : i64, tpu.core_type = #tpu.core_type<tc>, window_params = [{transform_indices = @transform_0, window_bounds = array<i64: 16, 128>}, {pipeline_mode = #tpu.pipeline_mode<synchronous>, transform_indices = @transform_1, window_bounds = array<i64: 1, 128>}, {pipeline_mode = #tpu.pipeline_mode<synchronous>, transform_indices = @transform_2, window_bounds = array<i64: 1, 128>}, {transform_indices = @transform_3, window_bounds = array<i64: 128, 384>}, {transform_indices = @transform_4, window_bounds = array<i64: 1, 384>}, {transform_indices = @transform_5, window_bounds = array<i64: 16, 384>}]} {
    %c0 = arith.constant 0 : index
    %c0_0 = arith.constant 0 : index
    %0 = vector.load %arg2[%c0, %c0_0] : memref<16x128xf32, #tpu.memory_space<vmem>>, vector<16x128xf32>
    %cst = arith.constant dense<0.000000e+00> : vector<16xf32>
    %1 = vector.multi_reduction <add>, %0, %cst [1] : vector<16x128xf32> to vector<16xf32>
    %2 = vector.shape_cast %1 : vector<16xf32> to vector<16x1xf32>
    %cst_1 = arith.constant 1.280000e+02 : f32
    %3 = vector.broadcast %cst_1 : f32 to vector<16x1xf32>
    %4 = arith.divf %2, %3 : vector<16x1xf32>
    %5 = vector.broadcast %4 : vector<16x1xf32> to vector<16x128xf32>
    %6 = arith.subf %0, %5 : vector<16x128xf32>
    %7 = arith.mulf %6, %6 : vector<16x128xf32>
    %cst_2 = arith.constant dense<0.000000e+00> : vector<16xf32>
    %8 = vector.multi_reduction <add>, %7, %cst_2 [1] : vector<16x128xf32> to vector<16xf32>
    %9 = vector.shape_cast %8 : vector<16xf32> to vector<16x1xf32>
    %cst_3 = arith.constant 1.280000e+02 : f32
    %10 = vector.broadcast %cst_3 : f32 to vector<16x1xf32>
    %11 = arith.divf %9, %10 : vector<16x1xf32>
    %12 = vector.broadcast %4 : vector<16x1xf32> to vector<16x128xf32>
    %13 = arith.subf %0, %12 : vector<16x128xf32>
    %cst_4 = arith.constant 9.99999974E-6 : f32
    %14 = vector.broadcast %cst_4 : f32 to vector<16x1xf32>
    %15 = arith.addf %11, %14 : vector<16x1xf32>
    %16 = math.rsqrt %15 : vector<16x1xf32>
    %17 = vector.broadcast %16 : vector<16x1xf32> to vector<16x128xf32>
    %18 = arith.mulf %13, %17 : vector<16x128xf32>
    %c0_5 = arith.constant 0 : index
    %c0_6 = arith.constant 0 : index
    %19 = vector.load %arg3[%c0_5, %c0_6] : memref<1x128xf32, #tpu.memory_space<vmem>>, vector<1x128xf32>
    %20 = vector.broadcast %19 : vector<1x128xf32> to vector<16x128xf32>
    %21 = arith.mulf %18, %20 : vector<16x128xf32>
    %c0_7 = arith.constant 0 : index
    %c0_8 = arith.constant 0 : index
    %22 = vector.load %arg4[%c0_7, %c0_8] : memref<1x128xf32, #tpu.memory_space<vmem>>, vector<1x128xf32>
    %23 = vector.broadcast %22 : vector<1x128xf32> to vector<16x128xf32>
    %24 = arith.addf %21, %23 : vector<16x128xf32>
    %25 = arith.truncf %24 : vector<16x128xf32> to vector<16x128xbf16>
    %c0_9 = arith.constant 0 : index
    %c0_10 = arith.constant 0 : index
    %26 = vector.load %arg5[%c0_9, %c0_10] : memref<128x384xf32, #tpu.memory_space<vmem>>, vector<128x384xf32>
    %27 = arith.truncf %26 : vector<128x384xf32> to vector<128x384xbf16>
    %cst_11 = arith.constant dense<0.000000e+00> : vector<16x384xf32>
    %28 = tpu.matmul %25, %27, %cst_11 {dimension_numbers = #tpu.dot_dimension_numbers<[1], [0], [0], [1], [0, 0, 1, 1], [], []>} : vector<16x128xbf16>, vector<128x384xbf16>, vector<16x384xf32> -> vector<16x384xf32>
    %c0_12 = arith.constant 0 : index
    %c0_13 = arith.constant 0 : index
    %29 = vector.load %arg6[%c0_12, %c0_13] : memref<1x384xf32, #tpu.memory_space<vmem>>, vector<1x384xf32>
    %30 = vector.broadcast %29 : vector<1x384xf32> to vector<16x384xf32>
    %31 = arith.addf %28, %30 : vector<16x384xf32>
    %c0_14 = arith.constant 0 : index
    %c0_15 = arith.constant 0 : index
    %32 = vector.load %arg7[%c0_14, %c0_15] : memref<16x384xf32, #tpu.memory_space<vmem>>, vector<16x384xf32>
    tpu.vector_store %arg7[%c0_14, %c0_15], %31 {strides = array<i32>} : memref<16x384xf32, #tpu.memory_space<vmem>>, vector<16x384xf32>,
    return
  }
  func.func @transform_0(%arg0: i32, %arg1: i32) -> (i32, i32) {
    %c0_i32 = arith.constant 0 : i32
    %c0_i32_0 = arith.constant 0 : i32
    return %arg0, %c0_i32 : i32, i32
  }
  func.func @transform_1(%arg0: i32, %arg1: i32) -> (i32, i32) {
    %c0_i32 = arith.constant 0 : i32
    %c0_i32_0 = arith.constant 0 : i32
    %c0_i32_1 = arith.constant 0 : i32
    return %c0_i32, %c0_i32_0 : i32, i32
  }
  func.func @transform_2(%arg0: i32, %arg1: i32) -> (i32, i32) {
    %c0_i32 = arith.constant 0 : i32
    %c0_i32_0 = arith.constant 0 : i32
    %c0_i32_1 = arith.constant 0 : i32
    return %c0_i32, %c0_i32_0 : i32, i32
  }
  func.func @transform_3(%arg0: i32, %arg1: i32) -> (i32, i32) {
    %c0_i32 = arith.constant 0 : i32
    %c0_i32_0 = arith.constant 0 : i32
    return %c0_i32, %arg1 : i32, i32
  }
  func.func @transform_4(%arg0: i32, %arg1: i32) -> (i32, i32) {
    %c0_i32 = arith.constant 0 : i32
    %c0_i32_0 = arith.constant 0 : i32
    return %c0_i32, %arg1 : i32, i32
  }
  func.func @transform_5(%arg0: i32, %arg1: i32) -> (i32, i32) {
    %c0_i32 = arith.constant 0 : i32
    return %arg0, %arg1 : i32, i32
  }
}

module attributes {stable_mosaic.version = 11 : i64} {
  func.func @kernel(%arg0: i32, %arg1: memref<16x384xf32, #tpu.memory_space<vmem>>, %arg2: memref<16x128xf32, #tpu.memory_space<vmem>>) attributes {dimension_semantics = [#tpu.dimension_semantics<parallel>], iteration_bounds = array<i64: 2>, scalar_prefetch = 0 : i64, scratch_operands = 0 : i64, tpu.core_type = #tpu.core_type<tc>, window_params = [{transform_indices = @transform_0, window_bounds = array<i64: 16, 384>}, {transform_indices = @transform_1, window_bounds = array<i64: 16, 128>}]} {
    %c0 = arith.constant 0 : index
    %c0_0 = arith.constant 0 : index
    %0 = vector.load %arg1[%c0, %c0_0] : memref<16x384xf32, #tpu.memory_space<vmem>>, vector<16x32xf32>
    %c0_1 = arith.constant 0 : index
    %c128 = arith.constant 128 : index
    %1 = vector.load %arg1[%c0_1, %c128] : memref<16x384xf32, #tpu.memory_space<vmem>>, vector<16x32xf32>
    %2 = arith.truncf %1 : vector<16x32xf32> to vector<16x32xbf16>
    %c0_2 = arith.constant 0 : index
    %c256 = arith.constant 256 : index
    %3 = vector.load %arg1[%c0_2, %c256] : memref<16x384xf32, #tpu.memory_space<vmem>>, vector<16x32xf32>
    %4 = arith.truncf %3 : vector<16x32xf32> to vector<16x32xbf16>
    %cst = arith.constant 0.176776692 : f32
    %5 = vector.broadcast %cst : f32 to vector<16x32xf32>
    %6 = arith.mulf %0, %5 : vector<16x32xf32>
    %7 = arith.truncf %6 : vector<16x32xf32> to vector<16x32xbf16>
    %cst_3 = arith.constant dense<0.000000e+00> : vector<16x16xf32>
    %8 = tpu.matmul %7, %2, %cst_3 {dimension_numbers = #tpu.dot_dimension_numbers<[1], [1], [0], [0], [0, 0, 1, 0], [], []>} : vector<16x32xbf16>, vector<16x32xbf16>, vector<16x16xf32> -> vector<16x16xf32>
    %cst_4 = arith.constant dense<0xFF800000> : vector<16xf32>
    %9 = vector.multi_reduction <maximumf>, %8, %cst_4 [1] : vector<16x16xf32> to vector<16xf32>
    %10 = vector.shape_cast %9 : vector<16xf32> to vector<16x1xf32>
    %11 = vector.broadcast %10 : vector<16x1xf32> to vector<16x16xf32>
    %12 = arith.subf %8, %11 : vector<16x16xf32>
    %13 = math.exp %12 : vector<16x16xf32>
    %cst_5 = arith.constant dense<0.000000e+00> : vector<16xf32>
    %14 = vector.multi_reduction <add>, %13, %cst_5 [1] : vector<16x16xf32> to vector<16xf32>
    %15 = vector.shape_cast %14 : vector<16xf32> to vector<16x1xf32>
    %16 = tpu.reciprocal %15 {approx = true} : vector<16x1xf32> -> vector<16x1xf32>
    %17 = vector.broadcast %16 : vector<16x1xf32> to vector<16x16xf32>
    %18 = arith.mulf %13, %17 : vector<16x16xf32>
    %19 = arith.truncf %18 : vector<16x16xf32> to vector<16x16xbf16>
    %cst_6 = arith.constant dense<0.000000e+00> : vector<16x32xf32>
    %20 = tpu.matmul %19, %4, %cst_6 {dimension_numbers = #tpu.dot_dimension_numbers<[1], [0], [0], [1], [0, 0, 1, 1], [], []>} : vector<16x16xbf16>, vector<16x32xbf16>, vector<16x32xf32> -> vector<16x32xf32>
    %c0_7 = arith.constant 0 : index
    %c0_8 = arith.constant 0 : index
    %21 = vector.load %arg2[%c0_7, %c0_8] : memref<16x128xf32, #tpu.memory_space<vmem>>, vector<16x32xf32>
    tpu.vector_store %arg2[%c0_7, %c0_8], %20 {strides = array<i32>} : memref<16x128xf32, #tpu.memory_space<vmem>>, vector<16x32xf32>,
    %c0_9 = arith.constant 0 : index
    %c32 = arith.constant 32 : index
    %22 = vector.load %arg1[%c0_9, %c32] : memref<16x384xf32, #tpu.memory_space<vmem>>, vector<16x32xf32>
    %c0_10 = arith.constant 0 : index
    %c160 = arith.constant 160 : index
    %23 = vector.load %arg1[%c0_10, %c160] : memref<16x384xf32, #tpu.memory_space<vmem>>, vector<16x32xf32>
    %24 = arith.truncf %23 : vector<16x32xf32> to vector<16x32xbf16>
    %c0_11 = arith.constant 0 : index
    %c288 = arith.constant 288 : index
    %25 = vector.load %arg1[%c0_11, %c288] : memref<16x384xf32, #tpu.memory_space<vmem>>, vector<16x32xf32>
    %26 = arith.truncf %25 : vector<16x32xf32> to vector<16x32xbf16>
    %cst_12 = arith.constant 0.176776692 : f32
    %27 = vector.broadcast %cst_12 : f32 to vector<16x32xf32>
    %28 = arith.mulf %22, %27 : vector<16x32xf32>
    %29 = arith.truncf %28 : vector<16x32xf32> to vector<16x32xbf16>
    %cst_13 = arith.constant dense<0.000000e+00> : vector<16x16xf32>
    %30 = tpu.matmul %29, %24, %cst_13 {dimension_numbers = #tpu.dot_dimension_numbers<[1], [1], [0], [0], [0, 0, 1, 0], [], []>} : vector<16x32xbf16>, vector<16x32xbf16>, vector<16x16xf32> -> vector<16x16xf32>
    %cst_14 = arith.constant dense<0xFF800000> : vector<16xf32>
    %31 = vector.multi_reduction <maximumf>, %30, %cst_14 [1] : vector<16x16xf32> to vector<16xf32>
    %32 = vector.shape_cast %31 : vector<16xf32> to vector<16x1xf32>
    %33 = vector.broadcast %32 : vector<16x1xf32> to vector<16x16xf32>
    %34 = arith.subf %30, %33 : vector<16x16xf32>
    %35 = math.exp %34 : vector<16x16xf32>
    %cst_15 = arith.constant dense<0.000000e+00> : vector<16xf32>
    %36 = vector.multi_reduction <add>, %35, %cst_15 [1] : vector<16x16xf32> to vector<16xf32>
    %37 = vector.shape_cast %36 : vector<16xf32> to vector<16x1xf32>
    %38 = tpu.reciprocal %37 {approx = true} : vector<16x1xf32> -> vector<16x1xf32>
    %39 = vector.broadcast %38 : vector<16x1xf32> to vector<16x16xf32>
    %40 = arith.mulf %35, %39 : vector<16x16xf32>
    %41 = arith.truncf %40 : vector<16x16xf32> to vector<16x16xbf16>
    %cst_16 = arith.constant dense<0.000000e+00> : vector<16x32xf32>
    %42 = tpu.matmul %41, %26, %cst_16 {dimension_numbers = #tpu.dot_dimension_numbers<[1], [0], [0], [1], [0, 0, 1, 1], [], []>} : vector<16x16xbf16>, vector<16x32xbf16>, vector<16x32xf32> -> vector<16x32xf32>
    %c0_17 = arith.constant 0 : index
    %c32_18 = arith.constant 32 : index
    %43 = vector.load %arg2[%c0_17, %c32_18] : memref<16x128xf32, #tpu.memory_space<vmem>>, vector<16x32xf32>
    tpu.vector_store %arg2[%c0_17, %c32_18], %42 {strides = array<i32>} : memref<16x128xf32, #tpu.memory_space<vmem>>, vector<16x32xf32>,
    %c0_19 = arith.constant 0 : index
    %c64 = arith.constant 64 : index
    %44 = vector.load %arg1[%c0_19, %c64] : memref<16x384xf32, #tpu.memory_space<vmem>>, vector<16x32xf32>
    %c0_20 = arith.constant 0 : index
    %c192 = arith.constant 192 : index
    %45 = vector.load %arg1[%c0_20, %c192] : memref<16x384xf32, #tpu.memory_space<vmem>>, vector<16x32xf32>
    %46 = arith.truncf %45 : vector<16x32xf32> to vector<16x32xbf16>
    %c0_21 = arith.constant 0 : index
    %c320 = arith.constant 320 : index
    %47 = vector.load %arg1[%c0_21, %c320] : memref<16x384xf32, #tpu.memory_space<vmem>>, vector<16x32xf32>
    %48 = arith.truncf %47 : vector<16x32xf32> to vector<16x32xbf16>
    %cst_22 = arith.constant 0.176776692 : f32
    %49 = vector.broadcast %cst_22 : f32 to vector<16x32xf32>
    %50 = arith.mulf %44, %49 : vector<16x32xf32>
    %51 = arith.truncf %50 : vector<16x32xf32> to vector<16x32xbf16>
    %cst_23 = arith.constant dense<0.000000e+00> : vector<16x16xf32>
    %52 = tpu.matmul %51, %46, %cst_23 {dimension_numbers = #tpu.dot_dimension_numbers<[1], [1], [0], [0], [0, 0, 1, 0], [], []>} : vector<16x32xbf16>, vector<16x32xbf16>, vector<16x16xf32> -> vector<16x16xf32>
    %cst_24 = arith.constant dense<0xFF800000> : vector<16xf32>
    %53 = vector.multi_reduction <maximumf>, %52, %cst_24 [1] : vector<16x16xf32> to vector<16xf32>
    %54 = vector.shape_cast %53 : vector<16xf32> to vector<16x1xf32>
    %55 = vector.broadcast %54 : vector<16x1xf32> to vector<16x16xf32>
    %56 = arith.subf %52, %55 : vector<16x16xf32>
    %57 = math.exp %56 : vector<16x16xf32>
    %cst_25 = arith.constant dense<0.000000e+00> : vector<16xf32>
    %58 = vector.multi_reduction <add>, %57, %cst_25 [1] : vector<16x16xf32> to vector<16xf32>
    %59 = vector.shape_cast %58 : vector<16xf32> to vector<16x1xf32>
    %60 = tpu.reciprocal %59 {approx = true} : vector<16x1xf32> -> vector<16x1xf32>
    %61 = vector.broadcast %60 : vector<16x1xf32> to vector<16x16xf32>
    %62 = arith.mulf %57, %61 : vector<16x16xf32>
    %63 = arith.truncf %62 : vector<16x16xf32> to vector<16x16xbf16>
    %cst_26 = arith.constant dense<0.000000e+00> : vector<16x32xf32>
    %64 = tpu.matmul %63, %48, %cst_26 {dimension_numbers = #tpu.dot_dimension_numbers<[1], [0], [0], [1], [0, 0, 1, 1], [], []>} : vector<16x16xbf16>, vector<16x32xbf16>, vector<16x32xf32> -> vector<16x32xf32>
    %c0_27 = arith.constant 0 : index
    %c64_28 = arith.constant 64 : index
    %65 = vector.load %arg2[%c0_27, %c64_28] : memref<16x128xf32, #tpu.memory_space<vmem>>, vector<16x32xf32>
    tpu.vector_store %arg2[%c0_27, %c64_28], %64 {strides = array<i32>} : memref<16x128xf32, #tpu.memory_space<vmem>>, vector<16x32xf32>,
    %c0_29 = arith.constant 0 : index
    %c96 = arith.constant 96 : index
    %66 = vector.load %arg1[%c0_29, %c96] : memref<16x384xf32, #tpu.memory_space<vmem>>, vector<16x32xf32>
    %c0_30 = arith.constant 0 : index
    %c224 = arith.constant 224 : index
    %67 = vector.load %arg1[%c0_30, %c224] : memref<16x384xf32, #tpu.memory_space<vmem>>, vector<16x32xf32>
    %68 = arith.truncf %67 : vector<16x32xf32> to vector<16x32xbf16>
    %c0_31 = arith.constant 0 : index
    %c352 = arith.constant 352 : index
    %69 = vector.load %arg1[%c0_31, %c352] : memref<16x384xf32, #tpu.memory_space<vmem>>, vector<16x32xf32>
    %70 = arith.truncf %69 : vector<16x32xf32> to vector<16x32xbf16>
    %cst_32 = arith.constant 0.176776692 : f32
    %71 = vector.broadcast %cst_32 : f32 to vector<16x32xf32>
    %72 = arith.mulf %66, %71 : vector<16x32xf32>
    %73 = arith.truncf %72 : vector<16x32xf32> to vector<16x32xbf16>
    %cst_33 = arith.constant dense<0.000000e+00> : vector<16x16xf32>
    %74 = tpu.matmul %73, %68, %cst_33 {dimension_numbers = #tpu.dot_dimension_numbers<[1], [1], [0], [0], [0, 0, 1, 0], [], []>} : vector<16x32xbf16>, vector<16x32xbf16>, vector<16x16xf32> -> vector<16x16xf32>
    %cst_34 = arith.constant dense<0xFF800000> : vector<16xf32>
    %75 = vector.multi_reduction <maximumf>, %74, %cst_34 [1] : vector<16x16xf32> to vector<16xf32>
    %76 = vector.shape_cast %75 : vector<16xf32> to vector<16x1xf32>
    %77 = vector.broadcast %76 : vector<16x1xf32> to vector<16x16xf32>
    %78 = arith.subf %74, %77 : vector<16x16xf32>
    %79 = math.exp %78 : vector<16x16xf32>
    %cst_35 = arith.constant dense<0.000000e+00> : vector<16xf32>
    %80 = vector.multi_reduction <add>, %79, %cst_35 [1] : vector<16x16xf32> to vector<16xf32>
    %81 = vector.shape_cast %80 : vector<16xf32> to vector<16x1xf32>
    %82 = tpu.reciprocal %81 {approx = true} : vector<16x1xf32> -> vector<16x1xf32>
    %83 = vector.broadcast %82 : vector<16x1xf32> to vector<16x16xf32>
    %84 = arith.mulf %79, %83 : vector<16x16xf32>
    %85 = arith.truncf %84 : vector<16x16xf32> to vector<16x16xbf16>
    %cst_36 = arith.constant dense<0.000000e+00> : vector<16x32xf32>
    %86 = tpu.matmul %85, %70, %cst_36 {dimension_numbers = #tpu.dot_dimension_numbers<[1], [0], [0], [1], [0, 0, 1, 1], [], []>} : vector<16x16xbf16>, vector<16x32xbf16>, vector<16x32xf32> -> vector<16x32xf32>
    %c0_37 = arith.constant 0 : index
    %c96_38 = arith.constant 96 : index
    %87 = vector.load %arg2[%c0_37, %c96_38] : memref<16x128xf32, #tpu.memory_space<vmem>>, vector<16x32xf32>
    tpu.vector_store %arg2[%c0_37, %c96_38], %86 {strides = array<i32>} : memref<16x128xf32, #tpu.memory_space<vmem>>, vector<16x32xf32>,
    return
  }
  func.func @transform_0(%arg0: i32) -> (i32, i32) {
    %c0_i32 = arith.constant 0 : i32
    %c0_i32_0 = arith.constant 0 : i32
    return %arg0, %c0_i32 : i32, i32
  }
  func.func @transform_1(%arg0: i32) -> (i32, i32) {
    %c0_i32 = arith.constant 0 : i32
    %c0_i32_0 = arith.constant 0 : i32
    return %arg0, %c0_i32 : i32, i32
  }
}

module attributes {stable_mosaic.version = 11 : i64} {
  func.func @kernel(%arg0: i32, %arg1: i32, %arg2: memref<16x128xf32, #tpu.memory_space<vmem>>, %arg3: memref<128x128xf32, #tpu.memory_space<vmem>>, %arg4: memref<1x128xf32, #tpu.memory_space<vmem>>, %arg5: memref<16x128xf32, #tpu.memory_space<vmem>>, %arg6: memref<16x128xf32, #tpu.memory_space<vmem>>) attributes {dimension_semantics = [#tpu.dimension_semantics<parallel>, #tpu.dimension_semantics<parallel>], iteration_bounds = array<i64: 2, 1>, scalar_prefetch = 0 : i64, scratch_operands = 0 : i64, tpu.core_type = #tpu.core_type<tc>, window_params = [{transform_indices = @transform_0, window_bounds = array<i64: 16, 128>}, {transform_indices = @transform_1, window_bounds = array<i64: 128, 128>}, {transform_indices = @transform_2, window_bounds = array<i64: 1, 128>}, {transform_indices = @transform_3, window_bounds = array<i64: 16, 128>}, {transform_indices = @transform_4, window_bounds = array<i64: 16, 128>}]} {
    %c0 = arith.constant 0 : index
    %c0_0 = arith.constant 0 : index
    %0 = vector.load %arg2[%c0, %c0_0] : memref<16x128xf32, #tpu.memory_space<vmem>>, vector<16x128xf32>
    %1 = arith.truncf %0 : vector<16x128xf32> to vector<16x128xbf16>
    %c0_1 = arith.constant 0 : index
    %c0_2 = arith.constant 0 : index
    %2 = vector.load %arg3[%c0_1, %c0_2] : memref<128x128xf32, #tpu.memory_space<vmem>>, vector<128x128xf32>
    %3 = arith.truncf %2 : vector<128x128xf32> to vector<128x128xbf16>
    %cst = arith.constant dense<0.000000e+00> : vector<16x128xf32>
    %4 = tpu.matmul %1, %3, %cst {dimension_numbers = #tpu.dot_dimension_numbers<[1], [0], [0], [1], [0, 0, 1, 1], [], []>} : vector<16x128xbf16>, vector<128x128xbf16>, vector<16x128xf32> -> vector<16x128xf32>
    %c0_3 = arith.constant 0 : index
    %c0_4 = arith.constant 0 : index
    %5 = vector.load %arg4[%c0_3, %c0_4] : memref<1x128xf32, #tpu.memory_space<vmem>>, vector<1x128xf32>
    %6 = vector.broadcast %5 : vector<1x128xf32> to vector<16x128xf32>
    %7 = arith.addf %4, %6 : vector<16x128xf32>
    %c0_5 = arith.constant 0 : index
    %c0_6 = arith.constant 0 : index
    %8 = vector.load %arg5[%c0_5, %c0_6] : memref<16x128xf32, #tpu.memory_space<vmem>>, vector<16x128xf32>
    %9 = arith.addf %7, %8 : vector<16x128xf32>
    %c0_7 = arith.constant 0 : index
    %c0_8 = arith.constant 0 : index
    %10 = vector.load %arg6[%c0_7, %c0_8] : memref<16x128xf32, #tpu.memory_space<vmem>>, vector<16x128xf32>
    tpu.vector_store %arg6[%c0_7, %c0_8], %9 {strides = array<i32>} : memref<16x128xf32, #tpu.memory_space<vmem>>, vector<16x128xf32>,
    return
  }
  func.func @transform_0(%arg0: i32, %arg1: i32) -> (i32, i32) {
    %c0_i32 = arith.constant 0 : i32
    %c0_i32_0 = arith.constant 0 : i32
    return %arg0, %c0_i32 : i32, i32
  }
  func.func @transform_1(%arg0: i32, %arg1: i32) -> (i32, i32) {
    %c0_i32 = arith.constant 0 : i32
    %c0_i32_0 = arith.constant 0 : i32
    return %c0_i32, %arg1 : i32, i32
  }
  func.func @transform_2(%arg0: i32, %arg1: i32) -> (i32, i32) {
    %c0_i32 = arith.constant 0 : i32
    %c0_i32_0 = arith.constant 0 : i32
    return %c0_i32, %arg1 : i32, i32
  }
  func.func @transform_3(%arg0: i32, %arg1: i32) -> (i32, i32) {
    %c0_i32 = arith.constant 0 : i32
    return %arg0, %arg1 : i32, i32
  }
  func.func @transform_4(%arg0: i32, %arg1: i32) -> (i32, i32) {
    %c0_i32 = arith.constant 0 : i32
    return %arg0, %arg1 : i32, i32
  }
}

module attributes {stable_mosaic.version = 11 : i64} {
  func.func @kernel(%arg0: i32, %arg1: i32, %arg2: memref<16x128xf32, #tpu.memory_space<vmem>>, %arg3: memref<1x128xf32, #tpu.memory_space<vmem>>, %arg4: memref<1x128xf32, #tpu.memory_space<vmem>>, %arg5: memref<128x256xf32, #tpu.memory_space<vmem>>, %arg6: memref<1x256xf32, #tpu.memory_space<vmem>>, %arg7: memref<16x256xf32, #tpu.memory_space<vmem>>) attributes {dimension_semantics = [#tpu.dimension_semantics<parallel>, #tpu.dimension_semantics<parallel>], iteration_bounds = array<i64: 2, 1>, scalar_prefetch = 0 : i64, scratch_operands = 0 : i64, tpu.core_type = #tpu.core_type<tc>, window_params = [{transform_indices = @transform_0, window_bounds = array<i64: 16, 128>}, {pipeline_mode = #tpu.pipeline_mode<synchronous>, transform_indices = @transform_1, window_bounds = array<i64: 1, 128>}, {pipeline_mode = #tpu.pipeline_mode<synchronous>, transform_indices = @transform_2, window_bounds = array<i64: 1, 128>}, {transform_indices = @transform_3, window_bounds = array<i64: 128, 256>}, {transform_indices = @transform_4, window_bounds = array<i64: 1, 256>}, {transform_indices = @transform_5, window_bounds = array<i64: 16, 256>}]} {
    %c0 = arith.constant 0 : index
    %c0_0 = arith.constant 0 : index
    %0 = vector.load %arg2[%c0, %c0_0] : memref<16x128xf32, #tpu.memory_space<vmem>>, vector<16x128xf32>
    %cst = arith.constant dense<0.000000e+00> : vector<16xf32>
    %1 = vector.multi_reduction <add>, %0, %cst [1] : vector<16x128xf32> to vector<16xf32>
    %2 = vector.shape_cast %1 : vector<16xf32> to vector<16x1xf32>
    %cst_1 = arith.constant 1.280000e+02 : f32
    %3 = vector.broadcast %cst_1 : f32 to vector<16x1xf32>
    %4 = arith.divf %2, %3 : vector<16x1xf32>
    %5 = vector.broadcast %4 : vector<16x1xf32> to vector<16x128xf32>
    %6 = arith.subf %0, %5 : vector<16x128xf32>
    %7 = arith.mulf %6, %6 : vector<16x128xf32>
    %cst_2 = arith.constant dense<0.000000e+00> : vector<16xf32>
    %8 = vector.multi_reduction <add>, %7, %cst_2 [1] : vector<16x128xf32> to vector<16xf32>
    %9 = vector.shape_cast %8 : vector<16xf32> to vector<16x1xf32>
    %cst_3 = arith.constant 1.280000e+02 : f32
    %10 = vector.broadcast %cst_3 : f32 to vector<16x1xf32>
    %11 = arith.divf %9, %10 : vector<16x1xf32>
    %12 = vector.broadcast %4 : vector<16x1xf32> to vector<16x128xf32>
    %13 = arith.subf %0, %12 : vector<16x128xf32>
    %cst_4 = arith.constant 9.99999974E-6 : f32
    %14 = vector.broadcast %cst_4 : f32 to vector<16x1xf32>
    %15 = arith.addf %11, %14 : vector<16x1xf32>
    %16 = math.rsqrt %15 : vector<16x1xf32>
    %17 = vector.broadcast %16 : vector<16x1xf32> to vector<16x128xf32>
    %18 = arith.mulf %13, %17 : vector<16x128xf32>
    %c0_5 = arith.constant 0 : index
    %c0_6 = arith.constant 0 : index
    %19 = vector.load %arg3[%c0_5, %c0_6] : memref<1x128xf32, #tpu.memory_space<vmem>>, vector<1x128xf32>
    %20 = vector.broadcast %19 : vector<1x128xf32> to vector<16x128xf32>
    %21 = arith.mulf %18, %20 : vector<16x128xf32>
    %c0_7 = arith.constant 0 : index
    %c0_8 = arith.constant 0 : index
    %22 = vector.load %arg4[%c0_7, %c0_8] : memref<1x128xf32, #tpu.memory_space<vmem>>, vector<1x128xf32>
    %23 = vector.broadcast %22 : vector<1x128xf32> to vector<16x128xf32>
    %24 = arith.addf %21, %23 : vector<16x128xf32>
    %25 = arith.truncf %24 : vector<16x128xf32> to vector<16x128xbf16>
    %c0_9 = arith.constant 0 : index
    %c0_10 = arith.constant 0 : index
    %26 = vector.load %arg5[%c0_9, %c0_10] : memref<128x256xf32, #tpu.memory_space<vmem>>, vector<128x256xf32>
    %27 = arith.truncf %26 : vector<128x256xf32> to vector<128x256xbf16>
    %cst_11 = arith.constant dense<0.000000e+00> : vector<16x256xf32>
    %28 = tpu.matmul %25, %27, %cst_11 {dimension_numbers = #tpu.dot_dimension_numbers<[1], [0], [0], [1], [0, 0, 1, 1], [], []>} : vector<16x128xbf16>, vector<128x256xbf16>, vector<16x256xf32> -> vector<16x256xf32>
    %c0_12 = arith.constant 0 : index
    %c0_13 = arith.constant 0 : index
    %29 = vector.load %arg6[%c0_12, %c0_13] : memref<1x256xf32, #tpu.memory_space<vmem>>, vector<1x256xf32>
    %30 = vector.broadcast %29 : vector<1x256xf32> to vector<16x256xf32>
    %31 = arith.addf %28, %30 : vector<16x256xf32>
    %cst_14 = arith.constant 0.000000e+00 : f32
    %32 = vector.broadcast %cst_14 : f32 to vector<16x256xf32>
    %33 = arith.maximumf %31, %32 : vector<16x256xf32>
    %c0_15 = arith.constant 0 : index
    %c0_16 = arith.constant 0 : index
    %34 = vector.load %arg7[%c0_15, %c0_16] : memref<16x256xf32, #tpu.memory_space<vmem>>, vector<16x256xf32>
    tpu.vector_store %arg7[%c0_15, %c0_16], %33 {strides = array<i32>} : memref<16x256xf32, #tpu.memory_space<vmem>>, vector<16x256xf32>,
    return
  }
  func.func @transform_0(%arg0: i32, %arg1: i32) -> (i32, i32) {
    %c0_i32 = arith.constant 0 : i32
    %c0_i32_0 = arith.constant 0 : i32
    return %arg0, %c0_i32 : i32, i32
  }
  func.func @transform_1(%arg0: i32, %arg1: i32) -> (i32, i32) {
    %c0_i32 = arith.constant 0 : i32
    %c0_i32_0 = arith.constant 0 : i32
    %c0_i32_1 = arith.constant 0 : i32
    return %c0_i32, %c0_i32_0 : i32, i32
  }
  func.func @transform_2(%arg0: i32, %arg1: i32) -> (i32, i32) {
    %c0_i32 = arith.constant 0 : i32
    %c0_i32_0 = arith.constant 0 : i32
    %c0_i32_1 = arith.constant 0 : i32
    return %c0_i32, %c0_i32_0 : i32, i32
  }
  func.func @transform_3(%arg0: i32, %arg1: i32) -> (i32, i32) {
    %c0_i32 = arith.constant 0 : i32
    %c0_i32_0 = arith.constant 0 : i32
    return %c0_i32, %arg1 : i32, i32
  }
  func.func @transform_4(%arg0: i32, %arg1: i32) -> (i32, i32) {
    %c0_i32 = arith.constant 0 : i32
    %c0_i32_0 = arith.constant 0 : i32
    return %c0_i32, %arg1 : i32, i32
  }
  func.func @transform_5(%arg0: i32, %arg1: i32) -> (i32, i32) {
    %c0_i32 = arith.constant 0 : i32
    return %arg0, %arg1 : i32, i32
  }
}

module attributes {stable_mosaic.version = 11 : i64} {
  func.func @kernel(%arg0: i32, %arg1: i32, %arg2: memref<16x256xf32, #tpu.memory_space<vmem>>, %arg3: memref<256x128xf32, #tpu.memory_space<vmem>>, %arg4: memref<1x128xf32, #tpu.memory_space<vmem>>, %arg5: memref<16x128xf32, #tpu.memory_space<vmem>>, %arg6: memref<16x128xf32, #tpu.memory_space<vmem>>) attributes {dimension_semantics = [#tpu.dimension_semantics<parallel>, #tpu.dimension_semantics<parallel>], iteration_bounds = array<i64: 2, 1>, scalar_prefetch = 0 : i64, scratch_operands = 0 : i64, tpu.core_type = #tpu.core_type<tc>, window_params = [{transform_indices = @transform_0, window_bounds = array<i64: 16, 256>}, {transform_indices = @transform_1, window_bounds = array<i64: 256, 128>}, {transform_indices = @transform_2, window_bounds = array<i64: 1, 128>}, {transform_indices = @transform_3, window_bounds = array<i64: 16, 128>}, {transform_indices = @transform_4, window_bounds = array<i64: 16, 128>}]} {
    %c0 = arith.constant 0 : index
    %c0_0 = arith.constant 0 : index
    %0 = vector.load %arg2[%c0, %c0_0] : memref<16x256xf32, #tpu.memory_space<vmem>>, vector<16x256xf32>
    %1 = arith.truncf %0 : vector<16x256xf32> to vector<16x256xbf16>
    %c0_1 = arith.constant 0 : index
    %c0_2 = arith.constant 0 : index
    %2 = vector.load %arg3[%c0_1, %c0_2] : memref<256x128xf32, #tpu.memory_space<vmem>>, vector<256x128xf32>
    %3 = arith.truncf %2 : vector<256x128xf32> to vector<256x128xbf16>
    %cst = arith.constant dense<0.000000e+00> : vector<16x128xf32>
    %4 = tpu.matmul %1, %3, %cst {dimension_numbers = #tpu.dot_dimension_numbers<[1], [0], [0], [1], [0, 0, 1, 1], [], []>} : vector<16x256xbf16>, vector<256x128xbf16>, vector<16x128xf32> -> vector<16x128xf32>
    %c0_3 = arith.constant 0 : index
    %c0_4 = arith.constant 0 : index
    %5 = vector.load %arg4[%c0_3, %c0_4] : memref<1x128xf32, #tpu.memory_space<vmem>>, vector<1x128xf32>
    %6 = vector.broadcast %5 : vector<1x128xf32> to vector<16x128xf32>
    %7 = arith.addf %4, %6 : vector<16x128xf32>
    %c0_5 = arith.constant 0 : index
    %c0_6 = arith.constant 0 : index
    %8 = vector.load %arg5[%c0_5, %c0_6] : memref<16x128xf32, #tpu.memory_space<vmem>>, vector<16x128xf32>
    %9 = arith.addf %7, %8 : vector<16x128xf32>
    %c0_7 = arith.constant 0 : index
    %c0_8 = arith.constant 0 : index
    %10 = vector.load %arg6[%c0_7, %c0_8] : memref<16x128xf32, #tpu.memory_space<vmem>>, vector<16x128xf32>
    tpu.vector_store %arg6[%c0_7, %c0_8], %9 {strides = array<i32>} : memref<16x128xf32, #tpu.memory_space<vmem>>, vector<16x128xf32>,
    return
  }
  func.func @transform_0(%arg0: i32, %arg1: i32) -> (i32, i32) {
    %c0_i32 = arith.constant 0 : i32
    %c0_i32_0 = arith.constant 0 : i32
    return %arg0, %c0_i32 : i32, i32
  }
  func.func @transform_1(%arg0: i32, %arg1: i32) -> (i32, i32) {
    %c0_i32 = arith.constant 0 : i32
    %c0_i32_0 = arith.constant 0 : i32
    return %c0_i32, %arg1 : i32, i32
  }
  func.func @transform_2(%arg0: i32, %arg1: i32) -> (i32, i32) {
    %c0_i32 = arith.constant 0 : i32
    %c0_i32_0 = arith.constant 0 : i32
    return %c0_i32, %arg1 : i32, i32
  }
  func.func @transform_3(%arg0: i32, %arg1: i32) -> (i32, i32) {
    %c0_i32 = arith.constant 0 : i32
    return %arg0, %arg1 : i32, i32
  }
  func.func @transform_4(%arg0: i32, %arg1: i32) -> (i32, i32) {
    %c0_i32 = arith.constant 0 : i32
    return %arg0, %arg1 : i32, i32
  }
}

module attributes {stable_mosaic.version = 11 : i64} {
  func.func @kernel(%arg0: i32, %arg1: i32, %arg2: memref<16x128xf32, #tpu.memory_space<vmem>>, %arg3: memref<1x128xf32, #tpu.memory_space<vmem>>, %arg4: memref<1x128xf32, #tpu.memory_space<vmem>>, %arg5: memref<128x384xf32, #tpu.memory_space<vmem>>, %arg6: memref<1x384xf32, #tpu.memory_space<vmem>>, %arg7: memref<16x384xf32, #tpu.memory_space<vmem>>) attributes {dimension_semantics = [#tpu.dimension_semantics<parallel>, #tpu.dimension_semantics<parallel>], iteration_bounds = array<i64: 2, 1>, scalar_prefetch = 0 : i64, scratch_operands = 0 : i64, tpu.core_type = #tpu.core_type<tc>, window_params = [{transform_indices = @transform_0, window_bounds = array<i64: 16, 128>}, {pipeline_mode = #tpu.pipeline_mode<synchronous>, transform_indices = @transform_1, window_bounds = array<i64: 1, 128>}, {pipeline_mode = #tpu.pipeline_mode<synchronous>, transform_indices = @transform_2, window_bounds = array<i64: 1, 128>}, {transform_indices = @transform_3, window_bounds = array<i64: 128, 384>}, {transform_indices = @transform_4, window_bounds = array<i64: 1, 384>}, {transform_indices = @transform_5, window_bounds = array<i64: 16, 384>}]} {
    %c0 = arith.constant 0 : index
    %c0_0 = arith.constant 0 : index
    %0 = vector.load %arg2[%c0, %c0_0] : memref<16x128xf32, #tpu.memory_space<vmem>>, vector<16x128xf32>
    %cst = arith.constant dense<0.000000e+00> : vector<16xf32>
    %1 = vector.multi_reduction <add>, %0, %cst [1] : vector<16x128xf32> to vector<16xf32>
    %2 = vector.shape_cast %1 : vector<16xf32> to vector<16x1xf32>
    %cst_1 = arith.constant 1.280000e+02 : f32
    %3 = vector.broadcast %cst_1 : f32 to vector<16x1xf32>
    %4 = arith.divf %2, %3 : vector<16x1xf32>
    %5 = vector.broadcast %4 : vector<16x1xf32> to vector<16x128xf32>
    %6 = arith.subf %0, %5 : vector<16x128xf32>
    %7 = arith.mulf %6, %6 : vector<16x128xf32>
    %cst_2 = arith.constant dense<0.000000e+00> : vector<16xf32>
    %8 = vector.multi_reduction <add>, %7, %cst_2 [1] : vector<16x128xf32> to vector<16xf32>
    %9 = vector.shape_cast %8 : vector<16xf32> to vector<16x1xf32>
    %cst_3 = arith.constant 1.280000e+02 : f32
    %10 = vector.broadcast %cst_3 : f32 to vector<16x1xf32>
    %11 = arith.divf %9, %10 : vector<16x1xf32>
    %12 = vector.broadcast %4 : vector<16x1xf32> to vector<16x128xf32>
    %13 = arith.subf %0, %12 : vector<16x128xf32>
    %cst_4 = arith.constant 9.99999974E-6 : f32
    %14 = vector.broadcast %cst_4 : f32 to vector<16x1xf32>
    %15 = arith.addf %11, %14 : vector<16x1xf32>
    %16 = math.rsqrt %15 : vector<16x1xf32>
    %17 = vector.broadcast %16 : vector<16x1xf32> to vector<16x128xf32>
    %18 = arith.mulf %13, %17 : vector<16x128xf32>
    %c0_5 = arith.constant 0 : index
    %c0_6 = arith.constant 0 : index
    %19 = vector.load %arg3[%c0_5, %c0_6] : memref<1x128xf32, #tpu.memory_space<vmem>>, vector<1x128xf32>
    %20 = vector.broadcast %19 : vector<1x128xf32> to vector<16x128xf32>
    %21 = arith.mulf %18, %20 : vector<16x128xf32>
    %c0_7 = arith.constant 0 : index
    %c0_8 = arith.constant 0 : index
    %22 = vector.load %arg4[%c0_7, %c0_8] : memref<1x128xf32, #tpu.memory_space<vmem>>, vector<1x128xf32>
    %23 = vector.broadcast %22 : vector<1x128xf32> to vector<16x128xf32>
    %24 = arith.addf %21, %23 : vector<16x128xf32>
    %25 = arith.truncf %24 : vector<16x128xf32> to vector<16x128xbf16>
    %c0_9 = arith.constant 0 : index
    %c0_10 = arith.constant 0 : index
    %26 = vector.load %arg5[%c0_9, %c0_10] : memref<128x384xf32, #tpu.memory_space<vmem>>, vector<128x384xf32>
    %27 = arith.truncf %26 : vector<128x384xf32> to vector<128x384xbf16>
    %cst_11 = arith.constant dense<0.000000e+00> : vector<16x384xf32>
    %28 = tpu.matmul %25, %27, %cst_11 {dimension_numbers = #tpu.dot_dimension_numbers<[1], [0], [0], [1], [0, 0, 1, 1], [], []>} : vector<16x128xbf16>, vector<128x384xbf16>, vector<16x384xf32> -> vector<16x384xf32>
    %c0_12 = arith.constant 0 : index
    %c0_13 = arith.constant 0 : index
    %29 = vector.load %arg6[%c0_12, %c0_13] : memref<1x384xf32, #tpu.memory_space<vmem>>, vector<1x384xf32>
    %30 = vector.broadcast %29 : vector<1x384xf32> to vector<16x384xf32>
    %31 = arith.addf %28, %30 : vector<16x384xf32>
    %c0_14 = arith.constant 0 : index
    %c0_15 = arith.constant 0 : index
    %32 = vector.load %arg7[%c0_14, %c0_15] : memref<16x384xf32, #tpu.memory_space<vmem>>, vector<16x384xf32>
    tpu.vector_store %arg7[%c0_14, %c0_15], %31 {strides = array<i32>} : memref<16x384xf32, #tpu.memory_space<vmem>>, vector<16x384xf32>,
    return
  }
  func.func @transform_0(%arg0: i32, %arg1: i32) -> (i32, i32) {
    %c0_i32 = arith.constant 0 : i32
    %c0_i32_0 = arith.constant 0 : i32
    return %arg0, %c0_i32 : i32, i32
  }
  func.func @transform_1(%arg0: i32, %arg1: i32) -> (i32, i32) {
    %c0_i32 = arith.constant 0 : i32
    %c0_i32_0 = arith.constant 0 : i32
    %c0_i32_1 = arith.constant 0 : i32
    return %c0_i32, %c0_i32_0 : i32, i32
  }
  func.func @transform_2(%arg0: i32, %arg1: i32) -> (i32, i32) {
    %c0_i32 = arith.constant 0 : i32
    %c0_i32_0 = arith.constant 0 : i32
    %c0_i32_1 = arith.constant 0 : i32
    return %c0_i32, %c0_i32_0 : i32, i32
  }
  func.func @transform_3(%arg0: i32, %arg1: i32) -> (i32, i32) {
    %c0_i32 = arith.constant 0 : i32
    %c0_i32_0 = arith.constant 0 : i32
    return %c0_i32, %arg1 : i32, i32
  }
  func.func @transform_4(%arg0: i32, %arg1: i32) -> (i32, i32) {
    %c0_i32 = arith.constant 0 : i32
    %c0_i32_0 = arith.constant 0 : i32
    return %c0_i32, %arg1 : i32, i32
  }
  func.func @transform_5(%arg0: i32, %arg1: i32) -> (i32, i32) {
    %c0_i32 = arith.constant 0 : i32
    return %arg0, %arg1 : i32, i32
  }
}

module attributes {stable_mosaic.version = 11 : i64} {
  func.func @kernel(%arg0: i32, %arg1: i32, %arg2: memref<16x128xf32, #tpu.memory_space<vmem>>, %arg3: memref<128x256xf32, #tpu.memory_space<vmem>>, %arg4: memref<1x256xf32, #tpu.memory_space<vmem>>, %arg5: memref<16x256xf32, #tpu.memory_space<vmem>>) attributes {dimension_semantics = [#tpu.dimension_semantics<parallel>, #tpu.dimension_semantics<parallel>], iteration_bounds = array<i64: 2, 1>, scalar_prefetch = 0 : i64, scratch_operands = 0 : i64, tpu.core_type = #tpu.core_type<tc>, window_params = [{transform_indices = @transform_0, window_bounds = array<i64: 16, 128>}, {transform_indices = @transform_1, window_bounds = array<i64: 128, 256>}, {transform_indices = @transform_2, window_bounds = array<i64: 1, 256>}, {transform_indices = @transform_3, window_bounds = array<i64: 16, 256>}]} {
    %c0 = arith.constant 0 : index
    %c0_0 = arith.constant 0 : index
    %0 = vector.load %arg2[%c0, %c0_0] : memref<16x128xf32, #tpu.memory_space<vmem>>, vector<16x128xf32>
    %1 = arith.truncf %0 : vector<16x128xf32> to vector<16x128xbf16>
    %c0_1 = arith.constant 0 : index
    %c0_2 = arith.constant 0 : index
    %2 = vector.load %arg3[%c0_1, %c0_2] : memref<128x256xf32, #tpu.memory_space<vmem>>, vector<128x256xf32>
    %3 = arith.truncf %2 : vector<128x256xf32> to vector<128x256xbf16>
    %cst = arith.constant dense<0.000000e+00> : vector<16x256xf32>
    %4 = tpu.matmul %1, %3, %cst {dimension_numbers = #tpu.dot_dimension_numbers<[1], [0], [0], [1], [0, 0, 1, 1], [], []>} : vector<16x128xbf16>, vector<128x256xbf16>, vector<16x256xf32> -> vector<16x256xf32>
    %c0_3 = arith.constant 0 : index
    %c0_4 = arith.constant 0 : index
    %5 = vector.load %arg4[%c0_3, %c0_4] : memref<1x256xf32, #tpu.memory_space<vmem>>, vector<1x256xf32>
    %6 = vector.broadcast %5 : vector<1x256xf32> to vector<16x256xf32>
    %7 = arith.addf %4, %6 : vector<16x256xf32>
    %c0_5 = arith.constant 0 : index
    %c0_6 = arith.constant 0 : index
    %8 = vector.load %arg5[%c0_5, %c0_6] : memref<16x256xf32, #tpu.memory_space<vmem>>, vector<16x256xf32>
    tpu.vector_store %arg5[%c0_5, %c0_6], %7 {strides = array<i32>} : memref<16x256xf32, #tpu.memory_space<vmem>>, vector<16x256xf32>,
    return
  }
  func.func @transform_0(%arg0: i32, %arg1: i32) -> (i32, i32) {
    %c0_i32 = arith.constant 0 : i32
    %c0_i32_0 = arith.constant 0 : i32
    return %arg0, %c0_i32 : i32, i32
  }
  func.func @transform_1(%arg0: i32, %arg1: i32) -> (i32, i32) {
    %c0_i32 = arith.constant 0 : i32
    %c0_i32_0 = arith.constant 0 : i32
    return %c0_i32, %arg1 : i32, i32
  }
  func.func @transform_2(%arg0: i32, %arg1: i32) -> (i32, i32) {
    %c0_i32 = arith.constant 0 : i32
    %c0_i32_0 = arith.constant 0 : i32
    return %c0_i32, %arg1 : i32, i32
  }
  func.func @transform_3(%arg0: i32, %arg1: i32) -> (i32, i32) {
    %c0_i32 = arith.constant 0 : i32
    return %arg0, %arg1 : i32, i32
  }
}

module attributes {stable_mosaic.version = 11 : i64} {
  func.func @kernel(%arg0: i32, %arg1: memref<16x384xf32, #tpu.memory_space<vmem>>, %arg2: memref<16x128xf32, #tpu.memory_space<vmem>>) attributes {dimension_semantics = [#tpu.dimension_semantics<parallel>], iteration_bounds = array<i64: 2>, scalar_prefetch = 0 : i64, scratch_operands = 0 : i64, tpu.core_type = #tpu.core_type<tc>, window_params = [{transform_indices = @transform_0, window_bounds = array<i64: 16, 384>}, {transform_indices = @transform_1, window_bounds = array<i64: 16, 128>}]} {
    %0 = tpu.iota {dimensions = array<i32: 0>} : vector<16x16xi32>
    %1 = tpu.iota {dimensions = array<i32: 1>} : vector<16x16xi32>
    %2 = arith.cmpi sle, %1, %0 : vector<16x16xi32>
    %cst = arith.constant 0.000000e+00 : f32
    %cst_0 = arith.constant -1.000000e+09 : f32
    %3 = vector.broadcast %cst : f32 to vector<16x16xf32>
    %4 = vector.broadcast %cst_0 : f32 to vector<16x16xf32>
    %5 = arith.select %2, %3, %4 : vector<16x16xi1>, vector<16x16xf32>
    %c0 = arith.constant 0 : index
    %c0_1 = arith.constant 0 : index
    %6 = vector.load %arg1[%c0, %c0_1] : memref<16x384xf32, #tpu.memory_space<vmem>>, vector<16x32xf32>
    %c0_2 = arith.constant 0 : index
    %c128 = arith.constant 128 : index
    %7 = vector.load %arg1[%c0_2, %c128] : memref<16x384xf32, #tpu.memory_space<vmem>>, vector<16x32xf32>
    %8 = arith.truncf %7 : vector<16x32xf32> to vector<16x32xbf16>
    %c0_3 = arith.constant 0 : index
    %c256 = arith.constant 256 : index
    %9 = vector.load %arg1[%c0_3, %c256] : memref<16x384xf32, #tpu.memory_space<vmem>>, vector<16x32xf32>
    %10 = arith.truncf %9 : vector<16x32xf32> to vector<16x32xbf16>
    %cst_4 = arith.constant 0.176776692 : f32
    %11 = vector.broadcast %cst_4 : f32 to vector<16x32xf32>
    %12 = arith.mulf %6, %11 : vector<16x32xf32>
    %13 = arith.truncf %12 : vector<16x32xf32> to vector<16x32xbf16>
    %cst_5 = arith.constant dense<0.000000e+00> : vector<16x16xf32>
    %14 = tpu.matmul %13, %8, %cst_5 {dimension_numbers = #tpu.dot_dimension_numbers<[1], [1], [0], [0], [0, 0, 1, 0], [], []>} : vector<16x32xbf16>, vector<16x32xbf16>, vector<16x16xf32> -> vector<16x16xf32>
    %15 = arith.addf %14, %5 : vector<16x16xf32>
    %cst_6 = arith.constant dense<0xFF800000> : vector<16xf32>
    %16 = vector.multi_reduction <maximumf>, %15, %cst_6 [1] : vector<16x16xf32> to vector<16xf32>
    %17 = vector.shape_cast %16 : vector<16xf32> to vector<16x1xf32>
    %18 = vector.broadcast %17 : vector<16x1xf32> to vector<16x16xf32>
    %19 = arith.subf %15, %18 : vector<16x16xf32>
    %20 = math.exp %19 : vector<16x16xf32>
    %cst_7 = arith.constant dense<0.000000e+00> : vector<16xf32>
    %21 = vector.multi_reduction <add>, %20, %cst_7 [1] : vector<16x16xf32> to vector<16xf32>
    %22 = vector.shape_cast %21 : vector<16xf32> to vector<16x1xf32>
    %23 = tpu.reciprocal %22 {approx = true} : vector<16x1xf32> -> vector<16x1xf32>
    %24 = vector.broadcast %23 : vector<16x1xf32> to vector<16x16xf32>
    %25 = arith.mulf %20, %24 : vector<16x16xf32>
    %26 = arith.truncf %25 : vector<16x16xf32> to vector<16x16xbf16>
    %cst_8 = arith.constant dense<0.000000e+00> : vector<16x32xf32>
    %27 = tpu.matmul %26, %10, %cst_8 {dimension_numbers = #tpu.dot_dimension_numbers<[1], [0], [0], [1], [0, 0, 1, 1], [], []>} : vector<16x16xbf16>, vector<16x32xbf16>, vector<16x32xf32> -> vector<16x32xf32>
    %c0_9 = arith.constant 0 : index
    %c0_10 = arith.constant 0 : index
    %28 = vector.load %arg2[%c0_9, %c0_10] : memref<16x128xf32, #tpu.memory_space<vmem>>, vector<16x32xf32>
    tpu.vector_store %arg2[%c0_9, %c0_10], %27 {strides = array<i32>} : memref<16x128xf32, #tpu.memory_space<vmem>>, vector<16x32xf32>,
    %c0_11 = arith.constant 0 : index
    %c32 = arith.constant 32 : index
    %29 = vector.load %arg1[%c0_11, %c32] : memref<16x384xf32, #tpu.memory_space<vmem>>, vector<16x32xf32>
    %c0_12 = arith.constant 0 : index
    %c160 = arith.constant 160 : index
    %30 = vector.load %arg1[%c0_12, %c160] : memref<16x384xf32, #tpu.memory_space<vmem>>, vector<16x32xf32>
    %31 = arith.truncf %30 : vector<16x32xf32> to vector<16x32xbf16>
    %c0_13 = arith.constant 0 : index
    %c288 = arith.constant 288 : index
    %32 = vector.load %arg1[%c0_13, %c288] : memref<16x384xf32, #tpu.memory_space<vmem>>, vector<16x32xf32>
    %33 = arith.truncf %32 : vector<16x32xf32> to vector<16x32xbf16>
    %cst_14 = arith.constant 0.176776692 : f32
    %34 = vector.broadcast %cst_14 : f32 to vector<16x32xf32>
    %35 = arith.mulf %29, %34 : vector<16x32xf32>
    %36 = arith.truncf %35 : vector<16x32xf32> to vector<16x32xbf16>
    %cst_15 = arith.constant dense<0.000000e+00> : vector<16x16xf32>
    %37 = tpu.matmul %36, %31, %cst_15 {dimension_numbers = #tpu.dot_dimension_numbers<[1], [1], [0], [0], [0, 0, 1, 0], [], []>} : vector<16x32xbf16>, vector<16x32xbf16>, vector<16x16xf32> -> vector<16x16xf32>
    %38 = arith.addf %37, %5 : vector<16x16xf32>
    %cst_16 = arith.constant dense<0xFF800000> : vector<16xf32>
    %39 = vector.multi_reduction <maximumf>, %38, %cst_16 [1] : vector<16x16xf32> to vector<16xf32>
    %40 = vector.shape_cast %39 : vector<16xf32> to vector<16x1xf32>
    %41 = vector.broadcast %40 : vector<16x1xf32> to vector<16x16xf32>
    %42 = arith.subf %38, %41 : vector<16x16xf32>
    %43 = math.exp %42 : vector<16x16xf32>
    %cst_17 = arith.constant dense<0.000000e+00> : vector<16xf32>
    %44 = vector.multi_reduction <add>, %43, %cst_17 [1] : vector<16x16xf32> to vector<16xf32>
    %45 = vector.shape_cast %44 : vector<16xf32> to vector<16x1xf32>
    %46 = tpu.reciprocal %45 {approx = true} : vector<16x1xf32> -> vector<16x1xf32>
    %47 = vector.broadcast %46 : vector<16x1xf32> to vector<16x16xf32>
    %48 = arith.mulf %43, %47 : vector<16x16xf32>
    %49 = arith.truncf %48 : vector<16x16xf32> to vector<16x16xbf16>
    %cst_18 = arith.constant dense<0.000000e+00> : vector<16x32xf32>
    %50 = tpu.matmul %49, %33, %cst_18 {dimension_numbers = #tpu.dot_dimension_numbers<[1], [0], [0], [1], [0, 0, 1, 1], [], []>} : vector<16x16xbf16>, vector<16x32xbf16>, vector<16x32xf32> -> vector<16x32xf32>
    %c0_19 = arith.constant 0 : index
    %c32_20 = arith.constant 32 : index
    %51 = vector.load %arg2[%c0_19, %c32_20] : memref<16x128xf32, #tpu.memory_space<vmem>>, vector<16x32xf32>
    tpu.vector_store %arg2[%c0_19, %c32_20], %50 {strides = array<i32>} : memref<16x128xf32, #tpu.memory_space<vmem>>, vector<16x32xf32>,
    %c0_21 = arith.constant 0 : index
    %c64 = arith.constant 64 : index
    %52 = vector.load %arg1[%c0_21, %c64] : memref<16x384xf32, #tpu.memory_space<vmem>>, vector<16x32xf32>
    %c0_22 = arith.constant 0 : index
    %c192 = arith.constant 192 : index
    %53 = vector.load %arg1[%c0_22, %c192] : memref<16x384xf32, #tpu.memory_space<vmem>>, vector<16x32xf32>
    %54 = arith.truncf %53 : vector<16x32xf32> to vector<16x32xbf16>
    %c0_23 = arith.constant 0 : index
    %c320 = arith.constant 320 : index
    %55 = vector.load %arg1[%c0_23, %c320] : memref<16x384xf32, #tpu.memory_space<vmem>>, vector<16x32xf32>
    %56 = arith.truncf %55 : vector<16x32xf32> to vector<16x32xbf16>
    %cst_24 = arith.constant 0.176776692 : f32
    %57 = vector.broadcast %cst_24 : f32 to vector<16x32xf32>
    %58 = arith.mulf %52, %57 : vector<16x32xf32>
    %59 = arith.truncf %58 : vector<16x32xf32> to vector<16x32xbf16>
    %cst_25 = arith.constant dense<0.000000e+00> : vector<16x16xf32>
    %60 = tpu.matmul %59, %54, %cst_25 {dimension_numbers = #tpu.dot_dimension_numbers<[1], [1], [0], [0], [0, 0, 1, 0], [], []>} : vector<16x32xbf16>, vector<16x32xbf16>, vector<16x16xf32> -> vector<16x16xf32>
    %61 = arith.addf %60, %5 : vector<16x16xf32>
    %cst_26 = arith.constant dense<0xFF800000> : vector<16xf32>
    %62 = vector.multi_reduction <maximumf>, %61, %cst_26 [1] : vector<16x16xf32> to vector<16xf32>
    %63 = vector.shape_cast %62 : vector<16xf32> to vector<16x1xf32>
    %64 = vector.broadcast %63 : vector<16x1xf32> to vector<16x16xf32>
    %65 = arith.subf %61, %64 : vector<16x16xf32>
    %66 = math.exp %65 : vector<16x16xf32>
    %cst_27 = arith.constant dense<0.000000e+00> : vector<16xf32>
    %67 = vector.multi_reduction <add>, %66, %cst_27 [1] : vector<16x16xf32> to vector<16xf32>
    %68 = vector.shape_cast %67 : vector<16xf32> to vector<16x1xf32>
    %69 = tpu.reciprocal %68 {approx = true} : vector<16x1xf32> -> vector<16x1xf32>
    %70 = vector.broadcast %69 : vector<16x1xf32> to vector<16x16xf32>
    %71 = arith.mulf %66, %70 : vector<16x16xf32>
    %72 = arith.truncf %71 : vector<16x16xf32> to vector<16x16xbf16>
    %cst_28 = arith.constant dense<0.000000e+00> : vector<16x32xf32>
    %73 = tpu.matmul %72, %56, %cst_28 {dimension_numbers = #tpu.dot_dimension_numbers<[1], [0], [0], [1], [0, 0, 1, 1], [], []>} : vector<16x16xbf16>, vector<16x32xbf16>, vector<16x32xf32> -> vector<16x32xf32>
    %c0_29 = arith.constant 0 : index
    %c64_30 = arith.constant 64 : index
    %74 = vector.load %arg2[%c0_29, %c64_30] : memref<16x128xf32, #tpu.memory_space<vmem>>, vector<16x32xf32>
    tpu.vector_store %arg2[%c0_29, %c64_30], %73 {strides = array<i32>} : memref<16x128xf32, #tpu.memory_space<vmem>>, vector<16x32xf32>,
    %c0_31 = arith.constant 0 : index
    %c96 = arith.constant 96 : index
    %75 = vector.load %arg1[%c0_31, %c96] : memref<16x384xf32, #tpu.memory_space<vmem>>, vector<16x32xf32>
    %c0_32 = arith.constant 0 : index
    %c224 = arith.constant 224 : index
    %76 = vector.load %arg1[%c0_32, %c224] : memref<16x384xf32, #tpu.memory_space<vmem>>, vector<16x32xf32>
    %77 = arith.truncf %76 : vector<16x32xf32> to vector<16x32xbf16>
    %c0_33 = arith.constant 0 : index
    %c352 = arith.constant 352 : index
    %78 = vector.load %arg1[%c0_33, %c352] : memref<16x384xf32, #tpu.memory_space<vmem>>, vector<16x32xf32>
    %79 = arith.truncf %78 : vector<16x32xf32> to vector<16x32xbf16>
    %cst_34 = arith.constant 0.176776692 : f32
    %80 = vector.broadcast %cst_34 : f32 to vector<16x32xf32>
    %81 = arith.mulf %75, %80 : vector<16x32xf32>
    %82 = arith.truncf %81 : vector<16x32xf32> to vector<16x32xbf16>
    %cst_35 = arith.constant dense<0.000000e+00> : vector<16x16xf32>
    %83 = tpu.matmul %82, %77, %cst_35 {dimension_numbers = #tpu.dot_dimension_numbers<[1], [1], [0], [0], [0, 0, 1, 0], [], []>} : vector<16x32xbf16>, vector<16x32xbf16>, vector<16x16xf32> -> vector<16x16xf32>
    %84 = arith.addf %83, %5 : vector<16x16xf32>
    %cst_36 = arith.constant dense<0xFF800000> : vector<16xf32>
    %85 = vector.multi_reduction <maximumf>, %84, %cst_36 [1] : vector<16x16xf32> to vector<16xf32>
    %86 = vector.shape_cast %85 : vector<16xf32> to vector<16x1xf32>
    %87 = vector.broadcast %86 : vector<16x1xf32> to vector<16x16xf32>
    %88 = arith.subf %84, %87 : vector<16x16xf32>
    %89 = math.exp %88 : vector<16x16xf32>
    %cst_37 = arith.constant dense<0.000000e+00> : vector<16xf32>
    %90 = vector.multi_reduction <add>, %89, %cst_37 [1] : vector<16x16xf32> to vector<16xf32>
    %91 = vector.shape_cast %90 : vector<16xf32> to vector<16x1xf32>
    %92 = tpu.reciprocal %91 {approx = true} : vector<16x1xf32> -> vector<16x1xf32>
    %93 = vector.broadcast %92 : vector<16x1xf32> to vector<16x16xf32>
    %94 = arith.mulf %89, %93 : vector<16x16xf32>
    %95 = arith.truncf %94 : vector<16x16xf32> to vector<16x16xbf16>
    %cst_38 = arith.constant dense<0.000000e+00> : vector<16x32xf32>
    %96 = tpu.matmul %95, %79, %cst_38 {dimension_numbers = #tpu.dot_dimension_numbers<[1], [0], [0], [1], [0, 0, 1, 1], [], []>} : vector<16x16xbf16>, vector<16x32xbf16>, vector<16x32xf32> -> vector<16x32xf32>
    %c0_39 = arith.constant 0 : index
    %c96_40 = arith.constant 96 : index
    %97 = vector.load %arg2[%c0_39, %c96_40] : memref<16x128xf32, #tpu.memory_space<vmem>>, vector<16x32xf32>
    tpu.vector_store %arg2[%c0_39, %c96_40], %96 {strides = array<i32>} : memref<16x128xf32, #tpu.memory_space<vmem>>, vector<16x32xf32>,
    return
  }
  func.func @transform_0(%arg0: i32) -> (i32, i32) {
    %c0_i32 = arith.constant 0 : i32
    %c0_i32_0 = arith.constant 0 : i32
    return %arg0, %c0_i32 : i32, i32
  }
  func.func @transform_1(%arg0: i32) -> (i32, i32) {
    %c0_i32 = arith.constant 0 : i32
    %c0_i32_0 = arith.constant 0 : i32
    return %arg0, %c0_i32 : i32, i32
  }
}

module attributes {stable_mosaic.version = 11 : i64} {
  func.func @kernel(%arg0: i32, %arg1: i32, %arg2: memref<16x128xf32, #tpu.memory_space<vmem>>, %arg3: memref<1x128xf32, #tpu.memory_space<vmem>>, %arg4: memref<1x128xf32, #tpu.memory_space<vmem>>, %arg5: memref<128x128xf32, #tpu.memory_space<vmem>>, %arg6: memref<1x128xf32, #tpu.memory_space<vmem>>, %arg7: memref<16x128xf32, #tpu.memory_space<vmem>>) attributes {dimension_semantics = [#tpu.dimension_semantics<parallel>, #tpu.dimension_semantics<parallel>], iteration_bounds = array<i64: 2, 1>, scalar_prefetch = 0 : i64, scratch_operands = 0 : i64, tpu.core_type = #tpu.core_type<tc>, window_params = [{transform_indices = @transform_0, window_bounds = array<i64: 16, 128>}, {pipeline_mode = #tpu.pipeline_mode<synchronous>, transform_indices = @transform_1, window_bounds = array<i64: 1, 128>}, {pipeline_mode = #tpu.pipeline_mode<synchronous>, transform_indices = @transform_2, window_bounds = array<i64: 1, 128>}, {transform_indices = @transform_3, window_bounds = array<i64: 128, 128>}, {transform_indices = @transform_4, window_bounds = array<i64: 1, 128>}, {transform_indices = @transform_5, window_bounds = array<i64: 16, 128>}]} {
    %c0 = arith.constant 0 : index
    %c0_0 = arith.constant 0 : index
    %0 = vector.load %arg2[%c0, %c0_0] : memref<16x128xf32, #tpu.memory_space<vmem>>, vector<16x128xf32>
    %cst = arith.constant dense<0.000000e+00> : vector<16xf32>
    %1 = vector.multi_reduction <add>, %0, %cst [1] : vector<16x128xf32> to vector<16xf32>
    %2 = vector.shape_cast %1 : vector<16xf32> to vector<16x1xf32>
    %cst_1 = arith.constant 1.280000e+02 : f32
    %3 = vector.broadcast %cst_1 : f32 to vector<16x1xf32>
    %4 = arith.divf %2, %3 : vector<16x1xf32>
    %5 = vector.broadcast %4 : vector<16x1xf32> to vector<16x128xf32>
    %6 = arith.subf %0, %5 : vector<16x128xf32>
    %7 = arith.mulf %6, %6 : vector<16x128xf32>
    %cst_2 = arith.constant dense<0.000000e+00> : vector<16xf32>
    %8 = vector.multi_reduction <add>, %7, %cst_2 [1] : vector<16x128xf32> to vector<16xf32>
    %9 = vector.shape_cast %8 : vector<16xf32> to vector<16x1xf32>
    %cst_3 = arith.constant 1.280000e+02 : f32
    %10 = vector.broadcast %cst_3 : f32 to vector<16x1xf32>
    %11 = arith.divf %9, %10 : vector<16x1xf32>
    %12 = vector.broadcast %4 : vector<16x1xf32> to vector<16x128xf32>
    %13 = arith.subf %0, %12 : vector<16x128xf32>
    %cst_4 = arith.constant 9.99999974E-6 : f32
    %14 = vector.broadcast %cst_4 : f32 to vector<16x1xf32>
    %15 = arith.addf %11, %14 : vector<16x1xf32>
    %16 = math.rsqrt %15 : vector<16x1xf32>
    %17 = vector.broadcast %16 : vector<16x1xf32> to vector<16x128xf32>
    %18 = arith.mulf %13, %17 : vector<16x128xf32>
    %c0_5 = arith.constant 0 : index
    %c0_6 = arith.constant 0 : index
    %19 = vector.load %arg3[%c0_5, %c0_6] : memref<1x128xf32, #tpu.memory_space<vmem>>, vector<1x128xf32>
    %20 = vector.broadcast %19 : vector<1x128xf32> to vector<16x128xf32>
    %21 = arith.mulf %18, %20 : vector<16x128xf32>
    %c0_7 = arith.constant 0 : index
    %c0_8 = arith.constant 0 : index
    %22 = vector.load %arg4[%c0_7, %c0_8] : memref<1x128xf32, #tpu.memory_space<vmem>>, vector<1x128xf32>
    %23 = vector.broadcast %22 : vector<1x128xf32> to vector<16x128xf32>
    %24 = arith.addf %21, %23 : vector<16x128xf32>
    %25 = arith.truncf %24 : vector<16x128xf32> to vector<16x128xbf16>
    %c0_9 = arith.constant 0 : index
    %c0_10 = arith.constant 0 : index
    %26 = vector.load %arg5[%c0_9, %c0_10] : memref<128x128xf32, #tpu.memory_space<vmem>>, vector<128x128xf32>
    %27 = arith.truncf %26 : vector<128x128xf32> to vector<128x128xbf16>
    %cst_11 = arith.constant dense<0.000000e+00> : vector<16x128xf32>
    %28 = tpu.matmul %25, %27, %cst_11 {dimension_numbers = #tpu.dot_dimension_numbers<[1], [0], [0], [1], [0, 0, 1, 1], [], []>} : vector<16x128xbf16>, vector<128x128xbf16>, vector<16x128xf32> -> vector<16x128xf32>
    %c0_12 = arith.constant 0 : index
    %c0_13 = arith.constant 0 : index
    %29 = vector.load %arg6[%c0_12, %c0_13] : memref<1x128xf32, #tpu.memory_space<vmem>>, vector<1x128xf32>
    %30 = vector.broadcast %29 : vector<1x128xf32> to vector<16x128xf32>
    %31 = arith.addf %28, %30 : vector<16x128xf32>
    %c0_14 = arith.constant 0 : index
    %c0_15 = arith.constant 0 : index
    %32 = vector.load %arg7[%c0_14, %c0_15] : memref<16x128xf32, #tpu.memory_space<vmem>>, vector<16x128xf32>
    tpu.vector_store %arg7[%c0_14, %c0_15], %31 {strides = array<i32>} : memref<16x128xf32, #tpu.memory_space<vmem>>, vector<16x128xf32>,
    return
  }
  func.func @transform_0(%arg0: i32, %arg1: i32) -> (i32, i32) {
    %c0_i32 = arith.constant 0 : i32
    %c0_i32_0 = arith.constant 0 : i32
    return %arg0, %c0_i32 : i32, i32
  }
  func.func @transform_1(%arg0: i32, %arg1: i32) -> (i32, i32) {
    %c0_i32 = arith.constant 0 : i32
    %c0_i32_0 = arith.constant 0 : i32
    %c0_i32_1 = arith.constant 0 : i32
    return %c0_i32, %c0_i32_0 : i32, i32
  }
  func.func @transform_2(%arg0: i32, %arg1: i32) -> (i32, i32) {
    %c0_i32 = arith.constant 0 : i32
    %c0_i32_0 = arith.constant 0 : i32
    %c0_i32_1 = arith.constant 0 : i32
    return %c0_i32, %c0_i32_0 : i32, i32
  }
  func.func @transform_3(%arg0: i32, %arg1: i32) -> (i32, i32) {
    %c0_i32 = arith.constant 0 : i32
    %c0_i32_0 = arith.constant 0 : i32
    return %c0_i32, %arg1 : i32, i32
  }
  func.func @transform_4(%arg0: i32, %arg1: i32) -> (i32, i32) {
    %c0_i32 = arith.constant 0 : i32
    %c0_i32_0 = arith.constant 0 : i32
    return %c0_i32, %arg1 : i32, i32
  }
  func.func @transform_5(%arg0: i32, %arg1: i32) -> (i32, i32) {
    %c0_i32 = arith.constant 0 : i32
    return %arg0, %arg1 : i32, i32
  }
}

module attributes {stable_mosaic.version = 11 : i64} {
  func.func @kernel(%arg0: i32, %arg1: memref<16x128xf32, #tpu.memory_space<vmem>>, %arg2: memref<16x256xf32, #tpu.memory_space<vmem>>, %arg3: memref<16x128xf32, #tpu.memory_space<vmem>>) attributes {dimension_semantics = [#tpu.dimension_semantics<parallel>], iteration_bounds = array<i64: 2>, scalar_prefetch = 0 : i64, scratch_operands = 0 : i64, tpu.core_type = #tpu.core_type<tc>, window_params = [{transform_indices = @transform_0, window_bounds = array<i64: 16, 128>}, {transform_indices = @transform_1, window_bounds = array<i64: 16, 256>}, {transform_indices = @transform_2, window_bounds = array<i64: 16, 128>}]} {
    %c0 = arith.constant 0 : index
    %c0_0 = arith.constant 0 : index
    %0 = vector.load %arg1[%c0, %c0_0] : memref<16x128xf32, #tpu.memory_space<vmem>>, vector<16x32xf32>
    %c0_1 = arith.constant 0 : index
    %c0_2 = arith.constant 0 : index
    %1 = vector.load %arg2[%c0_1, %c0_2] : memref<16x256xf32, #tpu.memory_space<vmem>>, vector<16x32xf32>
    %2 = arith.truncf %1 : vector<16x32xf32> to vector<16x32xbf16>
    %c0_3 = arith.constant 0 : index
    %c128 = arith.constant 128 : index
    %3 = vector.load %arg2[%c0_3, %c128] : memref<16x256xf32, #tpu.memory_space<vmem>>, vector<16x32xf32>
    %4 = arith.truncf %3 : vector<16x32xf32> to vector<16x32xbf16>
    %cst = arith.constant 0.176776692 : f32
    %5 = vector.broadcast %cst : f32 to vector<16x32xf32>
    %6 = arith.mulf %0, %5 : vector<16x32xf32>
    %7 = arith.truncf %6 : vector<16x32xf32> to vector<16x32xbf16>
    %cst_4 = arith.constant dense<0.000000e+00> : vector<16x16xf32>
    %8 = tpu.matmul %7, %2, %cst_4 {dimension_numbers = #tpu.dot_dimension_numbers<[1], [1], [0], [0], [0, 0, 1, 0], [], []>} : vector<16x32xbf16>, vector<16x32xbf16>, vector<16x16xf32> -> vector<16x16xf32>
    %cst_5 = arith.constant dense<0xFF800000> : vector<16xf32>
    %9 = vector.multi_reduction <maximumf>, %8, %cst_5 [1] : vector<16x16xf32> to vector<16xf32>
    %10 = vector.shape_cast %9 : vector<16xf32> to vector<16x1xf32>
    %11 = vector.broadcast %10 : vector<16x1xf32> to vector<16x16xf32>
    %12 = arith.subf %8, %11 : vector<16x16xf32>
    %13 = math.exp %12 : vector<16x16xf32>
    %cst_6 = arith.constant dense<0.000000e+00> : vector<16xf32>
    %14 = vector.multi_reduction <add>, %13, %cst_6 [1] : vector<16x16xf32> to vector<16xf32>
    %15 = vector.shape_cast %14 : vector<16xf32> to vector<16x1xf32>
    %16 = tpu.reciprocal %15 {approx = true} : vector<16x1xf32> -> vector<16x1xf32>
    %17 = vector.broadcast %16 : vector<16x1xf32> to vector<16x16xf32>
    %18 = arith.mulf %13, %17 : vector<16x16xf32>
    %19 = arith.truncf %18 : vector<16x16xf32> to vector<16x16xbf16>
    %cst_7 = arith.constant dense<0.000000e+00> : vector<16x32xf32>
    %20 = tpu.matmul %19, %4, %cst_7 {dimension_numbers = #tpu.dot_dimension_numbers<[1], [0], [0], [1], [0, 0, 1, 1], [], []>} : vector<16x16xbf16>, vector<16x32xbf16>, vector<16x32xf32> -> vector<16x32xf32>
    %c0_8 = arith.constant 0 : index
    %c0_9 = arith.constant 0 : index
    %21 = vector.load %arg3[%c0_8, %c0_9] : memref<16x128xf32, #tpu.memory_space<vmem>>, vector<16x32xf32>
    tpu.vector_store %arg3[%c0_8, %c0_9], %20 {strides = array<i32>} : memref<16x128xf32, #tpu.memory_space<vmem>>, vector<16x32xf32>,
    %c0_10 = arith.constant 0 : index
    %c32 = arith.constant 32 : index
    %22 = vector.load %arg1[%c0_10, %c32] : memref<16x128xf32, #tpu.memory_space<vmem>>, vector<16x32xf32>
    %c0_11 = arith.constant 0 : index
    %c32_12 = arith.constant 32 : index
    %23 = vector.load %arg2[%c0_11, %c32_12] : memref<16x256xf32, #tpu.memory_space<vmem>>, vector<16x32xf32>
    %24 = arith.truncf %23 : vector<16x32xf32> to vector<16x32xbf16>
    %c0_13 = arith.constant 0 : index
    %c160 = arith.constant 160 : index
    %25 = vector.load %arg2[%c0_13, %c160] : memref<16x256xf32, #tpu.memory_space<vmem>>, vector<16x32xf32>
    %26 = arith.truncf %25 : vector<16x32xf32> to vector<16x32xbf16>
    %cst_14 = arith.constant 0.176776692 : f32
    %27 = vector.broadcast %cst_14 : f32 to vector<16x32xf32>
    %28 = arith.mulf %22, %27 : vector<16x32xf32>
    %29 = arith.truncf %28 : vector<16x32xf32> to vector<16x32xbf16>
    %cst_15 = arith.constant dense<0.000000e+00> : vector<16x16xf32>
    %30 = tpu.matmul %29, %24, %cst_15 {dimension_numbers = #tpu.dot_dimension_numbers<[1], [1], [0], [0], [0, 0, 1, 0], [], []>} : vector<16x32xbf16>, vector<16x32xbf16>, vector<16x16xf32> -> vector<16x16xf32>
    %cst_16 = arith.constant dense<0xFF800000> : vector<16xf32>
    %31 = vector.multi_reduction <maximumf>, %30, %cst_16 [1] : vector<16x16xf32> to vector<16xf32>
    %32 = vector.shape_cast %31 : vector<16xf32> to vector<16x1xf32>
    %33 = vector.broadcast %32 : vector<16x1xf32> to vector<16x16xf32>
    %34 = arith.subf %30, %33 : vector<16x16xf32>
    %35 = math.exp %34 : vector<16x16xf32>
    %cst_17 = arith.constant dense<0.000000e+00> : vector<16xf32>
    %36 = vector.multi_reduction <add>, %35, %cst_17 [1] : vector<16x16xf32> to vector<16xf32>
    %37 = vector.shape_cast %36 : vector<16xf32> to vector<16x1xf32>
    %38 = tpu.reciprocal %37 {approx = true} : vector<16x1xf32> -> vector<16x1xf32>
    %39 = vector.broadcast %38 : vector<16x1xf32> to vector<16x16xf32>
    %40 = arith.mulf %35, %39 : vector<16x16xf32>
    %41 = arith.truncf %40 : vector<16x16xf32> to vector<16x16xbf16>
    %cst_18 = arith.constant dense<0.000000e+00> : vector<16x32xf32>
    %42 = tpu.matmul %41, %26, %cst_18 {dimension_numbers = #tpu.dot_dimension_numbers<[1], [0], [0], [1], [0, 0, 1, 1], [], []>} : vector<16x16xbf16>, vector<16x32xbf16>, vector<16x32xf32> -> vector<16x32xf32>
    %c0_19 = arith.constant 0 : index
    %c32_20 = arith.constant 32 : index
    %43 = vector.load %arg3[%c0_19, %c32_20] : memref<16x128xf32, #tpu.memory_space<vmem>>, vector<16x32xf32>
    tpu.vector_store %arg3[%c0_19, %c32_20], %42 {strides = array<i32>} : memref<16x128xf32, #tpu.memory_space<vmem>>, vector<16x32xf32>,
    %c0_21 = arith.constant 0 : index
    %c64 = arith.constant 64 : index
    %44 = vector.load %arg1[%c0_21, %c64] : memref<16x128xf32, #tpu.memory_space<vmem>>, vector<16x32xf32>
    %c0_22 = arith.constant 0 : index
    %c64_23 = arith.constant 64 : index
    %45 = vector.load %arg2[%c0_22, %c64_23] : memref<16x256xf32, #tpu.memory_space<vmem>>, vector<16x32xf32>
    %46 = arith.truncf %45 : vector<16x32xf32> to vector<16x32xbf16>
    %c0_24 = arith.constant 0 : index
    %c192 = arith.constant 192 : index
    %47 = vector.load %arg2[%c0_24, %c192] : memref<16x256xf32, #tpu.memory_space<vmem>>, vector<16x32xf32>
    %48 = arith.truncf %47 : vector<16x32xf32> to vector<16x32xbf16>
    %cst_25 = arith.constant 0.176776692 : f32
    %49 = vector.broadcast %cst_25 : f32 to vector<16x32xf32>
    %50 = arith.mulf %44, %49 : vector<16x32xf32>
    %51 = arith.truncf %50 : vector<16x32xf32> to vector<16x32xbf16>
    %cst_26 = arith.constant dense<0.000000e+00> : vector<16x16xf32>
    %52 = tpu.matmul %51, %46, %cst_26 {dimension_numbers = #tpu.dot_dimension_numbers<[1], [1], [0], [0], [0, 0, 1, 0], [], []>} : vector<16x32xbf16>, vector<16x32xbf16>, vector<16x16xf32> -> vector<16x16xf32>
    %cst_27 = arith.constant dense<0xFF800000> : vector<16xf32>
    %53 = vector.multi_reduction <maximumf>, %52, %cst_27 [1] : vector<16x16xf32> to vector<16xf32>
    %54 = vector.shape_cast %53 : vector<16xf32> to vector<16x1xf32>
    %55 = vector.broadcast %54 : vector<16x1xf32> to vector<16x16xf32>
    %56 = arith.subf %52, %55 : vector<16x16xf32>
    %57 = math.exp %56 : vector<16x16xf32>
    %cst_28 = arith.constant dense<0.000000e+00> : vector<16xf32>
    %58 = vector.multi_reduction <add>, %57, %cst_28 [1] : vector<16x16xf32> to vector<16xf32>
    %59 = vector.shape_cast %58 : vector<16xf32> to vector<16x1xf32>
    %60 = tpu.reciprocal %59 {approx = true} : vector<16x1xf32> -> vector<16x1xf32>
    %61 = vector.broadcast %60 : vector<16x1xf32> to vector<16x16xf32>
    %62 = arith.mulf %57, %61 : vector<16x16xf32>
    %63 = arith.truncf %62 : vector<16x16xf32> to vector<16x16xbf16>
    %cst_29 = arith.constant dense<0.000000e+00> : vector<16x32xf32>
    %64 = tpu.matmul %63, %48, %cst_29 {dimension_numbers = #tpu.dot_dimension_numbers<[1], [0], [0], [1], [0, 0, 1, 1], [], []>} : vector<16x16xbf16>, vector<16x32xbf16>, vector<16x32xf32> -> vector<16x32xf32>
    %c0_30 = arith.constant 0 : index
    %c64_31 = arith.constant 64 : index
    %65 = vector.load %arg3[%c0_30, %c64_31] : memref<16x128xf32, #tpu.memory_space<vmem>>, vector<16x32xf32>
    tpu.vector_store %arg3[%c0_30, %c64_31], %64 {strides = array<i32>} : memref<16x128xf32, #tpu.memory_space<vmem>>, vector<16x32xf32>,
    %c0_32 = arith.constant 0 : index
    %c96 = arith.constant 96 : index
    %66 = vector.load %arg1[%c0_32, %c96] : memref<16x128xf32, #tpu.memory_space<vmem>>, vector<16x32xf32>
    %c0_33 = arith.constant 0 : index
    %c96_34 = arith.constant 96 : index
    %67 = vector.load %arg2[%c0_33, %c96_34] : memref<16x256xf32, #tpu.memory_space<vmem>>, vector<16x32xf32>
    %68 = arith.truncf %67 : vector<16x32xf32> to vector<16x32xbf16>
    %c0_35 = arith.constant 0 : index
    %c224 = arith.constant 224 : index
    %69 = vector.load %arg2[%c0_35, %c224] : memref<16x256xf32, #tpu.memory_space<vmem>>, vector<16x32xf32>
    %70 = arith.truncf %69 : vector<16x32xf32> to vector<16x32xbf16>
    %cst_36 = arith.constant 0.176776692 : f32
    %71 = vector.broadcast %cst_36 : f32 to vector<16x32xf32>
    %72 = arith.mulf %66, %71 : vector<16x32xf32>
    %73 = arith.truncf %72 : vector<16x32xf32> to vector<16x32xbf16>
    %cst_37 = arith.constant dense<0.000000e+00> : vector<16x16xf32>
    %74 = tpu.matmul %73, %68, %cst_37 {dimension_numbers = #tpu.dot_dimension_numbers<[1], [1], [0], [0], [0, 0, 1, 0], [], []>} : vector<16x32xbf16>, vector<16x32xbf16>, vector<16x16xf32> -> vector<16x16xf32>
    %cst_38 = arith.constant dense<0xFF800000> : vector<16xf32>
    %75 = vector.multi_reduction <maximumf>, %74, %cst_38 [1] : vector<16x16xf32> to vector<16xf32>
    %76 = vector.shape_cast %75 : vector<16xf32> to vector<16x1xf32>
    %77 = vector.broadcast %76 : vector<16x1xf32> to vector<16x16xf32>
    %78 = arith.subf %74, %77 : vector<16x16xf32>
    %79 = math.exp %78 : vector<16x16xf32>
    %cst_39 = arith.constant dense<0.000000e+00> : vector<16xf32>
    %80 = vector.multi_reduction <add>, %79, %cst_39 [1] : vector<16x16xf32> to vector<16xf32>
    %81 = vector.shape_cast %80 : vector<16xf32> to vector<16x1xf32>
    %82 = tpu.reciprocal %81 {approx = true} : vector<16x1xf32> -> vector<16x1xf32>
    %83 = vector.broadcast %82 : vector<16x1xf32> to vector<16x16xf32>
    %84 = arith.mulf %79, %83 : vector<16x16xf32>
    %85 = arith.truncf %84 : vector<16x16xf32> to vector<16x16xbf16>
    %cst_40 = arith.constant dense<0.000000e+00> : vector<16x32xf32>
    %86 = tpu.matmul %85, %70, %cst_40 {dimension_numbers = #tpu.dot_dimension_numbers<[1], [0], [0], [1], [0, 0, 1, 1], [], []>} : vector<16x16xbf16>, vector<16x32xbf16>, vector<16x32xf32> -> vector<16x32xf32>
    %c0_41 = arith.constant 0 : index
    %c96_42 = arith.constant 96 : index
    %87 = vector.load %arg3[%c0_41, %c96_42] : memref<16x128xf32, #tpu.memory_space<vmem>>, vector<16x32xf32>
    tpu.vector_store %arg3[%c0_41, %c96_42], %86 {strides = array<i32>} : memref<16x128xf32, #tpu.memory_space<vmem>>, vector<16x32xf32>,
    return
  }
  func.func @transform_0(%arg0: i32) -> (i32, i32) {
    %c0_i32 = arith.constant 0 : i32
    %c0_i32_0 = arith.constant 0 : i32
    return %arg0, %c0_i32 : i32, i32
  }
  func.func @transform_1(%arg0: i32) -> (i32, i32) {
    %c0_i32 = arith.constant 0 : i32
    %c0_i32_0 = arith.constant 0 : i32
    return %arg0, %c0_i32 : i32, i32
  }
  func.func @transform_2(%arg0: i32) -> (i32, i32) {
    %c0_i32 = arith.constant 0 : i32
    %c0_i32_0 = arith.constant 0 : i32
    return %arg0, %c0_i32 : i32, i32
  }
}

module attributes {stable_mosaic.version = 11 : i64} {
  func.func @kernel(%arg0: i32, %arg1: i32, %arg2: memref<16x128xf32, #tpu.memory_space<vmem>>, %arg3: memref<1x128xf32, #tpu.memory_space<vmem>>, %arg4: memref<1x128xf32, #tpu.memory_space<vmem>>, %arg5: memref<128x128xf32, #tpu.memory_space<vmem>>, %arg6: memref<1x128xf32, #tpu.memory_space<vmem>>, %arg7: memref<16x128xf32, #tpu.memory_space<vmem>>) attributes {dimension_semantics = [#tpu.dimension_semantics<parallel>, #tpu.dimension_semantics<parallel>], iteration_bounds = array<i64: 2, 1>, scalar_prefetch = 0 : i64, scratch_operands = 0 : i64, tpu.core_type = #tpu.core_type<tc>, window_params = [{transform_indices = @transform_0, window_bounds = array<i64: 16, 128>}, {pipeline_mode = #tpu.pipeline_mode<synchronous>, transform_indices = @transform_1, window_bounds = array<i64: 1, 128>}, {pipeline_mode = #tpu.pipeline_mode<synchronous>, transform_indices = @transform_2, window_bounds = array<i64: 1, 128>}, {transform_indices = @transform_3, window_bounds = array<i64: 128, 128>}, {transform_indices = @transform_4, window_bounds = array<i64: 1, 128>}, {transform_indices = @transform_5, window_bounds = array<i64: 16, 128>}]} {
    %c0 = arith.constant 0 : index
    %c0_0 = arith.constant 0 : index
    %0 = vector.load %arg2[%c0, %c0_0] : memref<16x128xf32, #tpu.memory_space<vmem>>, vector<16x128xf32>
    %cst = arith.constant dense<0.000000e+00> : vector<16xf32>
    %1 = vector.multi_reduction <add>, %0, %cst [1] : vector<16x128xf32> to vector<16xf32>
    %2 = vector.shape_cast %1 : vector<16xf32> to vector<16x1xf32>
    %cst_1 = arith.constant 1.280000e+02 : f32
    %3 = vector.broadcast %cst_1 : f32 to vector<16x1xf32>
    %4 = arith.divf %2, %3 : vector<16x1xf32>
    %5 = vector.broadcast %4 : vector<16x1xf32> to vector<16x128xf32>
    %6 = arith.subf %0, %5 : vector<16x128xf32>
    %7 = arith.mulf %6, %6 : vector<16x128xf32>
    %cst_2 = arith.constant dense<0.000000e+00> : vector<16xf32>
    %8 = vector.multi_reduction <add>, %7, %cst_2 [1] : vector<16x128xf32> to vector<16xf32>
    %9 = vector.shape_cast %8 : vector<16xf32> to vector<16x1xf32>
    %cst_3 = arith.constant 1.280000e+02 : f32
    %10 = vector.broadcast %cst_3 : f32 to vector<16x1xf32>
    %11 = arith.divf %9, %10 : vector<16x1xf32>
    %12 = vector.broadcast %4 : vector<16x1xf32> to vector<16x128xf32>
    %13 = arith.subf %0, %12 : vector<16x128xf32>
    %cst_4 = arith.constant 9.99999974E-6 : f32
    %14 = vector.broadcast %cst_4 : f32 to vector<16x1xf32>
    %15 = arith.addf %11, %14 : vector<16x1xf32>
    %16 = math.rsqrt %15 : vector<16x1xf32>
    %17 = vector.broadcast %16 : vector<16x1xf32> to vector<16x128xf32>
    %18 = arith.mulf %13, %17 : vector<16x128xf32>
    %c0_5 = arith.constant 0 : index
    %c0_6 = arith.constant 0 : index
    %19 = vector.load %arg3[%c0_5, %c0_6] : memref<1x128xf32, #tpu.memory_space<vmem>>, vector<1x128xf32>
    %20 = vector.broadcast %19 : vector<1x128xf32> to vector<16x128xf32>
    %21 = arith.mulf %18, %20 : vector<16x128xf32>
    %c0_7 = arith.constant 0 : index
    %c0_8 = arith.constant 0 : index
    %22 = vector.load %arg4[%c0_7, %c0_8] : memref<1x128xf32, #tpu.memory_space<vmem>>, vector<1x128xf32>
    %23 = vector.broadcast %22 : vector<1x128xf32> to vector<16x128xf32>
    %24 = arith.addf %21, %23 : vector<16x128xf32>
    %25 = arith.truncf %24 : vector<16x128xf32> to vector<16x128xbf16>
    %c0_9 = arith.constant 0 : index
    %c0_10 = arith.constant 0 : index
    %26 = vector.load %arg5[%c0_9, %c0_10] : memref<128x128xf32, #tpu.memory_space<vmem>>, vector<128x128xf32>
    %27 = arith.truncf %26 : vector<128x128xf32> to vector<128x128xbf16>
    %cst_11 = arith.constant dense<0.000000e+00> : vector<16x128xf32>
    %28 = tpu.matmul %25, %27, %cst_11 {dimension_numbers = #tpu.dot_dimension_numbers<[1], [0], [0], [1], [0, 0, 1, 1], [], []>} : vector<16x128xbf16>, vector<128x128xbf16>, vector<16x128xf32> -> vector<16x128xf32>
    %c0_12 = arith.constant 0 : index
    %c0_13 = arith.constant 0 : index
    %29 = vector.load %arg6[%c0_12, %c0_13] : memref<1x128xf32, #tpu.memory_space<vmem>>, vector<1x128xf32>
    %30 = vector.broadcast %29 : vector<1x128xf32> to vector<16x128xf32>
    %31 = arith.addf %28, %30 : vector<16x128xf32>
    %c0_14 = arith.constant 0 : index
    %c0_15 = arith.constant 0 : index
    %32 = vector.load %arg7[%c0_14, %c0_15] : memref<16x128xf32, #tpu.memory_space<vmem>>, vector<16x128xf32>
    tpu.vector_store %arg7[%c0_14, %c0_15], %31 {strides = array<i32>} : memref<16x128xf32, #tpu.memory_space<vmem>>, vector<16x128xf32>,
    return
  }
  func.func @transform_0(%arg0: i32, %arg1: i32) -> (i32, i32) {
    %c0_i32 = arith.constant 0 : i32
    %c0_i32_0 = arith.constant 0 : i32
    return %arg0, %c0_i32 : i32, i32
  }
  func.func @transform_1(%arg0: i32, %arg1: i32) -> (i32, i32) {
    %c0_i32 = arith.constant 0 : i32
    %c0_i32_0 = arith.constant 0 : i32
    %c0_i32_1 = arith.constant 0 : i32
    return %c0_i32, %c0_i32_0 : i32, i32
  }
  func.func @transform_2(%arg0: i32, %arg1: i32) -> (i32, i32) {
    %c0_i32 = arith.constant 0 : i32
    %c0_i32_0 = arith.constant 0 : i32
    %c0_i32_1 = arith.constant 0 : i32
    return %c0_i32, %c0_i32_0 : i32, i32
  }
  func.func @transform_3(%arg0: i32, %arg1: i32) -> (i32, i32) {
    %c0_i32 = arith.constant 0 : i32
    %c0_i32_0 = arith.constant 0 : i32
    return %c0_i32, %arg1 : i32, i32
  }
  func.func @transform_4(%arg0: i32, %arg1: i32) -> (i32, i32) {
    %c0_i32 = arith.constant 0 : i32
    %c0_i32_0 = arith.constant 0 : i32
    return %c0_i32, %arg1 : i32, i32
  }
  func.func @transform_5(%arg0: i32, %arg1: i32) -> (i32, i32) {
    %c0_i32 = arith.constant 0 : i32
    return %arg0, %arg1 : i32, i32
  }
}

</mosaic_0001>

<bundles_post_ra>
// kernel: fwd.31
= control target key start
LH: loop header
LB: loop body
LE: loop exit
PB: predicated region body
PF: predicated region fallthrough
CT: control target
= control target key end

     0   :  { %s606_s15 = smov 0   ;;  %s608_s16 = smov 0   ;;  %s696_s0 = inlined_call_operand.vmem [shape: f32[32,128], index: 0, kind: input, shape index: {}]   ;;  %s697_s1 = inlined_call_operand.vmem [shape: f32[128,128], index: 1, kind: input, shape index: {}]   ;;  %s698_s2 = inlined_call_operand.vmem [shape: f32[1,128], index: 2, kind: input, shape index: {}]   ;;  %s699_s3 = inlined_call_operand.vmem [shape: f32[32,128], index: 3, kind: input, shape index: {}]   ;;  %s700_s4 = inlined_call_operand.vmem [shape: f32[32,128], index: 4, kind: output, shape index: {}]  }
   0x1   :  { %s610_s17 = smov 0  }
   0x2 LB: > { %s26_s18 = sadd.s32 1, %s573_s16  ;;  %p490_p0 = scmp.ge.s32.totalorder %s577_s17, 1  ;;  %s577_s17 = sphi %s610_s17, %s14_s17   ;;  %s573_s16 = sphi %s608_s16, %s702_s16   ;;  %s569_s15 = sphi %s606_s15, %s701_s15  }
   0x3   : > { %p28_p1 = scmp.ge.s32.totalorder %s26_s18, 2  ;;  %p210_p2 = scmp.lt.s32.totalorder %s577_s17, 3 }
   0x5   : > { %s704_s18 = smov (%p28_p1, %s26_s18), 0  ;;  %p211_p3 = pnand %p490_p0, %p210_p2 }
   0x6   : > { %s491_s9 = sshll.u32 (!%p211_p3), %s569_s15, 1 }
   0x7   : > { %214 = sbr.rel (%p211_p3) target bundleno = 248 (0xf8), region = 36  ;;  %p255_p4 = scmp.lt.s32.totalorder (!%p211_p3), %s491_s9, 3 }
   0xc   : > { %v303_v0 = vld [vmem:[%s697_s1 + $0x70] sm:$0xff]  ;;  %v304_v1 = vld [vmem:[%s697_s1 + $0x78] sm:$0xff]  ;;  %v301_v2 = vld [vmem:[%s697_s1 + $0x60] sm:$0xff]  ;;  %v579_v3 = vmov 0.0   ;;  %vm580_vm0 = vmmov 0   ;;  %s706_s9 = smov (!%p255_p4, %s491_s9), 3 }
   0xd   : > { %509 = vmatprep.subr.bf16.mxu0 %v579_v3  ;;  %v312_v4 = vpack.c.bf16 %v304_v1, %v303_v0  ;;  %v302_v5 = vld [vmem:[%s697_s1 + $0x68] sm:$0xff]  ;;  %525 = vmatprep.mubr.msk.bf16.mxu0 %vm580_vm0, %v579_v3  ;;  %v299_v7 = vld [vmem:[%s697_s1 + $0x50] sm:$0xff]  ;;  %v300_v8 = vld [vmem:[%s697_s1 + $0x58] sm:$0xff]  ;;  %s492_s25 = sshll.u32 %s706_s9, 3 }
   0xe   : > { %v311_v6 = vpack.c.bf16 %v302_v5, %v301_v2  ;;  %v310_v9 = vpack.c.bf16 %v300_v8, %v299_v7  ;;  %v297_v10 = vld [vmem:[%s697_s1 + $0x40] sm:$0xff]  ;;  %v298_v11 = vld [vmem:[%s697_s1 + $0x48] sm:$0xff]  ;;  %v295_v13 = vld [vmem:[%s697_s1 + $0x30] sm:$0xff]  ;;  %s258_s6 = scalar_lea.vmem %s696_s0, %s492_s25  ;;  %s274_s9 = scalar_lea.vmem %s699_s3, %s492_s25 }
   0xf   : > { %510 = vmatpush3.bf16.msra.mxu0 %v312_v4  ;;  %v309_v12 = vpack.c.bf16 %v298_v11, %v297_v10  ;;  %v296_v14 = vld [vmem:[%s697_s1 + $0x38] sm:$0xff]  ;;  %v293_v16 = vld [vmem:[%s697_s1 + $0x20] sm:$0xff]  ;;  %v294_v17 = vld [vmem:[%s697_s1 + $0x28] sm:$0xff]  ;;  %s283_s14 = scalar_lea.vmem %s700_s4, %s492_s25 }
  0x10   : > { %511 = vmatprep.subr.bf16.mxu0 %v579_v3  ;;  %v308_v15 = vpack.c.bf16 %v296_v14, %v295_v13  ;;  %v307_v18 = vpack.c.bf16 %v294_v17, %v293_v16  ;;  %v291_v19 = vld [vmem:[%s697_s1 + $0x10] sm:$0xff]  ;;  %v292_v20 = vld [vmem:[%s697_s1 + $0x18] sm:$0xff]  ;;  %v289_v22 = vld [vmem:[%s697_s1] sm:$0xff] }
  0x11   : > { %v306_v21 = vpack.c.bf16 %v292_v20, %v291_v19  ;;  %v290_v23 = vld [vmem:[%s697_s1 + $0x8] sm:$0xff]  ;;  %v286_v25 = vld [vmem:[%s258_s6] sm:$0xff] }
  0x12   : > { %v305_v24 = vpack.c.bf16 %v290_v23, %v289_v22  ;;  %v287_v26 = vld [vmem:[%s258_s6 + $0x8] sm:$0xff]  ;;  %v497_v28 = vld [vmem:[%s698_s2] ss:$0 sm:$0xff] }
  0x13   : > { %512 = vmatpush3.bf16.msra.mxu0 %v311_v6  ;;  %v288_v27 = vpack.c.bf16 %v287_v26, %v286_v25  ;;  %v361_v30 = vld [vmem:[%s274_s9] sm:$0xff]  ;;  %v362_v35 = vld [vmem:[%s274_s9 + $0x8] sm:$0xff] }
  0x14   : > { %513 = vmatprep.subr.bf16.mxu0 %v579_v3 }
  0x17   : > { %514 = vmatpush3.bf16.msra.mxu0 %v310_v9 }
  0x18   : > { %515 = vmatprep.subr.bf16.mxu0 %v579_v3 }
  0x1b   : > { %516 = vmatpush3.bf16.msra.mxu0 %v309_v12 }
  0x1c   : > { %517 = vmatprep.subr.bf16.mxu0 %v579_v3 }
  0x1f   : > { %518 = vmatpush3.bf16.msra.mxu0 %v308_v15 }
  0x20   : > { %519 = vmatprep.subr.bf16.mxu0 %v579_v3 }
  0x23   : > { %520 = vmatpush3.bf16.msra.mxu0 %v307_v18 }
  0x24   : > { %521 = vmatprep.subr.bf16.mxu0 %v579_v3 }
  0x27   : > { %522 = vmatpush3.bf16.msra.mxu0 %v306_v21 }
  0x28   : > { %523 = vmatprep.subr.bf16.mxu0 %v579_v3 }
  0x2b   : > { %524 = vmatpush3.bf16.msra.mxu0 %v305_v24 }
  0x2e   : > { %526 = vmatmul.mubr.bf16.vlgmr.msra.gmra.mxu0 %v288_v27 }
  0xee   : > { %v354_v29 = vpop.f32.mrf.mxu0 }
  0xef   : > { %v355_v31 = vadd.f32 %v497_v28, %v354_v29 }
  0xf0   : > { %v527_v32 = vpop.f32.mrf.mxu0 }
  0xf1   : > { %v363_v33 = vadd.f32 %v361_v30, %v355_v31 }
  0xf2   : > { %v357_v34 = vpop.f32.mrf.mxu0 }
  0xf3   : > { %365 = vst [vmem:[%s283_s14] sm:$0xff] %v363_v33  ;;  %v358_v36 = vadd.f32 %v497_v28, %v357_v34 }
  0xf4   : > { %v528_v37 = vpop.f32.mrf.mxu0 }
  0xf5   : > { %v364_v38 = vadd.f32 %v362_v35, %v358_v36 }
  0xf7   : > { %366 = vst [vmem:[%s283_s14 + $0x8] sm:$0xff] %v364_v38 }
  0xf8 PF: > { %s14_s17 = sadd.s32 1, %s577_s17   ;;  %s701_s15 = smov %s573_s16 }
  0xf9   : > { %p11_p5 = scmp.ge.s32.totalorder %s14_s17, 4   ;;  %s702_s16 = smov %s704_s18 }
  0xfb   :  { %13 = sbr.rel (!%p11_p5) target bundleno = 2 (0x2), region = 75 }

// kernel: fwd.29
= control target key start
LH: loop header
LB: loop body
LE: loop exit
PB: predicated region body
PF: predicated region fallthrough
CT: control target
= control target key end

     0   :  { %10 = vsyncpa [#allocation3], 0  ;;  %s810_s18 = smov 0   ;;  %s812_s19 = smov 0   ;;  %s900_s0 = inlined_call_operand.vmem [shape: f32[32,128], index: 0, kind: input, shape index: {}]   ;;  %s901_s1 = inlined_call_operand.vmem [shape: f32[1,128], index: 1, kind: input, shape index: {}]   ;;  %s902_s2 = inlined_call_operand.vmem [shape: f32[1,128], index: 2, kind: input, shape index: {}]   ;;  %s903_s3 = inlined_call_operand.hbm [shape: f32[128,384], index: 3, kind: input, shape index: {}]   ;;  %s904_s4 = inlined_call_operand.vmem [shape: f32[1,384], index: 4, kind: input, shape index: {}]   ;;  %s905_s5 = inlined_call_operand.vmem [shape: f32[32,384], index: 5, kind: output, shape index: {}]  }
   0x1   :  { %s814_s20 = smov 0  }
   0x2 LB: > { %s630_s21 = sadd.s32 4294967295, %s772_s20   ;;  %s28_s22 = sadd.s32 1, %s768_s19  ;;  %s772_s20 = sphi %s814_s20, %s16_s20   ;;  %s768_s19 = sphi %s812_s19, %s909_s19   ;;  %s764_s18 = sphi %s810_s18, %s908_s18  }
   0x3   : > { %p30_p0 = scmp.ge.s32.totalorder %s28_s22, 2  ;;  %p632_p1 = scmp.ge.s32.totalorder %s772_s20, 1 }
   0x4   : > { %p181_p2 = scmp.lt.s32.totalorder %s772_s20, 3  ;;  %p835_p4 = scmp.eq.s32.totalorder %s630_s21, 0 }
   0x5   : > { %s911_s22 = smov (%p30_p0, %s28_s22), 0  ;;  %s774_s25 = smov [#allocation2]  }
   0x6   : > { %p831_p3 = pnand %p632_p1, %p181_p2  ;;  %s202_s26 = sshll.u32 %s774_s25, 4  ;;  %s203_s26 = int_to_ptr.vmem [resolvable:$true] %s202_s26 }
   0x7   : > { %s731_s27 = scalar_lea.vmem %s203_s26, 6144  ;;  %p739_p11 = scmp.lt.s32.totalorder %s203_s26, %s203_s26 }
   0x8   : > { %p680_p5 = pneg %p831_p3  ;;  %p732_p8 = scmp.ne.s32.totalorder %s203_s26, %s731_s27 }
   0x9   : > { %p740_p12 = scmp.lt.s32.totalorder %s731_s27, %s731_s27 }
   0xa   : > { %p681_p6 = pnand %p835_p4, %p680_p5 }
   0xb   : > { %p741_p13 = por %p740_p12, %p739_p11 }
   0xc   : > { %p722_p7 = pneg %p681_p6 }
   0xe   : > { %p734_p9 = pnand %p732_p8, %p722_p7 }
  0x10   : > { %p735_p10 = pneg %p734_p9 }
  0x12   : > { %p742_p0 = pnand %p741_p13, %p735_p10 }
  0x14   : > { %745 = shalt.err (!%p742_p0)
}
  0x15   : > { %s775_s28 = smov 384   ;;  %s776_s29 = smov 24  }
  0x16   : > { %683 = dma.hbm_to_vmem [thread:$0]  (!%p681_p6), %s903_s3, 6144, %s203_s26, [#allocation3], %s775_s28, %s775_s28, %s776_s29  }
  0x17   : > { %235 = sbr.rel (%p831_p3) target bundleno = 550 (0x226), region = 40 }
  0x1c   : > { %759 = dma.done.wait (%p835_p4), [#allocation3], 6144  }
  0x1d   : > { %761 = vsyncadd (%p835_p4), [#allocation3], 4294961152  ;;  %s638_s7 = sshll.u32 %s764_s18, 1  ;;  %v384_v2 = vld [vmem:[#allocation2 + $0x158] sm:$0xff]  ;;  %v387_v3 = vld [vmem:[#allocation2 + $0x170] sm:$0xff]  ;;  %v777_v6 = vmov 0.0  }
  0x1e   : > { %p273_p1 = scmp.lt.s32.totalorder %s638_s7, 3  ;;  %v383_v4 = vld [vmem:[#allocation2 + $0x150] sm:$0xff]  ;;  %v411_v5 = vpack.c.bf16 %v387_v3, %v384_v2  ;;  %655 = vmatprep.subr.bf16.mxu1 %v777_v6  ;;  %v386_v7 = vld [vmem:[#allocation2 + $0x168] sm:$0xff]  ;;  %v385_v8 = vld [vmem:[#allocation2 + $0x160] sm:$0xff]  ;;  %v778_v48 = vmov 0   ;;  %vm779_vm0 = vmmov 0  }
  0x1f   : > { %v388_v9 = vld [vmem:[#allocation2 + $0x178] sm:$0xff]  ;;  %v410_v10 = vpack.c.bf16 %v386_v7, %v383_v4  ;;  %v378_v20 = vld [vmem:[#allocation2 + $0x128] sm:$0xff]  ;;  %v381_v21 = vld [vmem:[#allocation2 + $0x140] sm:$0xff]  ;;  %462 = vmatprep.mubr.bf16.mxu0 %v778_v48  ;;  %671 = vmatprep.mubr.msk.bf16.mxu1 %vm779_vm0, %v777_v6 }
  0x20   : > { %s913_s7 = smov (!%p273_p1, %s638_s7), 3  ;;  %v412_v11 = vpack.c.bf16 %v388_v9, %v385_v8  ;;  %430 = vmatprep.subr.bf16.mxu0 %v411_v5  ;;  %v408_v22 = vpack.c.bf16 %v381_v21, %v378_v20  ;;  %v377_v23 = vld [vmem:[#allocation2 + $0x120] sm:$0xff]  ;;  %v380_v24 = vld [vmem:[#allocation2 + $0x138] sm:$0xff]  ;;  %v379_v25 = vld [vmem:[#allocation2 + $0x130] sm:$0xff] }
  0x21   : > { %s639_s8 = sshll.u32 %s913_s7, 3  ;;  %431 = vmatpush1.bf16.msra.mxu0 %v410_v10  ;;  %v407_v26 = vpack.c.bf16 %v380_v24, %v377_v23  ;;  %v382_v27 = vld [vmem:[#allocation2 + $0x148] sm:$0xff]  ;;  %v372_v29 = vld [vmem:[#allocation2 + $0xf8] sm:$0xff]  ;;  %v375_v30 = vld [vmem:[#allocation2 + $0x110] sm:$0xff]  ;;  %s675_s18 = smul.u32 24, %s913_s7 }
  0x22   : > { %s276_s11 = scalar_lea.vmem %s900_s0, %s639_s8  ;;  %656 = vmatpush3.bf16.msra.mxu1 %v412_v11  ;;  %432 = vmatprep.subr.bf16.mxu0 %v408_v22  ;;  %v409_v28 = vpack.c.bf16 %v382_v27, %v379_v25  ;;  %v405_v31 = vpack.c.bf16 %v375_v30, %v372_v29  ;;  %v371_v32 = vld [vmem:[#allocation2 + $0xf0] sm:$0xff]  ;;  %v374_v33 = vld [vmem:[#allocation2 + $0x108] sm:$0xff]  ;;  %v373_v34 = vld [vmem:[#allocation2 + $0x100] sm:$0xff] }
  0x23   : > { %v297_v0 = vld [vmem:[%s276_s11] sm:$0xff]  ;;  %v298_v1 = vld [vmem:[%s276_s11 + $0x8] sm:$0xff]  ;;  %657 = vmatprep.subr.bf16.mxu1 %v777_v6  ;;  %v404_v35 = vpack.c.bf16 %v374_v33, %v371_v32  ;;  %v376_v36 = vld [vmem:[#allocation2 + $0x118] sm:$0xff]  ;;  %s293_s24 = scalar_lea.vmem %s905_s5, %s675_s18 }
  0x24   : > { %299 = vadd.xlane.f32.xlu0 %v297_v0  ;;  %v406_v37 = vpack.c.bf16 %v376_v36, %v373_v34  ;;  %v366_v38 = vld [vmem:[#allocation2 + $0xc8] sm:$0xff]  ;;  %v369_v39 = vld [vmem:[#allocation2 + $0xe0] sm:$0xff]  ;;  %v368_v42 = vld [vmem:[#allocation2 + $0xd8] sm:$0xff] }
  0x25   : > { %433 = vmatpush1.bf16.msra.mxu0 %v407_v26  ;;  %v402_v40 = vpack.c.bf16 %v369_v39, %v366_v38  ;;  %v365_v41 = vld [vmem:[#allocation2 + $0xc0] sm:$0xff]  ;;  %v367_v43 = vld [vmem:[#allocation2 + $0xd0] sm:$0xff]  ;;  %v370_v45 = vld [vmem:[#allocation2 + $0xe8] sm:$0xff] }
  0x26   : > { %658 = vmatpush3.bf16.msra.mxu1 %v409_v28  ;;  %434 = vmatprep.subr.bf16.mxu0 %v405_v31  ;;  %v401_v44 = vpack.c.bf16 %v368_v42, %v365_v41  ;;  %v360_v46 = vld [vmem:[#allocation2 + $0x98] sm:$0xff]  ;;  %v363_v47 = vld [vmem:[#allocation2 + $0xb0] sm:$0xff]  ;;  %v403_v49 = vpack.c.bf16 %v370_v45, %v367_v43  ;;  %v362_v52 = vld [vmem:[#allocation2 + $0xa8] sm:$0xff] }
  0x27   : > { %659 = vmatprep.subr.bf16.mxu1 %v777_v6  ;;  %v399_v50 = vpack.c.bf16 %v363_v47, %v360_v46  ;;  %v359_v51 = vld [vmem:[#allocation2 + $0x90] sm:$0xff]  ;;  %v361_v53 = vld [vmem:[#allocation2 + $0xa0] sm:$0xff]  ;;  %v364_v55 = vld [vmem:[#allocation2 + $0xb8] sm:$0xff] }
  0x28   : > { %301 = vadd.xlane.f32.xlu0 %v298_v1  ;;  %v398_v54 = vpack.c.bf16 %v362_v52, %v359_v51  ;;  %v354_v56 = vld [vmem:[#allocation2 + $0x68] sm:$0xff]  ;;  %v357_v57 = vld [vmem:[#allocation2 + $0x80] sm:$0xff]  ;;  %v400_v58 = vpack.c.bf16 %v364_v55, %v361_v53  ;;  %v356_v61 = vld [vmem:[#allocation2 + $0x78] sm:$0xff] }
  0x29   : > { %435 = vmatpush1.bf16.msra.mxu0 %v404_v35  ;;  %v396_v59 = vpack.c.bf16 %v357_v57, %v354_v56  ;;  %v353_v60 = vld [vmem:[#allocation2 + $0x60] sm:$0xff]  ;;  %v355_v62 = vld [vmem:[#allocation2 + $0x70] sm:$0xff]  ;;  %v358_v63 = vld [vmem:[#allocation2 + $0x88] sm:$0xff] }
  0x2a   : > { %660 = vmatpush3.bf16.msra.mxu1 %v406_v37  ;;  %436 = vmatprep.subr.bf16.mxu0 %v402_v40  ;;  %v395_v2 = vpack.c.bf16 %v356_v61, %v353_v60  ;;  %v397_v3 = vpack.c.bf16 %v358_v63, %v355_v62  ;;  %v347_v5 = vld [vmem:[#allocation2 + $0x30] sm:$0xff]  ;;  %v350_v7 = vld [vmem:[#allocation2 + $0x48] sm:$0xff]  ;;  %v349_v8 = vld [vmem:[#allocation2 + $0x40] sm:$0xff] }
  0x2b   : > { %661 = vmatprep.subr.bf16.mxu1 %v777_v6  ;;  %v352_v9 = vld [vmem:[#allocation2 + $0x58] sm:$0xff]  ;;  %v342_v10 = vld [vmem:[#allocation2 + $0x8] sm:$0xff]  ;;  %v345_v11 = vld [vmem:[#allocation2 + $0x20] sm:$0xff] }
  0x2c   : > { %v346_v20 = vld [vmem:[#allocation2 + $0x28] sm:$0xff]  ;;  %v642_v31 = vld [vmem:[%s901_s1] ss:$0 sm:$0xff] }
  0x2d   : > { %437 = vmatpush1.bf16.msra.mxu0 %v401_v44  ;;  %v643_v34 = vld [vmem:[%s902_s2] ss:$0 sm:$0xff] }
  0x2e   : > { %662 = vmatpush3.bf16.msra.mxu1 %v403_v49  ;;  %438 = vmatprep.subr.bf16.mxu0 %v399_v50  ;;  %v413_v42 = vld [vmem:[%s904_s4] sm:$0x7] }
  0x2f   : > { %663 = vmatprep.subr.bf16.mxu1 %v777_v6 }
  0x31   : > { %439 = vmatpush1.bf16.msra.mxu0 %v398_v54 }
  0x32   : > { %664 = vmatpush3.bf16.msra.mxu1 %v400_v58  ;;  %440 = vmatprep.subr.bf16.mxu0 %v396_v59 }
  0x33   : > { %665 = vmatprep.subr.bf16.mxu1 %v777_v6 }
  0x35   : > { %441 = vmatpush1.bf16.msra.mxu0 %v395_v2 }
  0x36   : > { %666 = vmatpush3.bf16.msra.mxu1 %v397_v3 }
  0x37   : > { %667 = vmatprep.subr.bf16.mxu1 %v777_v6 }
  0xad   : > { %v300_v12 = vpop.xlane.xlu0 %299 }
  0xae   : > { %v304_v13 = vmul.f32 0.0078125, %v300_v12  ;;  %v392_v12 = vpack.c.bf16 %v350_v7, %v347_v5 }
  0xb0   : > { %v861_v14 = vsub.f32 %v297_v0, %v304_v13  ;;  %v348_v0 = vld [vmem:[#allocation2 + $0x38] sm:$0xff]  ;;  %v394_v13 = vpack.c.bf16 %v352_v9, %v349_v8 }
  0xb1   : > { %v302_v15 = vpop.xlane.xlu0 %301 }
  0xb2   : > { %v305_v16 = vmul.f32 0.0078125, %v302_v15  ;;  %v308_v17 = vmul.f32 %v861_v14, %v861_v14  ;;  %v390_v15 = vpack.c.bf16 %v345_v11, %v342_v10  ;;  %668 = vmatpush3.bf16.msra.mxu1 %v394_v13 }
  0xb3   : > { %669 = vmatprep.subr.bf16.mxu1 %v777_v6 }
  0xb4   : > { %v865_v18 = vsub.f32 %v298_v1, %v305_v16  ;;  %310 = vadd.xlane.f32.xlu1 %v308_v17  ;;  %v351_v1 = vld [vmem:[#allocation2 + $0x50] sm:$0xff]  ;;  %v341_v16 = vld [vmem:[#allocation2] sm:$0xff]  ;;  %v344_v17 = vld [vmem:[#allocation2 + $0x18] sm:$0xff] }
  0xb5   : > { %v393_v4 = vpack.c.bf16 %v351_v1, %v348_v0  ;;  %v389_v21 = vpack.c.bf16 %v344_v17, %v341_v16 }
  0xb6   : > { %v309_v19 = vmul.f32 %v865_v18, %v865_v18 }
  0xb7   : > { %442 = vmatprep.subr.bf16.mxu0 %v393_v4 }
  0xb8   : > { %312 = vadd.xlane.f32.xlu1 %v309_v19  ;;  %v343_v19 = vld [vmem:[#allocation2 + $0x10] sm:$0xff]  ;;  %443 = vmatpush1.bf16.msra.mxu0 %v392_v12 }
  0xb9   : > { %444 = vmatprep.subr.bf16.mxu0 %v390_v15  ;;  %v391_v22 = vpack.c.bf16 %v346_v20, %v343_v19 }
  0xbb   : > { %670 = vmatpush3.bf16.msra.mxu1 %v391_v22 }
  0xbc   : > { %445 = vmatpush1.bf16.msra.mxu0 %v389_v21 }
 0x13d   : > { %v311_v23 = vpop.xlane.xlu1 %310 }
 0x13e   : > { %v314_v24 = vmul.f32 0.0078125, %v311_v23 }
 0x140   : > { %v316_v25 = vadd.f32 1e-05, %v314_v24 }
 0x141   : > { %v313_v26 = vpop.xlane.xlu1 %312 }
 0x142   : > { %716 = vrsqrt.f32 %v316_v25  ;;  %v315_v27 = vmul.f32 0.0078125, %v313_v26 }
 0x144   : > { %v317_v28 = vadd.f32 1e-05, %v315_v27 }
 0x146   : > { %718 = vrsqrt.f32 %v317_v28 }
 0x14f   : > { %v717_v29 = vpop.eup %716 }
 0x150   : > { %v320_v30 = vmul.f32 %v717_v29, %v861_v14  ;;  %v415_v14 = vlaneseq }
 0x152   : > { %v329_v33 = vmul.f32 %v642_v31, %v320_v30  ;;  %v416_v39 = vshrl.u32 %v415_v14, 7 }
 0x153   : > { %v719_v32 = vpop.eup %718 }
 0x154   : > { %v321_v6 = vmul.f32 %v719_v32, %v865_v18  ;;  %v338_v36 = vadd.f32 %v643_v34, %v329_v33  ;;  %v417_v40 = vsub.s32 0, %v416_v39  ;;  %v425_v41 = vsub.s32 2, %v416_v39 }
 0x155   : > { %v421_v18 = vsub.s32 1, %v416_v39 }
 0x156   : > { %v330_v35 = vmul.f32 %v642_v31, %v321_v6  ;;  %v418_v43 = vrot.slane %v413_v42, %v417_v40  ;;  %v426_v44 = vrot.slane %v413_v42, %v425_v41 }
 0x157   : > { %v422_v45 = vrot.slane %v413_v42, %v421_v18 }
 0x158   : > { %v339_v37 = vadd.f32 %v643_v34, %v330_v35 }
 0x15a   : > { %v340_v38 = vpack.c.bf16 %v339_v37, %v338_v36 }
 0x15c   : > { %463 = vmatmul.mubr.bf16.vlgmr.msra.gmra.mxu0 %v340_v38  ;;  %672 = vmatmul.mubr.bf16.vlgmr.msra.gmra.mxu1 %v340_v38 }
 0x21c   : > { %v464_v46 = vpop.f32.mrf.mxu0  ;;  %v507_v47 = vpop.f32.mrf.mxu1 }
 0x21d   : > { %v465_v48 = vadd.f32 %v464_v46, %v418_v43  ;;  %v508_v49 = vadd.f32 %v507_v47, %v426_v44 }
 0x21e   : > { %v466_v50 = vpop.f32.mrf.mxu0  ;;  %v673_v51 = vpop.f32.mrf.mxu1 }
 0x21f   : > { %514 = vst [vmem:[%s293_s24] sm:$0xff] %v465_v48  ;;  %516 = vst [vmem:[%s293_s24 + $0x10] sm:$0xff] %v508_v49  ;;  %v467_v52 = vadd.f32 %v466_v50, %v422_v45 }
 0x220   : > { %v468_v53 = vpop.f32.mrf.mxu0  ;;  %v510_v54 = vpop.f32.mrf.mxu1 }
 0x221   : > { %515 = vst [vmem:[%s293_s24 + $0x8] sm:$0xff] %v467_v52  ;;  %v469_v55 = vadd.f32 %v468_v53, %v418_v43  ;;  %v511_v56 = vadd.f32 %v510_v54, %v426_v44 }
 0x222   : > { %v470_v57 = vpop.f32.mrf.mxu0  ;;  %v674_v58 = vpop.f32.mrf.mxu1 }
 0x223   : > { %517 = vst [vmem:[%s293_s24 + $0x18] sm:$0xff] %v469_v55  ;;  %519 = vst [vmem:[%s293_s24 + $0x28] sm:$0xff] %v511_v56  ;;  %v471_v59 = vadd.f32 %v470_v57, %v422_v45 }
 0x225   : > { %518 = vst [vmem:[%s293_s24 + $0x20] sm:$0xff] %v471_v59 }
 0x226 PF: > { %s16_s20 = sadd.s32 1, %s772_s20   ;;  %s908_s18 = smov %s768_s19 }
 0x227   : > { %p13_p2 = scmp.ge.s32.totalorder %s16_s20, 4   ;;  %s909_s19 = smov %s911_s22 }
 0x229   :  { %15 = sbr.rel (!%p13_p2) target bundleno = 2 (0x2), region = 79 }
 0x22e   :  { %553 = vsyncpa [#allocation3], 1 }
 0x22f   :  { %555 = vsyncpa [#allocation3 + $0x1], 1 }

// kernel: fwd.30
= control target key start
LH: loop header
LB: loop body
LE: loop exit
PB: predicated region body
PF: predicated region fallthrough
CT: control target
= control target key end

     0   :  { %s899_s6 = smov 0   ;;  %s1013_s0 = inlined_call_operand.vmem [shape: f32[32,384], index: 0, kind: input, shape index: {}]   ;;  %s1014_s1 = inlined_call_operand.vmem [shape: f32[32,128], index: 1, kind: output, shape index: {}]  }
   0x1 LB: > { %s747_s7 = sadd.s32 4294967295, %s882_s6   ;;  %p751_p0 = scmp.ge.s32.totalorder %s882_s6, 1  ;;  %s882_s6 = sphi %s899_s6, %s11_s6  }
   0x2   : > { %p89_p1 = scmp.lt.s32.totalorder %s882_s6, 3 }
   0x4   : > { %p90_p2 = pnand %p751_p0, %p89_p1 }
   0x5   : > { %s752_s8 = sshll.u32 (!%p90_p2), %s747_s7, 1  ;;  %s886_s13 = smov (!%p90_p2), 96  }
   0x6   : > { %93 = sbr.rel (%p90_p2) target bundleno = 1430 (0x596), region = 24  ;;  %p111_p3 = scmp.lt.s32.totalorder (!%p90_p2), %s752_s8, 3 }
   0x7   : > { %s887_s14 = smov (!%p90_p2), 32   ;;  %s888_s15 = smov (!%p90_p2), 64  }
   0xb   : > { %v884_v0 = vmov 0.0   ;;  %vm885_vm0 = vmmov 0   ;;  %s1016_s8 = smov (!%p111_p3, %s752_s8), 3  ;;  %vm135_vm1 = vcmask 261120   ;;  %vm183_vm2 = vcmask 130048  }
   0xc   : > { %782 = vmatprep.subr.bf16.mxu0 %v884_v0  ;;  %784 = vmatprep.mubr.msk.bf16.mxu0 %vm885_vm0, %v884_v0  ;;  %s830_s9 = smul.u32 24, %s1016_s8  ;;  %s755_s16 = sshll.u32 %s1016_s8, 3  ;;  %vm396_vm3 = vcmask 523520   ;;  %vm542_vm4 = vcmask 785920   ;;  %vm688_vm5 = vcmask 1048320  }
   0xd   : > { %788 = vmatprep.subr.bf16.mxu1 %v884_v0  ;;  %790 = vmatprep.mubr.msk.bf16.mxu1 %vm885_vm0, %v884_v0  ;;  %s965_s19 = scalar_lea.vmem %s1014_s1, %s755_s16 }
   0xe   : > { %s919_s12 = scalar_lea.vmem %s1013_s0, %s830_s9 }
   0xf   : > { %v126_v1 = vld [vmem:[%s919_s12 + $0x8] sm:$0xff]  ;;  %v127_v2 = vld [vmem:[%s919_s12 + $0x20] sm:$0xff]  ;;  %v125_v5 = vld [vmem:[%s919_s12 + $0x18] sm:$0xff] }
  0x10   : > { %v124_v3 = vld [vmem:[%s919_s12] sm:$0xff]  ;;  %v128_v4 = vpack.c.bf16 %v127_v2, %v126_v1  ;;  %v133_v8 = vmul.f32 0.17677669, %v125_v5  ;;  %v129_v26 = vld [vmem:[%s919_s12 + $0x10] sm:$0xff]  ;;  %v130_v27 = vld [vmem:[%s919_s12 + $0x28] sm:$0xff] }
  0x11   : > { %v132_v7 = vmul.f32 0.17677669, %v124_v3  ;;  %v938_v28 = vpack.c.bf16 %v130_v27, %v129_v26 }
  0x12   : > { %v140_v6 = vsel %vm135_vm1, %v128_v4, 0 }
  0x13   : > { %783 = vmatpush3.bf16.xpose.msra.mxu0 %v140_v6  ;;  %v134_v9 = vpack.c.bf16 %v133_v8, %v132_v7  ;;  %789 = vmatpush3.bf16.msra.mxu1 %v938_v28 }
  0x14   : > { %800 = vmatprep.subr.bf16.mxu0 %v884_v0  ;;  %794 = vmatprep.subr.bf16.mxu1 %v884_v0 }
  0x1a   : > { %785 = vmatmul.mubr.msk.bf16.vlgmr.msra.gmra.mxu0 %vm135_vm1, %v134_v9 }
  0x1b   : > { %802 = vmatprep.mubr.msk.bf16.mxu0 %vm885_vm0, %v884_v0 }
  0xda   : > { %v176_v10 = vpop.f32.mrf.mxu0 }
  0xdb   : > { %v184_v11 = vsel %vm183_vm2, %v176_v10, -inf }
  0xdc   : > { %185 = vmax.xlane.f32.xlu0 %v184_v11  ;;  %v786_v12 = vpop.f32.mrf.mxu0 }
  0xde   : > { %v179_v13 = vpop.f32.mrf.mxu0 }
  0xdf   : > { %v187_v14 = vsel %vm183_vm2, %v179_v13, -inf }
  0xe0   : > { %188 = vmax.xlane.f32.xlu0 %v187_v14  ;;  %v787_v15 = vpop.f32.mrf.mxu0 }
  0xf6   : > { %268 = vrot.lane.b32.xlu0 %v128_v4, %s886_s13 }
  0xfa   : > { %560 = vrot.lane.b32.xlu0 %v128_v4, %s887_s14 }
 0x165   : > { %v186_v16 = vpop.xlane.xlu0 %185 }
 0x166   : > { %v190_v17 = vsub.f32 %v176_v10, %v186_v16 }
 0x168   : > { %v192_v18 = vmul.f32 1.442695, %v190_v17 }
 0x169   : > { %v189_v19 = vpop.xlane.xlu0 %188 }
 0x16a   : > { %844 = vpow2.f32 %v192_v18  ;;  %v191_v20 = vsub.f32 %v179_v13, %v189_v19 }
 0x16c   : > { %v194_v21 = vmul.f32 1.442695, %v191_v20 }
 0x16d   : > { %v269_v33 = vpop.permute.xlu0 %268 }
 0x16e   : > { %846 = vpow2.f32 %v194_v21  ;;  %v274_v37 = vsel %vm135_vm1, %v269_v33, 0 }
 0x171   : > { %v561_v41 = vpop.permute.xlu0 %560 }
 0x172   : > { %v566_v43 = vsel %vm135_vm1, %v561_v41, 0 }
 0x177   : > { %v845_v22 = vpop.eup %844 }
 0x178   : > { %v196_v23 = vsel %vm183_vm2, %v845_v22, 0.0 }
 0x179   : > { %197 = vadd.xlane.f32.xlu1 %v196_v23 }
 0x17b   : > { %v847_v24 = vpop.eup %846 }
 0x17c   : > { %v199_v25 = vsel %vm183_vm2, %v847_v24, 0.0 }
 0x17d   : > { %200 = vadd.xlane.f32.xlu1 %v199_v25 }
 0x18e   : > { %265 = vrot.lane.b32.xlu1 %v134_v9, %s886_s13 }
 0x192   : > { %414 = vrot.lane.b32.xlu1 %v128_v4, %s888_s15 }
 0x196   : > { %411 = vrot.lane.b32.xlu1 %v134_v9, %s888_s15 }
 0x19a   : > { %557 = vrot.lane.b32.xlu1 %v134_v9, %s887_s14 }
 0x202   : > { %v198_v29 = vpop.xlane.xlu1 %197 }
 0x203   : > { %848 = vrcp.f32 %v198_v29 }
 0x206   : > { %v201_v30 = vpop.xlane.xlu1 %200 }
 0x207   : > { %850 = vrcp.f32 %v201_v30 }
 0x20a   : > { %v266_v36 = vpop.permute.xlu1 %265 }
 0x20e   : > { %v415_v39 = vpop.permute.xlu1 %414 }
 0x20f   : > { %v420_v40 = vsel %vm135_vm1, %v415_v39, 0 }
 0x210   : > { %v849_v31 = vpop.eup %848 }
 0x211   : > { %v204_v34 = vmul.f32 %v849_v31, %v845_v22 }
 0x212   : > { %v412_v42 = vpop.permute.xlu1 %411 }
 0x214   : > { %v851_v32 = vpop.eup %850 }
 0x215   : > { %v205_v35 = vmul.f32 %v851_v32, %v847_v24 }
 0x216   : > { %v558_v44 = vpop.permute.xlu1 %557 }
 0x217   : > { %v206_v38 = vpack.c.bf16 %v205_v35, %v204_v34 }
 0x219   : > { %791 = vmatmul.mubr.msk.bf16.vlgmr.msra.gmra.mxu1 %vm183_vm2, %v206_v38 }
 0x21a   : > { %795 = vmatpush3.bf16.xpose.msra.mxu1 %v274_v37  ;;  %796 = vmatprep.mubr.msk.bf16.mxu1 %vm885_vm0, %v884_v0 }
 0x21b   : > { %806 = vmatprep.subr.bf16.mxu1 %v884_v0 }
 0x221   : > { %797 = vmatmul.mubr.msk.bf16.vlgmr.msra.gmra.mxu1 %vm135_vm1, %v266_v36 }
 0x222   : > { %807 = vmatpush3.bf16.xpose.msra.mxu1 %v420_v40  ;;  %808 = vmatprep.mubr.msk.bf16.mxu1 %vm885_vm0, %v884_v0 }
 0x223   : > { %818 = vmatprep.subr.bf16.mxu1 %v884_v0 }
 0x229   : > { %809 = vmatmul.mubr.msk.bf16.vlgmr.msra.gmra.mxu1 %vm135_vm1, %v412_v42 }
 0x22a   : > { %819 = vmatpush3.bf16.xpose.msra.mxu1 %v566_v43  ;;  %820 = vmatprep.mubr.msk.bf16.mxu1 %vm885_vm0, %v884_v0 }
 0x231   : > { %821 = vmatmul.mubr.msk.bf16.vlgmr.msra.gmra.mxu1 %vm135_vm1, %v558_v44 }
 0x2d9   : > { %v244_v45 = vpop.f32.mrf.mxu1 }
 0x2da   : > { %251 = vst.msk [vmem:[%s965_s19] sm:$0xff] %vm135_vm1, %v244_v45 }
 0x2db   : > { %v792_v46 = vpop.f32.mrf.mxu1 }
 0x2dd   : > { %v247_v47 = vpop.f32.mrf.mxu1 }
 0x2de   : > { %252 = vst.msk [vmem:[%s965_s19 + $0x8] sm:$0xff] %vm135_vm1, %v247_v47 }
 0x2df   : > { %v793_v48 = vpop.f32.mrf.mxu1 }
 0x2e1   : > { %v310_v49 = vpop.f32.mrf.mxu1 }
 0x2e2   : > { %v317_v50 = vsel %vm183_vm2, %v310_v49, -inf }
 0x2e3   : > { %318 = vmax.xlane.f32.xlu0 %v317_v50  ;;  %v798_v51 = vpop.f32.mrf.mxu1 }
 0x2e5   : > { %v313_v52 = vpop.f32.mrf.mxu1 }
 0x2e6   : > { %v320_v53 = vsel %vm183_vm2, %v313_v52, -inf }
 0x2e7   : > { %321 = vmax.xlane.f32.xlu1 %v320_v53  ;;  %v799_v54 = vpop.f32.mrf.mxu1 }
 0x2e9   : > { %v456_v55 = vpop.f32.mrf.mxu1 }
 0x2ea   : > { %v463_v56 = vsel %vm183_vm2, %v456_v55, -inf }
 0x2eb   : > { %464 = vmax.xlane.f32.xlu0 %v463_v56  ;;  %v810_v57 = vpop.f32.mrf.mxu1 }
 0x2ed   : > { %v459_v58 = vpop.f32.mrf.mxu1 }
 0x2ee   : > { %v466_v59 = vsel %vm183_vm2, %v459_v58, -inf }
 0x2ef   : > { %467 = vmax.xlane.f32.xlu0 %v466_v59  ;;  %v811_v60 = vpop.f32.mrf.mxu1 }
 0x2f1   : > { %v602_v61 = vpop.f32.mrf.mxu1 }
 0x2f2   : > { %v609_v62 = vsel %vm183_vm2, %v602_v61, -inf }
 0x2f3   : > { %610 = vmax.xlane.f32.xlu0 %v609_v62  ;;  %v822_v63 = vpop.f32.mrf.mxu1 }
 0x2f5   : > { %v605_v1 = vpop.f32.mrf.mxu1 }
 0x2f6   : > { %v612_v2 = vsel %vm183_vm2, %v605_v1, -inf }
 0x2f7   : > { %613 = vmax.xlane.f32.xlu1 %v612_v2  ;;  %v823_v3 = vpop.f32.mrf.mxu1 }
 0x36c   : > { %v319_v4 = vpop.xlane.xlu0 %318 }
 0x36d   : > { %v323_v5 = vsub.f32 %v310_v49, %v319_v4 }
 0x36f   : > { %v325_v6 = vmul.f32 1.442695, %v323_v5 }
 0x370   : > { %v322_v7 = vpop.xlane.xlu1 %321 }
 0x371   : > { %852 = vpow2.f32 %v325_v6  ;;  %v324_v8 = vsub.f32 %v313_v52, %v322_v7 }
 0x373   : > { %v327_v9 = vmul.f32 1.442695, %v324_v8 }
 0x374   : > { %v465_v10 = vpop.xlane.xlu0 %464 }
 0x375   : > { %854 = vpow2.f32 %v327_v9  ;;  %v469_v11 = vsub.f32 %v456_v55, %v465_v10 }
 0x377   : > { %v471_v12 = vmul.f32 1.442695, %v469_v11 }
 0x378   : > { %v468_v13 = vpop.xlane.xlu0 %467 }
 0x379   : > { %856 = vpow2.f32 %v471_v12  ;;  %v470_v14 = vsub.f32 %v459_v58, %v468_v13 }
 0x37b   : > { %v473_v15 = vmul.f32 1.442695, %v470_v14 }
 0x37c   : > { %v611_v16 = vpop.xlane.xlu0 %610 }
 0x37d   : > { %858 = vpow2.f32 %v473_v15  ;;  %v615_v17 = vsub.f32 %v602_v61, %v611_v16 }
 0x37e   : > { %v853_v18 = vpop.eup %852 }
 0x37f   : > { %v617_v19 = vmul.f32 1.442695, %v615_v17  ;;  %v329_v20 = vsel %vm183_vm2, %v853_v18, 0.0 }
 0x380   : > { %330 = vadd.xlane.f32.xlu0 %v329_v20  ;;  %v614_v30 = vpop.xlane.xlu1 %613 }
 0x381   : > { %860 = vpow2.f32 %v617_v19  ;;  %v616_v31 = vsub.f32 %v605_v1, %v614_v30 }
 0x382   : > { %v855_v21 = vpop.eup %854 }
 0x383   : > { %v332_v22 = vsel %vm183_vm2, %v855_v21, 0.0  ;;  %v619_v32 = vmul.f32 1.442695, %v616_v31 }
 0x384   : > { %333 = vadd.xlane.f32.xlu1 %v332_v22 }
 0x385   : > { %862 = vpow2.f32 %v619_v32 }
 0x386   : > { %v857_v23 = vpop.eup %856 }
 0x387   : > { %v475_v24 = vsel %vm183_vm2, %v857_v23, 0.0 }
 0x388   : > { %476 = vadd.xlane.f32.xlu0 %v475_v24 }
 0x38a   : > { %v859_v25 = vpop.eup %858 }
 0x38b   : > { %v478_v26 = vsel %vm183_vm2, %v859_v25, 0.0 }
 0x38c   : > { %479 = vadd.xlane.f32.xlu1 %v478_v26 }
 0x38e   : > { %v861_v27 = vpop.eup %860 }
 0x38f   : > { %v621_v29 = vsel %vm183_vm2, %v861_v27, 0.0 }
 0x390   : > { %622 = vadd.xlane.f32.xlu0 %v621_v29 }
 0x392   : > { %v863_v33 = vpop.eup %862 }
 0x393   : > { %v624_v34 = vsel %vm183_vm2, %v863_v33, 0.0 }
 0x39d   : > { %487 = vrot.lane.b32.xlu1 %v938_v28, %s888_s15 }
 0x3a6   : > { %341 = vrot.lane.b32.xlu0 %v938_v28, %s886_s13 }
 0x3c1   : > { %625 = vadd.xlane.f32.xlu1 %v624_v34 }
 0x3d2   : > { %633 = vrot.lane.b32.xlu1 %v938_v28, %s887_s14 }
 0x409   : > { %v331_v35 = vpop.xlane.xlu0 %330 }
 0x40a   : > { %864 = vrcp.f32 %v331_v35 }
 0x40d   : > { %v334_v36 = vpop.xlane.xlu1 %333 }
 0x40e   : > { %866 = vrcp.f32 %v334_v36 }
 0x411   : > { %v477_v37 = vpop.xlane.xlu0 %476 }
 0x412   : > { %868 = vrcp.f32 %v477_v37 }
 0x415   : > { %v480_v38 = vpop.xlane.xlu1 %479 }
 0x416   : > { %870 = vrcp.f32 %v480_v38 }
 0x417   : > { %v865_v39 = vpop.eup %864 }
 0x418   : > { %v337_v42 = vmul.f32 %v865_v39, %v853_v18 }
 0x419   : > { %v623_v40 = vpop.xlane.xlu0 %622  ;;  %v488_v28 = vpop.permute.xlu1 %487 }
 0x41a   : > { %872 = vrcp.f32 %v623_v40 }
 0x41b   : > { %v867_v41 = vpop.eup %866 }
 0x41c   : > { %v338_v43 = vmul.f32 %v867_v41, %v855_v21 }
 0x41d   : > { %v342_v44 = vpop.permute.xlu0 %341 }
 0x41e   : > { %801 = vmatpush3.bf16.msra.mxu0 %v342_v44  ;;  %v339_v45 = vpack.c.bf16 %v338_v43, %v337_v42 }
 0x41f   : > { %812 = vmatprep.subr.bf16.mxu0 %v884_v0  ;;  %v869_v46 = vpop.eup %868 }
 0x420   : > { %v483_v48 = vmul.f32 %v869_v46, %v857_v23 }
 0x421   : > { %803 = vmatmul.mubr.msk.bf16.vlgmr.msra.gmra.mxu0 %vm183_vm2, %v339_v45 }
 0x422   : > { %813 = vmatpush3.bf16.msra.mxu0 %v488_v28  ;;  %814 = vmatprep.mubr.msk.bf16.mxu0 %vm885_vm0, %v884_v0 }
 0x423   : > { %v871_v47 = vpop.eup %870  ;;  %824 = vmatprep.subr.bf16.mxu0 %v884_v0 }
 0x424   : > { %v484_v49 = vmul.f32 %v871_v47, %v859_v25 }
 0x426   : > { %v485_v50 = vpack.c.bf16 %v484_v49, %v483_v48 }
 0x427   : > { %v873_v53 = vpop.eup %872 }
 0x428   : > { %v629_v55 = vmul.f32 %v873_v53, %v861_v27 }
 0x429   : > { %815 = vmatmul.mubr.msk.bf16.vlgmr.msra.gmra.mxu0 %vm183_vm2, %v485_v50 }
 0x42a   : > { %826 = vmatprep.mubr.msk.bf16.mxu0 %vm885_vm0, %v884_v0 }
 0x44a   : > { %v626_v51 = vpop.xlane.xlu1 %625 }
 0x44b   : > { %874 = vrcp.f32 %v626_v51 }
 0x44e   : > { %v634_v52 = vpop.permute.xlu1 %633 }
 0x44f   : > { %825 = vmatpush3.bf16.msra.mxu0 %v634_v52 }
 0x458   : > { %v875_v54 = vpop.eup %874 }
 0x459   : > { %v630_v56 = vmul.f32 %v875_v54, %v863_v33 }
 0x45b   : > { %v631_v57 = vpack.c.bf16 %v630_v56, %v629_v55 }
 0x45d   : > { %827 = vmatmul.mubr.msk.bf16.vlgmr.msra.gmra.mxu0 %vm183_vm2, %v631_v57 }
 0x4e1   : > { %v381_v58 = vpop.f32.mrf.mxu0 }
 0x4e2   : > { %390 = vrot.lane.b32.xlu1 %v381_v58, %s887_s14 }
 0x4e3   : > { %v804_v59 = vpop.f32.mrf.mxu0 }
 0x4e5   : > { %v384_v60 = vpop.f32.mrf.mxu0 }
 0x4e6   : > { %392 = vrot.lane.b32.xlu0 %v384_v60, %s887_s14 }
 0x4e7   : > { %v805_v0 = vpop.f32.mrf.mxu0 }
 0x4e9   : > { %v527_v61 = vpop.f32.mrf.mxu0 }
 0x4ea   : > { %536 = vrot.lane.b32.xlu1 %v527_v61, %s888_s15 }
 0x4eb   : > { %v816_v62 = vpop.f32.mrf.mxu0 }
 0x4ed   : > { %v530_v63 = vpop.f32.mrf.mxu0 }
 0x4ee   : > { %538 = vrot.lane.b32.xlu0 %v530_v63, %s888_s15 }
 0x4ef   : > { %v817_v1 = vpop.f32.mrf.mxu0 }
 0x51d   : > { %v673_v2 = vpop.f32.mrf.mxu0 }
 0x51e   : > { %682 = vrot.lane.b32.xlu1 %v673_v2, %s886_s13 }
 0x51f   : > { %v828_v3 = vpop.f32.mrf.mxu0 }
 0x521   : > { %v676_v4 = vpop.f32.mrf.mxu0 }
 0x522   : > { %684 = vrot.lane.b32.xlu0 %v676_v4, %s886_s13 }
 0x523   : > { %v829_v5 = vpop.f32.mrf.mxu0 }
 0x554   : > { %v391_v6 = vpop.permute.xlu1 %390 }
 0x555   : > { %397 = vst.msk [vmem:[%s965_s19] sm:$0xff] %vm396_vm3, %v391_v6 }
 0x558   : > { %v393_v7 = vpop.permute.xlu0 %392 }
 0x559   : > { %398 = vst.msk [vmem:[%s965_s19 + $0x8] sm:$0xff] %vm396_vm3, %v393_v7 }
 0x55c   : > { %v537_v8 = vpop.permute.xlu1 %536 }
 0x55d   : > { %543 = vst.msk [vmem:[%s965_s19] sm:$0xff] %vm542_vm4, %v537_v8 }
 0x560   : > { %v539_v9 = vpop.permute.xlu0 %538 }
 0x561   : > { %544 = vst.msk [vmem:[%s965_s19 + $0x8] sm:$0xff] %vm542_vm4, %v539_v9 }
 0x590   : > { %v683_v10 = vpop.permute.xlu1 %682 }
 0x591   : > { %689 = vst.msk [vmem:[%s965_s19] sm:$0xff] %vm688_vm5, %v683_v10 }
 0x594   : > { %v685_v11 = vpop.permute.xlu0 %684 }
 0x595   : > { %690 = vst.msk [vmem:[%s965_s19 + $0x8] sm:$0xff] %vm688_vm5, %v685_v11 }
 0x596 PF: > { %s11_s6 = sadd.s32 1, %s882_s6  }
 0x597   : > { %p8_p4 = scmp.ge.s32.totalorder %s11_s6, 4  }
 0x599   :  { %10 = sbr.rel (!%p8_p4) target bundleno = 1 (0x1), region = 54 }

// kernel: fwd.32
= control target key start
LH: loop header
LB: loop body
LE: loop exit
PB: predicated region body
PF: predicated region fallthrough
CT: control target
= control target key end

     0   :  { %s662_s18 = smov 0   ;;  %s664_s19 = smov 0   ;;  %s814_s0 = inlined_call_operand.vmem [shape: f32[32,128], index: 0, kind: input, shape index: {}]   ;;  %s815_s1 = inlined_call_operand.vmem [shape: f32[1,128], index: 1, kind: input, shape index: {}]   ;;  %s816_s2 = inlined_call_operand.vmem [shape: f32[1,128], index: 2, kind: input, shape index: {}]   ;;  %s817_s3 = inlined_call_operand.vmem [shape: f32[128,256], index: 3, kind: input, shape index: {}]   ;;  %s818_s4 = inlined_call_operand.vmem [shape: f32[1,256], index: 4, kind: input, shape index: {}]   ;;  %s819_s5 = inlined_call_operand.vmem [shape: f32[32,256], index: 5, kind: output, shape index: {}]  }
   0x1   :  { %s666_s20 = smov 0  }
   0x2 LB: > { %s27_s21 = sadd.s32 1, %s625_s19  ;;  %p567_p0 = scmp.ge.s32.totalorder %s629_s20, 1  ;;  %s629_s20 = sphi %s666_s20, %s15_s20   ;;  %s625_s19 = sphi %s664_s19, %s821_s19   ;;  %s621_s18 = sphi %s662_s18, %s820_s18  }
   0x3   : > { %p29_p1 = scmp.ge.s32.totalorder %s27_s21, 2  ;;  %p223_p2 = scmp.lt.s32.totalorder %s629_s20, 3 }
   0x5   : > { %s823_s21 = smov (%p29_p1, %s27_s21), 0  ;;  %p224_p3 = pnand %p567_p0, %p223_p2 }
   0x6   : > { %s568_s22 = sshll.u32 (!%p224_p3), %s621_s18, 1 }
   0x7   : > { %227 = sbr.rel (%p224_p3) target bundleno = 532 (0x214), region = 40  ;;  %p266_p4 = scmp.lt.s32.totalorder (!%p224_p3), %s568_s22, 3 }
   0xc   : > { %s825_s22 = smov (!%p266_p4, %s568_s22), 3  ;;  %v368_v2 = vld [vmem:[%s817_s3 + $0xe8] sm:$0xff]  ;;  %v370_v3 = vld [vmem:[%s817_s3 + $0xf8] sm:$0xff]  ;;  %v367_v4 = vld [vmem:[%s817_s3 + $0xe0] sm:$0xff]  ;;  %v631_v38 = vmov 0  }
   0xd   : > { %s569_s23 = sshll.u32 %s825_s22, 3  ;;  %v386_v5 = vpack.c.bf16 %v370_v3, %v368_v2  ;;  %v369_v6 = vld [vmem:[%s817_s3 + $0xf0] sm:$0xff]  ;;  %v364_v16 = vld [vmem:[%s817_s3 + $0xc8] sm:$0xff]  ;;  %v366_v17 = vld [vmem:[%s817_s3 + $0xd8] sm:$0xff]  ;;  %431 = vmatprep.mubr.bf16.mxu0 %v631_v38  ;;  %s577_s9 = sshll.u32 %s825_s22, 4 }
   0xe   : > { %s269_s26 = scalar_lea.vmem %s814_s0, %s569_s23  ;;  %v385_v7 = vpack.c.bf16 %v369_v6, %v367_v4  ;;  %v384_v18 = vpack.c.bf16 %v366_v17, %v364_v16  ;;  %v363_v19 = vld [vmem:[%s817_s3 + $0xc0] sm:$0xff]  ;;  %v365_v20 = vld [vmem:[%s817_s3 + $0xd0] sm:$0xff]  ;;  %v360_v22 = vld [vmem:[%s817_s3 + $0xa8] sm:$0xff]  ;;  %s291_s12 = scalar_lea.vmem %s819_s5, %s577_s9 }
   0xf   : > { %v295_v0 = vld [vmem:[%s269_s26] sm:$0xff]  ;;  %v296_v1 = vld [vmem:[%s269_s26 + $0x8] sm:$0xff]  ;;  %399 = vmatprep.subr.bf16.mxu0 %v386_v5  ;;  %v383_v21 = vpack.c.bf16 %v365_v20, %v363_v19  ;;  %v362_v23 = vld [vmem:[%s817_s3 + $0xb8] sm:$0xff] }
  0x10   : > { %297 = vadd.xlane.f32.xlu0 %v295_v0  ;;  %400 = vmatpush1.bf16.msra.mxu0 %v385_v7  ;;  %v382_v24 = vpack.c.bf16 %v362_v23, %v360_v22  ;;  %v359_v25 = vld [vmem:[%s817_s3 + $0xa0] sm:$0xff]  ;;  %v361_v26 = vld [vmem:[%s817_s3 + $0xb0] sm:$0xff]  ;;  %v356_v28 = vld [vmem:[%s817_s3 + $0x88] sm:$0xff] }
  0x11   : > { %401 = vmatprep.subr.bf16.mxu0 %v384_v18  ;;  %v381_v27 = vpack.c.bf16 %v361_v26, %v359_v25  ;;  %v358_v29 = vld [vmem:[%s817_s3 + $0x98] sm:$0xff]  ;;  %v355_v31 = vld [vmem:[%s817_s3 + $0x80] sm:$0xff]  ;;  %v357_v32 = vld [vmem:[%s817_s3 + $0x90] sm:$0xff] }
  0x12   : > { %v380_v30 = vpack.c.bf16 %v358_v29, %v356_v28  ;;  %v352_v33 = vld [vmem:[%s817_s3 + $0x68] sm:$0xff]  ;;  %v379_v34 = vpack.c.bf16 %v357_v32, %v355_v31  ;;  %v354_v35 = vld [vmem:[%s817_s3 + $0x78] sm:$0xff]  ;;  %v351_v36 = vld [vmem:[%s817_s3 + $0x60] sm:$0xff] }
  0x13   : > { %v353_v37 = vld [vmem:[%s817_s3 + $0x70] sm:$0xff]  ;;  %v378_v39 = vpack.c.bf16 %v354_v35, %v352_v33  ;;  %v348_v40 = vld [vmem:[%s817_s3 + $0x48] sm:$0xff]  ;;  %v350_v41 = vld [vmem:[%s817_s3 + $0x58] sm:$0xff] }
  0x14   : > { %299 = vadd.xlane.f32.xlu0 %v296_v1  ;;  %402 = vmatpush1.bf16.msra.mxu0 %v383_v21  ;;  %v377_v42 = vpack.c.bf16 %v353_v37, %v351_v36  ;;  %v376_v43 = vpack.c.bf16 %v350_v41, %v348_v40  ;;  %v347_v44 = vld [vmem:[%s817_s3 + $0x40] sm:$0xff]  ;;  %v349_v45 = vld [vmem:[%s817_s3 + $0x50] sm:$0xff]  ;;  %v344_v46 = vld [vmem:[%s817_s3 + $0x28] sm:$0xff] }
  0x15   : > { %403 = vmatprep.subr.bf16.mxu0 %v382_v24  ;;  %v346_v47 = vld [vmem:[%s817_s3 + $0x38] sm:$0xff]  ;;  %v375_v48 = vpack.c.bf16 %v349_v45, %v347_v44  ;;  %v343_v50 = vld [vmem:[%s817_s3 + $0x20] sm:$0xff]  ;;  %v345_v51 = vld [vmem:[%s817_s3 + $0x30] sm:$0xff] }
  0x16   : > { %v374_v49 = vpack.c.bf16 %v346_v47, %v344_v46  ;;  %v340_v52 = vld [vmem:[%s817_s3 + $0x8] sm:$0xff]  ;;  %v342_v53 = vld [vmem:[%s817_s3 + $0x18] sm:$0xff]  ;;  %v373_v54 = vpack.c.bf16 %v345_v51, %v343_v50  ;;  %v339_v56 = vld [vmem:[%s817_s3] sm:$0xff] }
  0x17   : > { %v372_v55 = vpack.c.bf16 %v342_v53, %v340_v52  ;;  %v341_v57 = vld [vmem:[%s817_s3 + $0x10] sm:$0xff]  ;;  %v573_v3 = vld [vmem:[%s815_s1] ss:$0 sm:$0xff] }
  0x18   : > { %404 = vmatpush1.bf16.msra.mxu0 %v381_v27  ;;  %v371_v58 = vpack.c.bf16 %v341_v57, %v339_v56  ;;  %v574_v7 = vld [vmem:[%s816_s2] ss:$0 sm:$0xff] }
  0x19   : > { %405 = vmatprep.subr.bf16.mxu0 %v380_v30  ;;  %v387_v16 = vld [vmem:[%s818_s4] sm:$0x3] }
  0x1c   : > { %406 = vmatpush1.bf16.msra.mxu0 %v379_v34 }
  0x1d   : > { %407 = vmatprep.subr.bf16.mxu0 %v378_v39 }
  0x20   : > { %408 = vmatpush1.bf16.msra.mxu0 %v377_v42 }
  0x21   : > { %409 = vmatprep.subr.bf16.mxu0 %v376_v43 }
  0x24   : > { %410 = vmatpush1.bf16.msra.mxu0 %v375_v48 }
  0x25   : > { %411 = vmatprep.subr.bf16.mxu0 %v374_v49 }
  0x28   : > { %412 = vmatpush1.bf16.msra.mxu0 %v373_v54 }
  0x29   : > { %413 = vmatprep.subr.bf16.mxu0 %v372_v55 }
  0x2c   : > { %414 = vmatpush1.bf16.msra.mxu0 %v371_v58 }
  0x99   : > { %v298_v8 = vpop.xlane.xlu0 %297 }
  0x9a   : > { %v302_v9 = vmul.f32 0.0078125, %v298_v8 }
  0x9c   : > { %v698_v10 = vsub.f32 %v295_v0, %v302_v9 }
  0x9d   : > { %v300_v11 = vpop.xlane.xlu0 %299 }
  0x9e   : > { %v303_v12 = vmul.f32 0.0078125, %v300_v11  ;;  %v306_v13 = vmul.f32 %v698_v10, %v698_v10 }
  0xa0   : > { %v702_v14 = vsub.f32 %v296_v1, %v303_v12  ;;  %308 = vadd.xlane.f32.xlu1 %v306_v13  ;;  %v389_v13 = vlaneseq }
  0xa2   : > { %v307_v15 = vmul.f32 %v702_v14, %v702_v14 }
  0xa4   : > { %310 = vadd.xlane.f32.xlu1 %v307_v15 }
 0x129   : > { %v309_v59 = vpop.xlane.xlu1 %308 }
 0x12a   : > { %v312_v60 = vmul.f32 0.0078125, %v309_v59 }
 0x12c   : > { %v314_v61 = vadd.f32 1e-05, %v312_v60 }
 0x12d   : > { %v311_v62 = vpop.xlane.xlu1 %310 }
 0x12e   : > { %603 = vrsqrt.f32 %v314_v61  ;;  %v313_v63 = vmul.f32 0.0078125, %v311_v62 }
 0x130   : > { %v315_v0 = vadd.f32 1e-05, %v313_v63 }
 0x132   : > { %605 = vrsqrt.f32 %v315_v0 }
 0x13b   : > { %v604_v1 = vpop.eup %603 }
 0x13c   : > { %v318_v2 = vmul.f32 %v604_v1, %v698_v10  ;;  %v390_v10 = vshrl.u32 %v389_v13, 7 }
 0x13e   : > { %v327_v6 = vmul.f32 %v573_v3, %v318_v2  ;;  %v391_v15 = vsub.s32 0, %v390_v10  ;;  %v395_v17 = vsub.s32 1, %v390_v10 }
 0x13f   : > { %v606_v4 = vpop.eup %605 }
 0x140   : > { %v319_v5 = vmul.f32 %v606_v4, %v702_v14  ;;  %v336_v9 = vadd.f32 %v574_v7, %v327_v6  ;;  %v392_v18 = vrot.slane %v387_v16, %v391_v15  ;;  %v396_v14 = vrot.slane %v387_v16, %v395_v17 }
 0x142   : > { %v328_v8 = vmul.f32 %v573_v3, %v319_v5 }
 0x144   : > { %v337_v11 = vadd.f32 %v574_v7, %v328_v8 }
 0x146   : > { %v338_v12 = vpack.c.bf16 %v337_v11, %v336_v9 }
 0x148   : > { %432 = vmatmul.mubr.bf16.vlgmr.msra.gmra.mxu0 %v338_v12 }
 0x208   : > { %v433_v19 = vpop.f32.mrf.mxu0 }
 0x209   : > { %v434_v20 = vadd.f32 %v433_v19, %v392_v18 }
 0x20a   : > { %v435_v21 = vpop.f32.mrf.mxu0 }
 0x20b   : > { %v442_v22 = vmax.f32 %v434_v20, 0.0  ;;  %v436_v23 = vadd.f32 %v435_v21, %v396_v14 }
 0x20c   : > { %v437_v24 = vpop.f32.mrf.mxu0 }
 0x20d   : > { %446 = vst [vmem:[%s291_s12] sm:$0xff] %v442_v22  ;;  %v443_v25 = vmax.f32 %v436_v23, 0.0  ;;  %v438_v26 = vadd.f32 %v437_v24, %v392_v18 }
 0x20e   : > { %v439_v27 = vpop.f32.mrf.mxu0 }
 0x20f   : > { %447 = vst [vmem:[%s291_s12 + $0x8] sm:$0xff] %v443_v25  ;;  %v444_v28 = vmax.f32 %v438_v26, 0.0  ;;  %v440_v29 = vadd.f32 %v439_v27, %v396_v14 }
 0x211   : > { %448 = vst [vmem:[%s291_s12 + $0x10] sm:$0xff] %v444_v28  ;;  %v445_v30 = vmax.f32 %v440_v29, 0.0 }
 0x213   : > { %449 = vst [vmem:[%s291_s12 + $0x18] sm:$0xff] %v445_v30 }
 0x214 PF: > { %s15_s20 = sadd.s32 1, %s629_s20   ;;  %s820_s18 = smov %s625_s19 }
 0x215   : > { %p12_p5 = scmp.ge.s32.totalorder %s15_s20, 4   ;;  %s821_s19 = smov %s823_s21 }
 0x217   :  { %14 = sbr.rel (!%p12_p5) target bundleno = 2 (0x2), region = 76 }

// kernel: fwd.33
= control target key start
LH: loop header
LB: loop body
LE: loop exit
PB: predicated region body
PF: predicated region fallthrough
CT: control target
= control target key end

     0   :  { %s627_s15 = smov 0   ;;  %s629_s16 = smov 0   ;;  %s772_s0 = inlined_call_operand.vmem [shape: f32[32,256], index: 0, kind: input, shape index: {}]   ;;  %s773_s1 = inlined_call_operand.vmem [shape: f32[256,128], index: 1, kind: input, shape index: {}]   ;;  %s774_s2 = inlined_call_operand.vmem [shape: f32[1,128], index: 2, kind: input, shape index: {}]   ;;  %s775_s3 = inlined_call_operand.vmem [shape: f32[32,128], index: 3, kind: input, shape index: {}]   ;;  %s776_s4 = inlined_call_operand.vmem [shape: f32[32,128], index: 4, kind: output, shape index: {}]  }
   0x1   :  { %s631_s17 = smov 0  }
   0x2 LB: > { %s26_s18 = sadd.s32 1, %s596_s16  ;;  %p520_p0 = scmp.ge.s32.totalorder %s600_s17, 1  ;;  %s600_s17 = sphi %s631_s17, %s14_s17   ;;  %s596_s16 = sphi %s629_s16, %s778_s16   ;;  %s592_s15 = sphi %s627_s15, %s777_s15  }
   0x3   : > { %p28_p1 = scmp.ge.s32.totalorder %s26_s18, 2  ;;  %p211_p2 = scmp.lt.s32.totalorder %s600_s17, 3 }
   0x5   : > { %s780_s18 = smov (%p28_p1, %s26_s18), 0  ;;  %p212_p3 = pnand %p520_p0, %p211_p2 }
   0x6   : > { %s521_s25 = sshll.u32 (!%p212_p3), %s592_s15, 1 }
   0x7   : > { %215 = sbr.rel (%p212_p3) target bundleno = 253 (0xfd), region = 36  ;;  %p257_p4 = scmp.lt.s32.totalorder (!%p212_p3), %s521_s25, 3 }
   0xc   : > { %v325_v0 = vld [vmem:[%s773_s1 + $0xf0] sm:$0xff]  ;;  %v326_v1 = vld [vmem:[%s773_s1 + $0xf8] sm:$0xff]  ;;  %v323_v5 = vld [vmem:[%s773_s1 + $0xe0] sm:$0xff]  ;;  %s782_s25 = smov (!%p257_p4, %s521_s25), 3 }
   0xd   : > { %v309_v2 = vld [vmem:[%s773_s1 + $0x70] sm:$0xff]  ;;  %v342_v3 = vpack.c.bf16 %v326_v1, %v325_v0  ;;  %v310_v4 = vld [vmem:[%s773_s1 + $0x78] sm:$0xff]  ;;  %v324_v6 = vld [vmem:[%s773_s1 + $0xe8] sm:$0xff]  ;;  %s531_s21 = sshll.u32 %s782_s25, 4  ;;  %s525_s22 = sshll.u32 %s782_s25, 3 }
   0xe   : > { %v334_v7 = vpack.c.bf16 %v310_v4, %v309_v2  ;;  %v341_v8 = vpack.c.bf16 %v324_v6, %v323_v5  ;;  %v307_v9 = vld [vmem:[%s773_s1 + $0x60] sm:$0xff]  ;;  %v308_v10 = vld [vmem:[%s773_s1 + $0x68] sm:$0xff]  ;;  %v321_v11 = vld [vmem:[%s773_s1 + $0xd0] sm:$0xff]  ;;  %s693_s29 = scalar_lea.vmem %s772_s0, %s531_s21  ;;  %s277_s26 = scalar_lea.vmem %s775_s3, %s525_s22 }
   0xf   : > { %532 = vmatprep.subr.bf16.mxu0 %v342_v3  ;;  %v322_v12 = vld [vmem:[%s773_s1 + $0xd8] sm:$0xff]  ;;  %v333_v13 = vpack.c.bf16 %v308_v10, %v307_v9  ;;  %v305_v15 = vld [vmem:[%s773_s1 + $0x50] sm:$0xff]  ;;  %v319_v17 = vld [vmem:[%s773_s1 + $0xc0] sm:$0xff]  ;;  %s286_s5 = scalar_lea.vmem %s776_s4, %s525_s22 }
  0x10   : > { %533 = vmatpush3.bf16.msra.mxu0 %v334_v7  ;;  %v340_v14 = vpack.c.bf16 %v322_v12, %v321_v11  ;;  %v306_v16 = vld [vmem:[%s773_s1 + $0x58] sm:$0xff]  ;;  %v320_v18 = vld [vmem:[%s773_s1 + $0xc8] sm:$0xff]  ;;  %v303_v21 = vld [vmem:[%s773_s1 + $0x40] sm:$0xff] }
  0x11   : > { %534 = vmatprep.subr.bf16.mxu0 %v341_v8  ;;  %v332_v19 = vpack.c.bf16 %v306_v16, %v305_v15  ;;  %v339_v20 = vpack.c.bf16 %v320_v18, %v319_v17  ;;  %v304_v22 = vld [vmem:[%s773_s1 + $0x48] sm:$0xff]  ;;  %v317_v23 = vld [vmem:[%s773_s1 + $0xb0] sm:$0xff]  ;;  %v318_v24 = vld [vmem:[%s773_s1 + $0xb8] sm:$0xff] }
  0x12   : > { %v290_v25 = vld [vmem:[%s693_s29 + $0x8] sm:$0xff]  ;;  %v292_v26 = vld [vmem:[%s693_s29 + $0x18] sm:$0xff]  ;;  %v331_v27 = vpack.c.bf16 %v304_v22, %v303_v21  ;;  %v338_v29 = vpack.c.bf16 %v318_v24, %v317_v23  ;;  %v301_v30 = vld [vmem:[%s773_s1 + $0x30] sm:$0xff] }
  0x13   : > { %v294_v28 = vpack.c.bf16 %v292_v26, %v290_v25  ;;  %v302_v31 = vld [vmem:[%s773_s1 + $0x38] sm:$0xff]  ;;  %v315_v32 = vld [vmem:[%s773_s1 + $0xa0] sm:$0xff]  ;;  %v316_v33 = vld [vmem:[%s773_s1 + $0xa8] sm:$0xff] }
  0x14   : > { %535 = vmatpush3.bf16.msra.mxu0 %v333_v13  ;;  %v330_v34 = vpack.c.bf16 %v302_v31, %v301_v30  ;;  %v337_v35 = vpack.c.bf16 %v316_v33, %v315_v32  ;;  %v299_v36 = vld [vmem:[%s773_s1 + $0x20] sm:$0xff]  ;;  %v300_v37 = vld [vmem:[%s773_s1 + $0x28] sm:$0xff]  ;;  %v313_v38 = vld [vmem:[%s773_s1 + $0x90] sm:$0xff] }
  0x15   : > { %536 = vmatprep.subr.bf16.mxu0 %v340_v14  ;;  %382 = vmatprep.mubr.bf16.mxu0 %v294_v28  ;;  %v314_v39 = vld [vmem:[%s773_s1 + $0x98] sm:$0xff]  ;;  %v329_v40 = vpack.c.bf16 %v300_v37, %v299_v36  ;;  %v297_v42 = vld [vmem:[%s773_s1 + $0x10] sm:$0xff]  ;;  %v311_v44 = vld [vmem:[%s773_s1 + $0x80] sm:$0xff] }
  0x16   : > { %v336_v41 = vpack.c.bf16 %v314_v39, %v313_v38  ;;  %v298_v43 = vld [vmem:[%s773_s1 + $0x18] sm:$0xff]  ;;  %v312_v45 = vld [vmem:[%s773_s1 + $0x88] sm:$0xff]  ;;  %v295_v48 = vld [vmem:[%s773_s1] sm:$0xff] }
  0x17   : > { %v328_v46 = vpack.c.bf16 %v298_v43, %v297_v42  ;;  %v335_v47 = vpack.c.bf16 %v312_v45, %v311_v44  ;;  %v296_v49 = vld [vmem:[%s773_s1 + $0x8] sm:$0xff]  ;;  %v289_v51 = vld [vmem:[%s693_s29] sm:$0xff]  ;;  %v291_v52 = vld [vmem:[%s693_s29 + $0x10] sm:$0xff] }
  0x18   : > { %537 = vmatpush3.bf16.msra.mxu0 %v332_v19  ;;  %v327_v50 = vpack.c.bf16 %v296_v49, %v295_v48  ;;  %v293_v53 = vpack.c.bf16 %v291_v52, %v289_v51  ;;  %v528_v55 = vld [vmem:[%s774_s2] ss:$0 sm:$0xff]  ;;  %v392_v0 = vld [vmem:[%s277_s26 + $0x8] sm:$0xff] }
  0x19   : > { %538 = vmatprep.subr.bf16.mxu0 %v339_v20  ;;  %v391_v58 = vld [vmem:[%s277_s26] sm:$0xff] }
  0x1c   : > { %539 = vmatpush3.bf16.msra.mxu0 %v331_v27 }
  0x1d   : > { %540 = vmatprep.subr.bf16.mxu0 %v338_v29 }
  0x20   : > { %541 = vmatpush3.bf16.msra.mxu0 %v330_v34 }
  0x21   : > { %542 = vmatprep.subr.bf16.mxu0 %v337_v35 }
  0x24   : > { %543 = vmatpush3.bf16.msra.mxu0 %v329_v40 }
  0x25   : > { %544 = vmatprep.subr.bf16.mxu0 %v336_v41 }
  0x28   : > { %545 = vmatpush3.bf16.msra.mxu0 %v328_v46 }
  0x29   : > { %546 = vmatprep.subr.bf16.mxu0 %v335_v47 }
  0x2c   : > { %547 = vmatpush3.bf16.msra.mxu0 %v327_v50 }
  0x2f   : > { %383 = vmatmul.mubr.bf16.vlgmr.msra.gmra.mxu0 %v293_v53 }
  0xef   : > { %v548_v54 = vpop.f32.mrf.mxu0 }
  0xf1   : > { %v549_v56 = vpop.f32.mrf.mxu0 }
  0xf2   : > { %v550_v57 = vadd.f32 %v549_v56, %v548_v54 }
  0xf3   : > { %v551_v59 = vpop.f32.mrf.mxu0 }
  0xf4   : > { %v385_v60 = vadd.f32 %v550_v57, %v528_v55 }
  0xf5   : > { %v552_v61 = vpop.f32.mrf.mxu0 }
  0xf6   : > { %v393_v62 = vadd.f32 %v391_v58, %v385_v60  ;;  %v553_v63 = vadd.f32 %v552_v61, %v551_v59 }
  0xf8   : > { %395 = vst [vmem:[%s286_s5] sm:$0xff] %v393_v62  ;;  %v388_v1 = vadd.f32 %v553_v63, %v528_v55 }
  0xfa   : > { %v394_v2 = vadd.f32 %v392_v0, %v388_v1 }
  0xfc   : > { %396 = vst [vmem:[%s286_s5 + $0x8] sm:$0xff] %v394_v2 }
  0xfd PF: > { %s14_s17 = sadd.s32 1, %s600_s17   ;;  %s777_s15 = smov %s596_s16 }
  0xfe   : > { %p11_p5 = scmp.ge.s32.totalorder %s14_s17, 4   ;;  %s778_s16 = smov %s780_s18 }
 0x100   :  { %13 = sbr.rel (!%p11_p5) target bundleno = 2 (0x2), region = 75 }

// kernel: fwd.34
= control target key start
LH: loop header
LB: loop body
LE: loop exit
PB: predicated region body
PF: predicated region fallthrough
CT: control target
= control target key end

     0   :  { %s762_s18 = smov 0   ;;  %s764_s19 = smov 0   ;;  %s971_s0 = inlined_call_operand.vmem [shape: f32[32,128], index: 0, kind: input, shape index: {}]   ;;  %s972_s1 = inlined_call_operand.vmem [shape: f32[1,128], index: 1, kind: input, shape index: {}]   ;;  %s973_s2 = inlined_call_operand.vmem [shape: f32[1,128], index: 2, kind: input, shape index: {}]   ;;  %s974_s3 = inlined_call_operand.vmem [shape: f32[128,384], index: 3, kind: input, shape index: {}]   ;;  %s975_s4 = inlined_call_operand.vmem [shape: f32[1,384], index: 4, kind: input, shape index: {}]   ;;  %s976_s5 = inlined_call_operand.vmem [shape: f32[32,384], index: 5, kind: output, shape index: {}]  }
   0x1   :  { %s766_s20 = smov 0  }
   0x2 LB: > { %s27_s21 = sadd.s32 1, %s723_s19  ;;  %p635_p0 = scmp.ge.s32.totalorder %s727_s20, 1  ;;  %s727_s20 = sphi %s766_s20, %s15_s20   ;;  %s723_s19 = sphi %s764_s19, %s978_s19   ;;  %s719_s18 = sphi %s762_s18, %s977_s18  }
   0x3   : > { %p29_p1 = scmp.ge.s32.totalorder %s27_s21, 2  ;;  %p223_p2 = scmp.lt.s32.totalorder %s727_s20, 3 }
   0x5   : > { %s980_s21 = smov (%p29_p1, %s27_s21), 0  ;;  %p224_p3 = pnand %p635_p0, %p223_p2 }
   0x6   : > { %s636_s22 = sshll.u32 (!%p224_p3), %s719_s18, 1 }
   0x7   : > { %227 = sbr.rel (%p224_p3) target bundleno = 530 (0x212), region = 40  ;;  %p266_p4 = scmp.lt.s32.totalorder (!%p224_p3), %s636_s22, 3 }
   0xc   : > { %s982_s22 = smov (!%p266_p4, %s636_s22), 3  ;;  %v382_v2 = vld [vmem:[%s974_s3 + $0x158] sm:$0xff]  ;;  %v385_v3 = vld [vmem:[%s974_s3 + $0x170] sm:$0xff]  ;;  %v729_v6 = vmov 0.0   ;;  %v384_v7 = vld [vmem:[%s974_s3 + $0x168] sm:$0xff]  ;;  %v730_v48 = vmov 0  }
   0xd   : > { %s637_s23 = sshll.u32 %s982_s22, 3  ;;  %v381_v4 = vld [vmem:[%s974_s3 + $0x150] sm:$0xff]  ;;  %v409_v5 = vpack.c.bf16 %v385_v3, %v382_v2  ;;  %653 = vmatprep.subr.bf16.mxu1 %v729_v6  ;;  %v383_v8 = vld [vmem:[%s974_s3 + $0x160] sm:$0xff]  ;;  %v386_v9 = vld [vmem:[%s974_s3 + $0x178] sm:$0xff]  ;;  %460 = vmatprep.mubr.bf16.mxu0 %v730_v48  ;;  %vm731_vm0 = vmmov 0   ;;  %s673_s24 = smul.u32 24, %s982_s22 }
   0xe   : > { %s269_s26 = scalar_lea.vmem %s971_s0, %s637_s23  ;;  %v408_v10 = vpack.c.bf16 %v384_v7, %v381_v4  ;;  %v410_v11 = vpack.c.bf16 %v386_v9, %v383_v8  ;;  %v376_v20 = vld [vmem:[%s974_s3 + $0x128] sm:$0xff]  ;;  %v379_v21 = vld [vmem:[%s974_s3 + $0x140] sm:$0xff]  ;;  %v378_v24 = vld [vmem:[%s974_s3 + $0x138] sm:$0xff]  ;;  %669 = vmatprep.mubr.msk.bf16.mxu1 %vm731_vm0, %v729_v6 }
   0xf   : > { %v295_v0 = vld [vmem:[%s269_s26] sm:$0xff]  ;;  %v296_v1 = vld [vmem:[%s269_s26 + $0x8] sm:$0xff]  ;;  %428 = vmatprep.subr.bf16.mxu0 %v409_v5  ;;  %v406_v22 = vpack.c.bf16 %v379_v21, %v376_v20  ;;  %v377_v25 = vld [vmem:[%s974_s3 + $0x130] sm:$0xff]  ;;  %s291_s27 = scalar_lea.vmem %s976_s5, %s673_s24 }
  0x10   : > { %297 = vadd.xlane.f32.xlu0 %v295_v0  ;;  %429 = vmatpush1.bf16.msra.mxu0 %v408_v10  ;;  %v375_v23 = vld [vmem:[%s974_s3 + $0x120] sm:$0xff]  ;;  %v380_v27 = vld [vmem:[%s974_s3 + $0x148] sm:$0xff]  ;;  %v370_v29 = vld [vmem:[%s974_s3 + $0xf8] sm:$0xff] }
  0x11   : > { %654 = vmatpush3.bf16.msra.mxu1 %v410_v11  ;;  %v405_v26 = vpack.c.bf16 %v378_v24, %v375_v23  ;;  %430 = vmatprep.subr.bf16.mxu0 %v406_v22  ;;  %v407_v28 = vpack.c.bf16 %v380_v27, %v377_v25  ;;  %v373_v30 = vld [vmem:[%s974_s3 + $0x110] sm:$0xff]  ;;  %v372_v33 = vld [vmem:[%s974_s3 + $0x108] sm:$0xff]  ;;  %v371_v34 = vld [vmem:[%s974_s3 + $0x100] sm:$0xff] }
  0x12   : > { %655 = vmatprep.subr.bf16.mxu1 %v729_v6  ;;  %v403_v31 = vpack.c.bf16 %v373_v30, %v370_v29  ;;  %v369_v32 = vld [vmem:[%s974_s3 + $0xf0] sm:$0xff]  ;;  %v374_v36 = vld [vmem:[%s974_s3 + $0x118] sm:$0xff]  ;;  %v364_v38 = vld [vmem:[%s974_s3 + $0xc8] sm:$0xff] }
  0x13   : > { %v402_v35 = vpack.c.bf16 %v372_v33, %v369_v32  ;;  %v404_v37 = vpack.c.bf16 %v374_v36, %v371_v34  ;;  %v367_v39 = vld [vmem:[%s974_s3 + $0xe0] sm:$0xff]  ;;  %v366_v42 = vld [vmem:[%s974_s3 + $0xd8] sm:$0xff]  ;;  %v365_v43 = vld [vmem:[%s974_s3 + $0xd0] sm:$0xff] }
  0x14   : > { %299 = vadd.xlane.f32.xlu0 %v296_v1  ;;  %431 = vmatpush1.bf16.msra.mxu0 %v405_v26  ;;  %v400_v40 = vpack.c.bf16 %v367_v39, %v364_v38  ;;  %v363_v41 = vld [vmem:[%s974_s3 + $0xc0] sm:$0xff]  ;;  %v368_v45 = vld [vmem:[%s974_s3 + $0xe8] sm:$0xff]  ;;  %v358_v46 = vld [vmem:[%s974_s3 + $0x98] sm:$0xff] }
  0x15   : > { %656 = vmatpush3.bf16.msra.mxu1 %v407_v28  ;;  %432 = vmatprep.subr.bf16.mxu0 %v403_v31  ;;  %v399_v44 = vpack.c.bf16 %v366_v42, %v363_v41  ;;  %v361_v47 = vld [vmem:[%s974_s3 + $0xb0] sm:$0xff]  ;;  %v401_v49 = vpack.c.bf16 %v368_v45, %v365_v43  ;;  %v360_v52 = vld [vmem:[%s974_s3 + $0xa8] sm:$0xff]  ;;  %v359_v53 = vld [vmem:[%s974_s3 + $0xa0] sm:$0xff] }
  0x16   : > { %657 = vmatprep.subr.bf16.mxu1 %v729_v6  ;;  %v397_v50 = vpack.c.bf16 %v361_v47, %v358_v46  ;;  %v357_v51 = vld [vmem:[%s974_s3 + $0x90] sm:$0xff]  ;;  %v362_v55 = vld [vmem:[%s974_s3 + $0xb8] sm:$0xff]  ;;  %v352_v56 = vld [vmem:[%s974_s3 + $0x68] sm:$0xff] }
  0x17   : > { %v396_v54 = vpack.c.bf16 %v360_v52, %v357_v51  ;;  %v355_v57 = vld [vmem:[%s974_s3 + $0x80] sm:$0xff]  ;;  %v398_v58 = vpack.c.bf16 %v362_v55, %v359_v53  ;;  %v354_v61 = vld [vmem:[%s974_s3 + $0x78] sm:$0xff]  ;;  %v353_v62 = vld [vmem:[%s974_s3 + $0x70] sm:$0xff] }
  0x18   : > { %433 = vmatpush1.bf16.msra.mxu0 %v402_v35  ;;  %v394_v59 = vpack.c.bf16 %v355_v57, %v352_v56  ;;  %v351_v60 = vld [vmem:[%s974_s3 + $0x60] sm:$0xff]  ;;  %v356_v63 = vld [vmem:[%s974_s3 + $0x88] sm:$0xff]  ;;  %v345_v5 = vld [vmem:[%s974_s3 + $0x30] sm:$0xff] }
  0x19   : > { %658 = vmatpush3.bf16.msra.mxu1 %v404_v37  ;;  %434 = vmatprep.subr.bf16.mxu0 %v400_v40  ;;  %v393_v2 = vpack.c.bf16 %v354_v61, %v351_v60  ;;  %v395_v3 = vpack.c.bf16 %v356_v63, %v353_v62  ;;  %v348_v7 = vld [vmem:[%s974_s3 + $0x48] sm:$0xff]  ;;  %v347_v8 = vld [vmem:[%s974_s3 + $0x40] sm:$0xff]  ;;  %v350_v9 = vld [vmem:[%s974_s3 + $0x58] sm:$0xff] }
  0x1a   : > { %659 = vmatprep.subr.bf16.mxu1 %v729_v6  ;;  %v340_v10 = vld [vmem:[%s974_s3 + $0x8] sm:$0xff]  ;;  %v343_v11 = vld [vmem:[%s974_s3 + $0x20] sm:$0xff] }
  0x1b   : > { %v344_v20 = vld [vmem:[%s974_s3 + $0x28] sm:$0xff]  ;;  %v640_v31 = vld [vmem:[%s972_s1] ss:$0 sm:$0xff] }
  0x1c   : > { %435 = vmatpush1.bf16.msra.mxu0 %v399_v44  ;;  %v641_v34 = vld [vmem:[%s973_s2] ss:$0 sm:$0xff] }
  0x1d   : > { %660 = vmatpush3.bf16.msra.mxu1 %v401_v49  ;;  %436 = vmatprep.subr.bf16.mxu0 %v397_v50  ;;  %v411_v42 = vld [vmem:[%s975_s4] sm:$0x7] }
  0x1e   : > { %661 = vmatprep.subr.bf16.mxu1 %v729_v6 }
  0x20   : > { %437 = vmatpush1.bf16.msra.mxu0 %v396_v54 }
  0x21   : > { %662 = vmatpush3.bf16.msra.mxu1 %v398_v58  ;;  %438 = vmatprep.subr.bf16.mxu0 %v394_v59 }
  0x22   : > { %663 = vmatprep.subr.bf16.mxu1 %v729_v6 }
  0x24   : > { %439 = vmatpush1.bf16.msra.mxu0 %v393_v2 }
  0x25   : > { %664 = vmatpush3.bf16.msra.mxu1 %v395_v3 }
  0x26   : > { %665 = vmatprep.subr.bf16.mxu1 %v729_v6 }
  0x99   : > { %v298_v12 = vpop.xlane.xlu0 %297 }
  0x9a   : > { %v302_v13 = vmul.f32 0.0078125, %v298_v12  ;;  %v390_v12 = vpack.c.bf16 %v348_v7, %v345_v5 }
  0x9c   : > { %v806_v14 = vsub.f32 %v295_v0, %v302_v13  ;;  %v346_v0 = vld [vmem:[%s974_s3 + $0x38] sm:$0xff]  ;;  %v392_v13 = vpack.c.bf16 %v350_v9, %v347_v8 }
  0x9d   : > { %v300_v15 = vpop.xlane.xlu0 %299 }
  0x9e   : > { %v303_v16 = vmul.f32 0.0078125, %v300_v15  ;;  %v306_v17 = vmul.f32 %v806_v14, %v806_v14  ;;  %v388_v15 = vpack.c.bf16 %v343_v11, %v340_v10  ;;  %666 = vmatpush3.bf16.msra.mxu1 %v392_v13 }
  0x9f   : > { %667 = vmatprep.subr.bf16.mxu1 %v729_v6 }
  0xa0   : > { %v810_v18 = vsub.f32 %v296_v1, %v303_v16  ;;  %308 = vadd.xlane.f32.xlu1 %v306_v17  ;;  %v349_v1 = vld [vmem:[%s974_s3 + $0x50] sm:$0xff]  ;;  %v339_v16 = vld [vmem:[%s974_s3] sm:$0xff]  ;;  %v342_v17 = vld [vmem:[%s974_s3 + $0x18] sm:$0xff] }
  0xa1   : > { %v391_v4 = vpack.c.bf16 %v349_v1, %v346_v0  ;;  %v387_v21 = vpack.c.bf16 %v342_v17, %v339_v16 }
  0xa2   : > { %v307_v19 = vmul.f32 %v810_v18, %v810_v18 }
  0xa3   : > { %440 = vmatprep.subr.bf16.mxu0 %v391_v4 }
  0xa4   : > { %310 = vadd.xlane.f32.xlu1 %v307_v19  ;;  %v341_v19 = vld [vmem:[%s974_s3 + $0x10] sm:$0xff]  ;;  %441 = vmatpush1.bf16.msra.mxu0 %v390_v12 }
  0xa5   : > { %442 = vmatprep.subr.bf16.mxu0 %v388_v15  ;;  %v389_v22 = vpack.c.bf16 %v344_v20, %v341_v19 }
  0xa7   : > { %668 = vmatpush3.bf16.msra.mxu1 %v389_v22 }
  0xa8   : > { %443 = vmatpush1.bf16.msra.mxu0 %v387_v21 }
 0x129   : > { %v309_v23 = vpop.xlane.xlu1 %308 }
 0x12a   : > { %v312_v24 = vmul.f32 0.0078125, %v309_v23 }
 0x12c   : > { %v314_v25 = vadd.f32 1e-05, %v312_v24 }
 0x12d   : > { %v311_v26 = vpop.xlane.xlu1 %310 }
 0x12e   : > { %701 = vrsqrt.f32 %v314_v25  ;;  %v313_v27 = vmul.f32 0.0078125, %v311_v26 }
 0x130   : > { %v315_v28 = vadd.f32 1e-05, %v313_v27 }
 0x132   : > { %703 = vrsqrt.f32 %v315_v28 }
 0x13b   : > { %v702_v29 = vpop.eup %701 }
 0x13c   : > { %v318_v30 = vmul.f32 %v702_v29, %v806_v14  ;;  %v413_v14 = vlaneseq }
 0x13e   : > { %v327_v33 = vmul.f32 %v640_v31, %v318_v30  ;;  %v414_v39 = vshrl.u32 %v413_v14, 7 }
 0x13f   : > { %v704_v32 = vpop.eup %703 }
 0x140   : > { %v319_v6 = vmul.f32 %v704_v32, %v810_v18  ;;  %v336_v36 = vadd.f32 %v641_v34, %v327_v33  ;;  %v415_v40 = vsub.s32 0, %v414_v39  ;;  %v423_v41 = vsub.s32 2, %v414_v39 }
 0x141   : > { %v419_v18 = vsub.s32 1, %v414_v39 }
 0x142   : > { %v328_v35 = vmul.f32 %v640_v31, %v319_v6  ;;  %v416_v43 = vrot.slane %v411_v42, %v415_v40  ;;  %v424_v44 = vrot.slane %v411_v42, %v423_v41 }
 0x143   : > { %v420_v45 = vrot.slane %v411_v42, %v419_v18 }
 0x144   : > { %v337_v37 = vadd.f32 %v641_v34, %v328_v35 }
 0x146   : > { %v338_v38 = vpack.c.bf16 %v337_v37, %v336_v36 }
 0x148   : > { %461 = vmatmul.mubr.bf16.vlgmr.msra.gmra.mxu0 %v338_v38  ;;  %670 = vmatmul.mubr.bf16.vlgmr.msra.gmra.mxu1 %v338_v38 }
 0x208   : > { %v462_v46 = vpop.f32.mrf.mxu0  ;;  %v505_v47 = vpop.f32.mrf.mxu1 }
 0x209   : > { %v463_v48 = vadd.f32 %v462_v46, %v416_v43  ;;  %v506_v49 = vadd.f32 %v505_v47, %v424_v44 }
 0x20a   : > { %v464_v50 = vpop.f32.mrf.mxu0  ;;  %v671_v51 = vpop.f32.mrf.mxu1 }
 0x20b   : > { %512 = vst [vmem:[%s291_s27] sm:$0xff] %v463_v48  ;;  %514 = vst [vmem:[%s291_s27 + $0x10] sm:$0xff] %v506_v49  ;;  %v465_v52 = vadd.f32 %v464_v50, %v420_v45 }
 0x20c   : > { %v466_v53 = vpop.f32.mrf.mxu0  ;;  %v508_v54 = vpop.f32.mrf.mxu1 }
 0x20d   : > { %513 = vst [vmem:[%s291_s27 + $0x8] sm:$0xff] %v465_v52  ;;  %v467_v55 = vadd.f32 %v466_v53, %v416_v43  ;;  %v509_v56 = vadd.f32 %v508_v54, %v424_v44 }
 0x20e   : > { %v468_v57 = vpop.f32.mrf.mxu0  ;;  %v672_v58 = vpop.f32.mrf.mxu1 }
 0x20f   : > { %515 = vst [vmem:[%s291_s27 + $0x18] sm:$0xff] %v467_v55  ;;  %517 = vst [vmem:[%s291_s27 + $0x28] sm:$0xff] %v509_v56  ;;  %v469_v59 = vadd.f32 %v468_v57, %v420_v45 }
 0x211   : > { %516 = vst [vmem:[%s291_s27 + $0x20] sm:$0xff] %v469_v59 }
 0x212 PF: > { %s15_s20 = sadd.s32 1, %s727_s20   ;;  %s977_s18 = smov %s723_s19 }
 0x213   : > { %p12_p5 = scmp.ge.s32.totalorder %s15_s20, 4   ;;  %s978_s19 = smov %s980_s21 }
 0x215   :  { %14 = sbr.rel (!%p12_p5) target bundleno = 2 (0x2), region = 76 }

// kernel: fwd.43
= control target key start
LH: loop header
LB: loop body
LE: loop exit
PB: predicated region body
PF: predicated region fallthrough
CT: control target
= control target key end

     0   :  { %s547_s12 = smov 0   ;;  %s549_s13 = smov 0   ;;  %s686_s0 = inlined_call_operand.vmem [shape: f32[32,128], index: 0, kind: input, shape index: {}]   ;;  %s687_s1 = inlined_call_operand.vmem [shape: f32[128,256], index: 1, kind: input, shape index: {}]   ;;  %s688_s2 = inlined_call_operand.vmem [shape: f32[1,256], index: 2, kind: input, shape index: {}]   ;;  %s689_s3 = inlined_call_operand.vmem [shape: f32[32,256], index: 3, kind: output, shape index: {}]  }
   0x1   :  { %s551_s14 = smov 0  }
   0x2 LB: > { %s25_s15 = sadd.s32 1, %s520_s13  ;;  %p468_p0 = scmp.ge.s32.totalorder %s524_s14, 1  ;;  %s524_s14 = sphi %s551_s14, %s13_s14   ;;  %s520_s13 = sphi %s549_s13, %s691_s13   ;;  %s516_s12 = sphi %s547_s12, %s690_s12  }
   0x3   : > { %p27_p1 = scmp.ge.s32.totalorder %s25_s15, 2  ;;  %p173_p2 = scmp.lt.s32.totalorder %s524_s14, 3 }
   0x5   : > { %s693_s15 = smov (%p27_p1, %s25_s15), 0  ;;  %p174_p3 = pnand %p468_p0, %p173_p2 }
   0x6   : > { %s469_s29 = sshll.u32 (!%p174_p3), %s516_s12, 1 }
   0x7   : > { %177 = sbr.rel (%p174_p3) target bundleno = 249 (0xf9), region = 32  ;;  %p212_p4 = scmp.lt.s32.totalorder (!%p174_p3), %s469_s29, 3 }
   0xc   : > { %v273_v0 = vld [vmem:[%s687_s1 + $0xe8] sm:$0xff]  ;;  %v275_v1 = vld [vmem:[%s687_s1 + $0xf8] sm:$0xff]  ;;  %v272_v2 = vld [vmem:[%s687_s1 + $0xe0] sm:$0xff]  ;;  %v526_v7 = vmov 0   ;;  %s695_s29 = smov (!%p212_p4, %s469_s29), 3  ;;  %v294_v52 = vlaneseq }
   0xd   : > { %v291_v3 = vpack.c.bf16 %v275_v1, %v273_v0  ;;  %v274_v4 = vld [vmem:[%s687_s1 + $0xf0] sm:$0xff]  ;;  %v269_v5 = vld [vmem:[%s687_s1 + $0xc8] sm:$0xff]  ;;  %v271_v6 = vld [vmem:[%s687_s1 + $0xd8] sm:$0xff]  ;;  %336 = vmatprep.mubr.bf16.mxu0 %v526_v7  ;;  %s470_s4 = sshll.u32 %s695_s29, 3  ;;  %s476_s17 = sshll.u32 %s695_s29, 4 }
   0xe   : > { %v290_v8 = vpack.c.bf16 %v274_v4, %v272_v2  ;;  %v289_v9 = vpack.c.bf16 %v271_v6, %v269_v5  ;;  %v268_v10 = vld [vmem:[%s687_s1 + $0xc0] sm:$0xff]  ;;  %v270_v11 = vld [vmem:[%s687_s1 + $0xd0] sm:$0xff]  ;;  %v265_v12 = vld [vmem:[%s687_s1 + $0xa8] sm:$0xff]  ;;  %s215_s12 = scalar_lea.vmem %s686_s0, %s470_s4  ;;  %v295_v53 = vshrl.u32 %v294_v52, 7  ;;  %s237_s20 = scalar_lea.vmem %s689_s3, %s476_s17 }
   0xf   : > { %304 = vmatprep.subr.bf16.mxu0 %v291_v3  ;;  %v267_v13 = vld [vmem:[%s687_s1 + $0xb8] sm:$0xff]  ;;  %v288_v14 = vpack.c.bf16 %v270_v11, %v268_v10  ;;  %v264_v16 = vld [vmem:[%s687_s1 + $0xa0] sm:$0xff]  ;;  %v266_v17 = vld [vmem:[%s687_s1 + $0xb0] sm:$0xff] }
  0x10   : > { %305 = vmatpush1.bf16.msra.mxu0 %v290_v8  ;;  %v287_v15 = vpack.c.bf16 %v267_v13, %v265_v12  ;;  %v261_v18 = vld [vmem:[%s687_s1 + $0x88] sm:$0xff]  ;;  %v263_v19 = vld [vmem:[%s687_s1 + $0x98] sm:$0xff]  ;;  %v286_v20 = vpack.c.bf16 %v266_v17, %v264_v16  ;;  %v260_v22 = vld [vmem:[%s687_s1 + $0x80] sm:$0xff]  ;;  %v296_v54 = vsub.s32 0, %v295_v53  ;;  %v300_v56 = vsub.s32 1, %v295_v53 }
  0x11   : > { %306 = vmatprep.subr.bf16.mxu0 %v289_v9  ;;  %v285_v21 = vpack.c.bf16 %v263_v19, %v261_v18  ;;  %v262_v23 = vld [vmem:[%s687_s1 + $0x90] sm:$0xff]  ;;  %v257_v24 = vld [vmem:[%s687_s1 + $0x68] sm:$0xff]  ;;  %v259_v25 = vld [vmem:[%s687_s1 + $0x78] sm:$0xff] }
  0x12   : > { %v284_v26 = vpack.c.bf16 %v262_v23, %v260_v22  ;;  %v283_v27 = vpack.c.bf16 %v259_v25, %v257_v24  ;;  %v256_v28 = vld [vmem:[%s687_s1 + $0x60] sm:$0xff]  ;;  %v258_v29 = vld [vmem:[%s687_s1 + $0x70] sm:$0xff]  ;;  %v253_v30 = vld [vmem:[%s687_s1 + $0x48] sm:$0xff] }
  0x13   : > { %v255_v31 = vld [vmem:[%s687_s1 + $0x58] sm:$0xff]  ;;  %v282_v32 = vpack.c.bf16 %v258_v29, %v256_v28  ;;  %v252_v34 = vld [vmem:[%s687_s1 + $0x40] sm:$0xff]  ;;  %v254_v35 = vld [vmem:[%s687_s1 + $0x50] sm:$0xff] }
  0x14   : > { %307 = vmatpush1.bf16.msra.mxu0 %v288_v14  ;;  %v281_v33 = vpack.c.bf16 %v255_v31, %v253_v30  ;;  %v249_v36 = vld [vmem:[%s687_s1 + $0x28] sm:$0xff]  ;;  %v251_v37 = vld [vmem:[%s687_s1 + $0x38] sm:$0xff]  ;;  %v280_v38 = vpack.c.bf16 %v254_v35, %v252_v34  ;;  %v248_v40 = vld [vmem:[%s687_s1 + $0x20] sm:$0xff] }
  0x15   : > { %308 = vmatprep.subr.bf16.mxu0 %v287_v15  ;;  %v279_v39 = vpack.c.bf16 %v251_v37, %v249_v36  ;;  %v250_v41 = vld [vmem:[%s687_s1 + $0x30] sm:$0xff]  ;;  %v245_v42 = vld [vmem:[%s687_s1 + $0x8] sm:$0xff]  ;;  %v247_v43 = vld [vmem:[%s687_s1 + $0x18] sm:$0xff] }
  0x16   : > { %v278_v44 = vpack.c.bf16 %v250_v41, %v248_v40  ;;  %v277_v45 = vpack.c.bf16 %v247_v43, %v245_v42  ;;  %v244_v46 = vld [vmem:[%s687_s1] sm:$0xff]  ;;  %v246_v47 = vld [vmem:[%s687_s1 + $0x10] sm:$0xff]  ;;  %v242_v50 = vld [vmem:[%s215_s12 + $0x8] sm:$0xff] }
  0x17   : > { %v276_v48 = vpack.c.bf16 %v246_v47, %v244_v46  ;;  %v241_v49 = vld [vmem:[%s215_s12] sm:$0xff] }
  0x18   : > { %309 = vmatpush1.bf16.msra.mxu0 %v286_v20  ;;  %v243_v51 = vpack.c.bf16 %v242_v50, %v241_v49  ;;  %v292_v55 = vld [vmem:[%s688_s2] sm:$0x3] }
  0x19   : > { %310 = vmatprep.subr.bf16.mxu0 %v285_v21  ;;  %v297_v57 = vrot.slane %v292_v55, %v296_v54  ;;  %v301_v58 = vrot.slane %v292_v55, %v300_v56 }
  0x1c   : > { %311 = vmatpush1.bf16.msra.mxu0 %v284_v26 }
  0x1d   : > { %312 = vmatprep.subr.bf16.mxu0 %v283_v27 }
  0x20   : > { %313 = vmatpush1.bf16.msra.mxu0 %v282_v32 }
  0x21   : > { %314 = vmatprep.subr.bf16.mxu0 %v281_v33 }
  0x24   : > { %315 = vmatpush1.bf16.msra.mxu0 %v280_v38 }
  0x25   : > { %316 = vmatprep.subr.bf16.mxu0 %v279_v39 }
  0x28   : > { %317 = vmatpush1.bf16.msra.mxu0 %v278_v44 }
  0x29   : > { %318 = vmatprep.subr.bf16.mxu0 %v277_v45 }
  0x2c   : > { %319 = vmatpush1.bf16.msra.mxu0 %v276_v48 }
  0x2f   : > { %337 = vmatmul.mubr.bf16.vlgmr.msra.gmra.mxu0 %v243_v51 }
  0xef   : > { %v338_v59 = vpop.f32.mrf.mxu0 }
  0xf0   : > { %v339_v60 = vadd.f32 %v338_v59, %v297_v57 }
  0xf1   : > { %v340_v61 = vpop.f32.mrf.mxu0 }
  0xf2   : > { %347 = vst [vmem:[%s237_s20] sm:$0xff] %v339_v60  ;;  %v341_v62 = vadd.f32 %v340_v61, %v301_v58 }
  0xf3   : > { %v342_v63 = vpop.f32.mrf.mxu0 }
  0xf4   : > { %348 = vst [vmem:[%s237_s20 + $0x8] sm:$0xff] %v341_v62  ;;  %v343_v0 = vadd.f32 %v342_v63, %v297_v57 }
  0xf5   : > { %v344_v1 = vpop.f32.mrf.mxu0 }
  0xf6   : > { %349 = vst [vmem:[%s237_s20 + $0x10] sm:$0xff] %v343_v0  ;;  %v345_v2 = vadd.f32 %v344_v1, %v301_v58 }
  0xf8   : > { %350 = vst [vmem:[%s237_s20 + $0x18] sm:$0xff] %v345_v2 }
  0xf9 PF: > { %s13_s14 = sadd.s32 1, %s524_s14   ;;  %s690_s12 = smov %s520_s13 }
  0xfa   : > { %p10_p5 = scmp.ge.s32.totalorder %s13_s14, 4   ;;  %s691_s13 = smov %s693_s15 }
  0xfc   :  { %12 = sbr.rel (!%p10_p5) target bundleno = 2 (0x2), region = 68 }

// kernel: fwd.42
= control target key start
LH: loop header
LB: loop body
LE: loop exit
PB: predicated region body
PF: predicated region fallthrough
CT: control target
= control target key end

     0   :  { %s631_s18 = smov 0   ;;  %s633_s19 = smov 0   ;;  %s728_s0 = inlined_call_operand.vmem [shape: f32[32,128], index: 0, kind: input, shape index: {}]   ;;  %s729_s1 = inlined_call_operand.vmem [shape: f32[1,128], index: 1, kind: input, shape index: {}]   ;;  %s730_s2 = inlined_call_operand.vmem [shape: f32[1,128], index: 2, kind: input, shape index: {}]   ;;  %s731_s3 = inlined_call_operand.vmem [shape: f32[128,128], index: 3, kind: input, shape index: {}]   ;;  %s732_s4 = inlined_call_operand.vmem [shape: f32[1,128], index: 4, kind: input, shape index: {}]   ;;  %s733_s5 = inlined_call_operand.vmem [shape: f32[32,128], index: 5, kind: output, shape index: {}]  }
   0x1   :  { %s635_s20 = smov 0  }
   0x2 LB: > { %s27_s21 = sadd.s32 1, %s593_s19  ;;  %p506_p0 = scmp.ge.s32.totalorder %s597_s20, 1  ;;  %s597_s20 = sphi %s635_s20, %s15_s20   ;;  %s593_s19 = sphi %s633_s19, %s735_s19   ;;  %s589_s18 = sphi %s631_s18, %s734_s18  }
   0x3   : > { %p29_p1 = scmp.ge.s32.totalorder %s27_s21, 2  ;;  %p219_p2 = scmp.lt.s32.totalorder %s597_s20, 3 }
   0x5   : > { %s737_s21 = smov (%p29_p1, %s27_s21), 0  ;;  %p220_p3 = pnand %p506_p0, %p219_p2 }
   0x6   : > { %s507_s22 = sshll.u32 (!%p220_p3), %s589_s18, 1 }
   0x7   : > { %223 = sbr.rel (%p220_p3) target bundleno = 528 (0x210), region = 40  ;;  %p258_p4 = scmp.lt.s32.totalorder (!%p220_p3), %s507_s22, 3 }
   0xc   : > { %s739_s22 = smov (!%p258_p4, %s507_s22), 3  ;;  %v338_v2 = vld [vmem:[%s731_s3 + $0x70] sm:$0xff]  ;;  %v339_v3 = vld [vmem:[%s731_s3 + $0x78] sm:$0xff]  ;;  %v599_v4 = vmov 0.0   ;;  %v336_v14 = vld [vmem:[%s731_s3 + $0x60] sm:$0xff]  ;;  %vm600_vm0 = vmmov 0  }
   0xd   : > { %s508_s23 = sshll.u32 %s739_s22, 3  ;;  %525 = vmatprep.subr.bf16.mxu0 %v599_v4  ;;  %v347_v5 = vpack.c.bf16 %v339_v3, %v338_v2  ;;  %v337_v15 = vld [vmem:[%s731_s3 + $0x68] sm:$0xff]  ;;  %v334_v17 = vld [vmem:[%s731_s3 + $0x50] sm:$0xff]  ;;  %v335_v18 = vld [vmem:[%s731_s3 + $0x58] sm:$0xff]  ;;  %541 = vmatprep.mubr.msk.bf16.mxu0 %vm600_vm0, %v599_v4 }
   0xe   : > { %s261_s26 = scalar_lea.vmem %s728_s0, %s508_s23  ;;  %v346_v16 = vpack.c.bf16 %v337_v15, %v336_v14  ;;  %v345_v19 = vpack.c.bf16 %v335_v18, %v334_v17  ;;  %v332_v20 = vld [vmem:[%s731_s3 + $0x40] sm:$0xff]  ;;  %v333_v21 = vld [vmem:[%s731_s3 + $0x48] sm:$0xff]  ;;  %v330_v22 = vld [vmem:[%s731_s3 + $0x30] sm:$0xff]  ;;  %s277_s27 = scalar_lea.vmem %s733_s5, %s508_s23 }
   0xf   : > { %v280_v0 = vld [vmem:[%s261_s26] sm:$0xff]  ;;  %v281_v1 = vld [vmem:[%s261_s26 + $0x8] sm:$0xff]  ;;  %526 = vmatpush3.bf16.msra.mxu0 %v347_v5  ;;  %v344_v23 = vpack.c.bf16 %v333_v21, %v332_v20  ;;  %v331_v24 = vld [vmem:[%s731_s3 + $0x38] sm:$0xff] }
  0x10   : > { %282 = vadd.xlane.f32.xlu0 %v280_v0  ;;  %527 = vmatprep.subr.bf16.mxu0 %v599_v4  ;;  %v343_v25 = vpack.c.bf16 %v331_v24, %v330_v22  ;;  %v328_v26 = vld [vmem:[%s731_s3 + $0x20] sm:$0xff]  ;;  %v329_v27 = vld [vmem:[%s731_s3 + $0x28] sm:$0xff]  ;;  %v326_v29 = vld [vmem:[%s731_s3 + $0x10] sm:$0xff] }
  0x11   : > { %v342_v28 = vpack.c.bf16 %v329_v27, %v328_v26  ;;  %v327_v30 = vld [vmem:[%s731_s3 + $0x18] sm:$0xff]  ;;  %v324_v32 = vld [vmem:[%s731_s3] sm:$0xff]  ;;  %v325_v33 = vld [vmem:[%s731_s3 + $0x8] sm:$0xff] }
  0x12   : > { %v341_v31 = vpack.c.bf16 %v327_v30, %v326_v29  ;;  %v340_v34 = vpack.c.bf16 %v325_v33, %v324_v32  ;;  %v511_v43 = vld [vmem:[%s729_s1] ss:$0 sm:$0xff] }
  0x13   : > { %528 = vmatpush3.bf16.msra.mxu0 %v346_v16  ;;  %v512_v47 = vld [vmem:[%s730_s2] ss:$0 sm:$0xff] }
  0x14   : > { %284 = vadd.xlane.f32.xlu0 %v281_v1  ;;  %529 = vmatprep.subr.bf16.mxu0 %v599_v4  ;;  %v513_v52 = vld [vmem:[%s732_s4] ss:$0 sm:$0xff] }
  0x17   : > { %530 = vmatpush3.bf16.msra.mxu0 %v345_v19 }
  0x18   : > { %531 = vmatprep.subr.bf16.mxu0 %v599_v4 }
  0x1b   : > { %532 = vmatpush3.bf16.msra.mxu0 %v344_v23 }
  0x1c   : > { %533 = vmatprep.subr.bf16.mxu0 %v599_v4 }
  0x1f   : > { %534 = vmatpush3.bf16.msra.mxu0 %v343_v25 }
  0x20   : > { %535 = vmatprep.subr.bf16.mxu0 %v599_v4 }
  0x23   : > { %536 = vmatpush3.bf16.msra.mxu0 %v342_v28 }
  0x24   : > { %537 = vmatprep.subr.bf16.mxu0 %v599_v4 }
  0x27   : > { %538 = vmatpush3.bf16.msra.mxu0 %v341_v31 }
  0x28   : > { %539 = vmatprep.subr.bf16.mxu0 %v599_v4 }
  0x2b   : > { %540 = vmatpush3.bf16.msra.mxu0 %v340_v34 }
  0x99   : > { %v283_v6 = vpop.xlane.xlu0 %282 }
  0x9a   : > { %v287_v7 = vmul.f32 0.0078125, %v283_v6 }
  0x9c   : > { %v289_v8 = vsub.f32 %v280_v0, %v287_v7 }
  0x9d   : > { %v285_v9 = vpop.xlane.xlu0 %284 }
  0x9e   : > { %v288_v10 = vmul.f32 0.0078125, %v285_v9  ;;  %v291_v11 = vmul.f32 %v289_v8, %v289_v8 }
  0xa0   : > { %v290_v12 = vsub.f32 %v281_v1, %v288_v10  ;;  %293 = vadd.xlane.f32.xlu1 %v291_v11 }
  0xa2   : > { %v292_v13 = vmul.f32 %v290_v12, %v290_v12 }
  0xa4   : > { %295 = vadd.xlane.f32.xlu1 %v292_v13 }
 0x129   : > { %v294_v35 = vpop.xlane.xlu1 %293 }
 0x12a   : > { %v297_v36 = vmul.f32 0.0078125, %v294_v35 }
 0x12c   : > { %v299_v37 = vadd.f32 1e-05, %v297_v36 }
 0x12d   : > { %v296_v38 = vpop.xlane.xlu1 %295 }
 0x12e   : > { %571 = vrsqrt.f32 %v299_v37  ;;  %v298_v39 = vmul.f32 0.0078125, %v296_v38 }
 0x130   : > { %v300_v40 = vadd.f32 1e-05, %v298_v39 }
 0x132   : > { %573 = vrsqrt.f32 %v300_v40 }
 0x13b   : > { %v572_v41 = vpop.eup %571 }
 0x13c   : > { %v303_v42 = vmul.f32 %v572_v41, %v289_v8 }
 0x13e   : > { %v312_v46 = vmul.f32 %v511_v43, %v303_v42 }
 0x13f   : > { %v574_v44 = vpop.eup %573 }
 0x140   : > { %v304_v45 = vmul.f32 %v574_v44, %v290_v12  ;;  %v321_v49 = vadd.f32 %v512_v47, %v312_v46 }
 0x142   : > { %v313_v48 = vmul.f32 %v511_v43, %v304_v45 }
 0x144   : > { %v322_v50 = vadd.f32 %v512_v47, %v313_v48 }
 0x146   : > { %v323_v51 = vpack.c.bf16 %v322_v50, %v321_v49 }
 0x148   : > { %542 = vmatmul.mubr.bf16.vlgmr.msra.gmra.mxu0 %v323_v51 }
 0x208   : > { %v389_v53 = vpop.f32.mrf.mxu0 }
 0x209   : > { %v390_v54 = vadd.f32 %v513_v52, %v389_v53 }
 0x20a   : > { %v543_v55 = vpop.f32.mrf.mxu0 }
 0x20b   : > { %396 = vst [vmem:[%s277_s27] sm:$0xff] %v390_v54 }
 0x20c   : > { %v392_v56 = vpop.f32.mrf.mxu0 }
 0x20d   : > { %v393_v57 = vadd.f32 %v513_v52, %v392_v56 }
 0x20e   : > { %v544_v58 = vpop.f32.mrf.mxu0 }
 0x20f   : > { %397 = vst [vmem:[%s277_s27 + $0x8] sm:$0xff] %v393_v57 }
 0x210 PF: > { %s15_s20 = sadd.s32 1, %s597_s20   ;;  %s734_s18 = smov %s593_s19 }
 0x211   : > { %p12_p5 = scmp.ge.s32.totalorder %s15_s20, 4   ;;  %s735_s19 = smov %s737_s21 }
 0x213   :  { %14 = sbr.rel (!%p12_p5) target bundleno = 2 (0x2), region = 76 }

// kernel: fwd.44
= control target key start
LH: loop header
LB: loop body
LE: loop exit
PB: predicated region body
PF: predicated region fallthrough
CT: control target
= control target key end

     0   :  { %s968_s9 = smov 0   ;;  %s1087_s0 = inlined_call_operand.vmem [shape: f32[32,128], index: 0, kind: input, shape index: {}]   ;;  %s1088_s1 = inlined_call_operand.vmem [shape: f32[32,256], index: 1, kind: input, shape index: {}]   ;;  %s1089_s2 = inlined_call_operand.vmem [shape: f32[32,128], index: 2, kind: output, shape index: {}]  }
   0x1 LB: > { %s808_s10 = sadd.s32 4294967295, %s946_s9   ;;  %p812_p0 = scmp.ge.s32.totalorder %s946_s9, 1  ;;  %s946_s9 = sphi %s968_s9, %s12_s9  }
   0x2   : > { %p125_p1 = scmp.lt.s32.totalorder %s946_s9, 3 }
   0x4   : > { %p126_p2 = pnand %p812_p0, %p125_p1 }
   0x5   : > { %s813_s11 = sshll.u32 (!%p126_p2), %s808_s10, 1  ;;  %s950_s20 = smov (!%p126_p2), 96  }
   0x6   : > { %129 = sbr.rel (%p126_p2) target bundleno = 1429 (0x595), region = 28  ;;  %p154_p3 = scmp.lt.s32.totalorder (!%p126_p2), %s813_s11, 3 }
   0x7   : > { %s951_s21 = smov (!%p126_p2), 32   ;;  %s952_s22 = smov (!%p126_p2), 64  }
   0xb   : > { %v948_v0 = vmov 0.0   ;;  %vm949_vm0 = vmmov 0   ;;  %s1091_s11 = smov (!%p154_p3, %s813_s11), 3  ;;  %vm184_vm1 = vcmask 261120   ;;  %vm232_vm2 = vcmask 130048  }
   0xc   : > { %847 = vmatprep.subr.bf16.mxu0 %v948_v0  ;;  %849 = vmatprep.mubr.msk.bf16.mxu0 %vm949_vm0, %v948_v0  ;;  %s830_s12 = sshll.u32 %s1091_s11, 4  ;;  %s814_s13 = sshll.u32 %s1091_s11, 3  ;;  %vm445_vm3 = vcmask 523520   ;;  %vm591_vm4 = vcmask 785920   ;;  %vm737_vm5 = vcmask 1048320  }
   0xd   : > { %853 = vmatprep.subr.bf16.mxu1 %v948_v0  ;;  %855 = vmatprep.mubr.msk.bf16.mxu1 %vm949_vm0, %v948_v0  ;;  %s989_s16 = scalar_lea.vmem %s1088_s1, %s830_s12  ;;  %s157_s19 = scalar_lea.vmem %s1087_s0, %s814_s13 }
   0xe   : > { %v175_v1 = vld [vmem:[%s989_s16] sm:$0xff]  ;;  %v176_v2 = vld [vmem:[%s989_s16 + $0x10] sm:$0xff]  ;;  %v174_v5 = vld [vmem:[%s157_s19 + $0x8] sm:$0xff]  ;;  %s1039_s25 = scalar_lea.vmem %s1089_s2, %s814_s13 }
   0xf   : > { %v173_v3 = vld [vmem:[%s157_s19] sm:$0xff]  ;;  %v177_v4 = vpack.c.bf16 %v176_v2, %v175_v1  ;;  %v182_v8 = vmul.f32 0.17677669, %v174_v5  ;;  %v178_v26 = vld [vmem:[%s989_s16 + $0x8] sm:$0xff]  ;;  %v179_v27 = vld [vmem:[%s989_s16 + $0x18] sm:$0xff] }
  0x10   : > { %v181_v7 = vmul.f32 0.17677669, %v173_v3  ;;  %v1011_v28 = vpack.c.bf16 %v179_v27, %v178_v26 }
  0x11   : > { %v189_v6 = vsel %vm184_vm1, %v177_v4, 0 }
  0x12   : > { %848 = vmatpush3.bf16.xpose.msra.mxu0 %v189_v6  ;;  %v183_v9 = vpack.c.bf16 %v182_v8, %v181_v7  ;;  %854 = vmatpush3.bf16.msra.mxu1 %v1011_v28 }
  0x13   : > { %865 = vmatprep.subr.bf16.mxu0 %v948_v0  ;;  %859 = vmatprep.subr.bf16.mxu1 %v948_v0 }
  0x19   : > { %850 = vmatmul.mubr.msk.bf16.vlgmr.msra.gmra.mxu0 %vm184_vm1, %v183_v9 }
  0x1a   : > { %867 = vmatprep.mubr.msk.bf16.mxu0 %vm949_vm0, %v948_v0 }
  0xd9   : > { %v225_v10 = vpop.f32.mrf.mxu0 }
  0xda   : > { %v233_v11 = vsel %vm232_vm2, %v225_v10, -inf }
  0xdb   : > { %234 = vmax.xlane.f32.xlu0 %v233_v11  ;;  %v851_v12 = vpop.f32.mrf.mxu0 }
  0xdd   : > { %v228_v13 = vpop.f32.mrf.mxu0 }
  0xde   : > { %v236_v14 = vsel %vm232_vm2, %v228_v13, -inf }
  0xdf   : > { %237 = vmax.xlane.f32.xlu0 %v236_v14  ;;  %v852_v15 = vpop.f32.mrf.mxu0 }
  0xf5   : > { %317 = vrot.lane.b32.xlu0 %v177_v4, %s950_s20 }
  0xf9   : > { %609 = vrot.lane.b32.xlu0 %v177_v4, %s951_s21 }
 0x164   : > { %v235_v16 = vpop.xlane.xlu0 %234 }
 0x165   : > { %v239_v17 = vsub.f32 %v225_v10, %v235_v16 }
 0x167   : > { %v241_v18 = vmul.f32 1.442695, %v239_v17 }
 0x168   : > { %v238_v19 = vpop.xlane.xlu0 %237 }
 0x169   : > { %908 = vpow2.f32 %v241_v18  ;;  %v240_v20 = vsub.f32 %v228_v13, %v238_v19 }
 0x16b   : > { %v243_v21 = vmul.f32 1.442695, %v240_v20 }
 0x16c   : > { %v318_v33 = vpop.permute.xlu0 %317 }
 0x16d   : > { %910 = vpow2.f32 %v243_v21  ;;  %v323_v37 = vsel %vm184_vm1, %v318_v33, 0 }
 0x170   : > { %v610_v41 = vpop.permute.xlu0 %609 }
 0x171   : > { %v615_v43 = vsel %vm184_vm1, %v610_v41, 0 }
 0x176   : > { %v909_v22 = vpop.eup %908 }
 0x177   : > { %v245_v23 = vsel %vm232_vm2, %v909_v22, 0.0 }
 0x178   : > { %246 = vadd.xlane.f32.xlu1 %v245_v23 }
 0x17a   : > { %v911_v24 = vpop.eup %910 }
 0x17b   : > { %v248_v25 = vsel %vm232_vm2, %v911_v24, 0.0 }
 0x17c   : > { %249 = vadd.xlane.f32.xlu1 %v248_v25 }
 0x18d   : > { %314 = vrot.lane.b32.xlu1 %v183_v9, %s950_s20 }
 0x191   : > { %463 = vrot.lane.b32.xlu1 %v177_v4, %s952_s22 }
 0x195   : > { %460 = vrot.lane.b32.xlu1 %v183_v9, %s952_s22 }
 0x199   : > { %606 = vrot.lane.b32.xlu1 %v183_v9, %s951_s21 }
 0x201   : > { %v247_v29 = vpop.xlane.xlu1 %246 }
 0x202   : > { %912 = vrcp.f32 %v247_v29 }
 0x205   : > { %v250_v30 = vpop.xlane.xlu1 %249 }
 0x206   : > { %914 = vrcp.f32 %v250_v30 }
 0x209   : > { %v315_v36 = vpop.permute.xlu1 %314 }
 0x20d   : > { %v464_v39 = vpop.permute.xlu1 %463 }
 0x20e   : > { %v469_v40 = vsel %vm184_vm1, %v464_v39, 0 }
 0x20f   : > { %v913_v31 = vpop.eup %912 }
 0x210   : > { %v253_v34 = vmul.f32 %v913_v31, %v909_v22 }
 0x211   : > { %v461_v42 = vpop.permute.xlu1 %460 }
 0x213   : > { %v915_v32 = vpop.eup %914 }
 0x214   : > { %v254_v35 = vmul.f32 %v915_v32, %v911_v24 }
 0x215   : > { %v607_v44 = vpop.permute.xlu1 %606 }
 0x216   : > { %v255_v38 = vpack.c.bf16 %v254_v35, %v253_v34 }
 0x218   : > { %856 = vmatmul.mubr.msk.bf16.vlgmr.msra.gmra.mxu1 %vm232_vm2, %v255_v38 }
 0x219   : > { %860 = vmatpush3.bf16.xpose.msra.mxu1 %v323_v37  ;;  %861 = vmatprep.mubr.msk.bf16.mxu1 %vm949_vm0, %v948_v0 }
 0x21a   : > { %871 = vmatprep.subr.bf16.mxu1 %v948_v0 }
 0x220   : > { %862 = vmatmul.mubr.msk.bf16.vlgmr.msra.gmra.mxu1 %vm184_vm1, %v315_v36 }
 0x221   : > { %872 = vmatpush3.bf16.xpose.msra.mxu1 %v469_v40  ;;  %873 = vmatprep.mubr.msk.bf16.mxu1 %vm949_vm0, %v948_v0 }
 0x222   : > { %883 = vmatprep.subr.bf16.mxu1 %v948_v0 }
 0x228   : > { %874 = vmatmul.mubr.msk.bf16.vlgmr.msra.gmra.mxu1 %vm184_vm1, %v461_v42 }
 0x229   : > { %884 = vmatpush3.bf16.xpose.msra.mxu1 %v615_v43  ;;  %885 = vmatprep.mubr.msk.bf16.mxu1 %vm949_vm0, %v948_v0 }
 0x230   : > { %886 = vmatmul.mubr.msk.bf16.vlgmr.msra.gmra.mxu1 %vm184_vm1, %v607_v44 }
 0x2d8   : > { %v293_v45 = vpop.f32.mrf.mxu1 }
 0x2d9   : > { %300 = vst.msk [vmem:[%s1039_s25] sm:$0xff] %vm184_vm1, %v293_v45 }
 0x2da   : > { %v857_v46 = vpop.f32.mrf.mxu1 }
 0x2dc   : > { %v296_v47 = vpop.f32.mrf.mxu1 }
 0x2dd   : > { %301 = vst.msk [vmem:[%s1039_s25 + $0x8] sm:$0xff] %vm184_vm1, %v296_v47 }
 0x2de   : > { %v858_v48 = vpop.f32.mrf.mxu1 }
 0x2e0   : > { %v359_v49 = vpop.f32.mrf.mxu1 }
 0x2e1   : > { %v366_v50 = vsel %vm232_vm2, %v359_v49, -inf }
 0x2e2   : > { %367 = vmax.xlane.f32.xlu0 %v366_v50  ;;  %v863_v51 = vpop.f32.mrf.mxu1 }
 0x2e4   : > { %v362_v52 = vpop.f32.mrf.mxu1 }
 0x2e5   : > { %v369_v53 = vsel %vm232_vm2, %v362_v52, -inf }
 0x2e6   : > { %370 = vmax.xlane.f32.xlu1 %v369_v53  ;;  %v864_v54 = vpop.f32.mrf.mxu1 }
 0x2e8   : > { %v505_v55 = vpop.f32.mrf.mxu1 }
 0x2e9   : > { %v512_v56 = vsel %vm232_vm2, %v505_v55, -inf }
 0x2ea   : > { %513 = vmax.xlane.f32.xlu0 %v512_v56  ;;  %v875_v57 = vpop.f32.mrf.mxu1 }
 0x2ec   : > { %v508_v58 = vpop.f32.mrf.mxu1 }
 0x2ed   : > { %v515_v59 = vsel %vm232_vm2, %v508_v58, -inf }
 0x2ee   : > { %516 = vmax.xlane.f32.xlu0 %v515_v59  ;;  %v876_v60 = vpop.f32.mrf.mxu1 }
 0x2f0   : > { %v651_v61 = vpop.f32.mrf.mxu1 }
 0x2f1   : > { %v658_v62 = vsel %vm232_vm2, %v651_v61, -inf }
 0x2f2   : > { %659 = vmax.xlane.f32.xlu0 %v658_v62  ;;  %v887_v63 = vpop.f32.mrf.mxu1 }
 0x2f4   : > { %v654_v1 = vpop.f32.mrf.mxu1 }
 0x2f5   : > { %v661_v2 = vsel %vm232_vm2, %v654_v1, -inf }
 0x2f6   : > { %662 = vmax.xlane.f32.xlu1 %v661_v2  ;;  %v888_v3 = vpop.f32.mrf.mxu1 }
 0x36b   : > { %v368_v4 = vpop.xlane.xlu0 %367 }
 0x36c   : > { %v372_v5 = vsub.f32 %v359_v49, %v368_v4 }
 0x36e   : > { %v374_v6 = vmul.f32 1.442695, %v372_v5 }
 0x36f   : > { %v371_v7 = vpop.xlane.xlu1 %370 }
 0x370   : > { %916 = vpow2.f32 %v374_v6  ;;  %v373_v8 = vsub.f32 %v362_v52, %v371_v7 }
 0x372   : > { %v376_v9 = vmul.f32 1.442695, %v373_v8 }
 0x373   : > { %v514_v10 = vpop.xlane.xlu0 %513 }
 0x374   : > { %918 = vpow2.f32 %v376_v9  ;;  %v518_v11 = vsub.f32 %v505_v55, %v514_v10 }
 0x376   : > { %v520_v12 = vmul.f32 1.442695, %v518_v11 }
 0x377   : > { %v517_v13 = vpop.xlane.xlu0 %516 }
 0x378   : > { %920 = vpow2.f32 %v520_v12  ;;  %v519_v14 = vsub.f32 %v508_v58, %v517_v13 }
 0x37a   : > { %v522_v15 = vmul.f32 1.442695, %v519_v14 }
 0x37b   : > { %v660_v16 = vpop.xlane.xlu0 %659 }
 0x37c   : > { %922 = vpow2.f32 %v522_v15  ;;  %v664_v17 = vsub.f32 %v651_v61, %v660_v16 }
 0x37d   : > { %v917_v18 = vpop.eup %916 }
 0x37e   : > { %v666_v19 = vmul.f32 1.442695, %v664_v17  ;;  %v378_v20 = vsel %vm232_vm2, %v917_v18, 0.0 }
 0x37f   : > { %379 = vadd.xlane.f32.xlu0 %v378_v20  ;;  %v663_v30 = vpop.xlane.xlu1 %662 }
 0x380   : > { %924 = vpow2.f32 %v666_v19  ;;  %v665_v31 = vsub.f32 %v654_v1, %v663_v30 }
 0x381   : > { %v919_v21 = vpop.eup %918 }
 0x382   : > { %v381_v22 = vsel %vm232_vm2, %v919_v21, 0.0  ;;  %v668_v32 = vmul.f32 1.442695, %v665_v31 }
 0x383   : > { %382 = vadd.xlane.f32.xlu1 %v381_v22 }
 0x384   : > { %926 = vpow2.f32 %v668_v32 }
 0x385   : > { %v921_v23 = vpop.eup %920 }
 0x386   : > { %v524_v24 = vsel %vm232_vm2, %v921_v23, 0.0 }
 0x387   : > { %525 = vadd.xlane.f32.xlu0 %v524_v24 }
 0x389   : > { %v923_v25 = vpop.eup %922 }
 0x38a   : > { %v527_v26 = vsel %vm232_vm2, %v923_v25, 0.0 }
 0x38b   : > { %528 = vadd.xlane.f32.xlu1 %v527_v26 }
 0x38d   : > { %v925_v27 = vpop.eup %924 }
 0x38e   : > { %v670_v29 = vsel %vm232_vm2, %v925_v27, 0.0 }
 0x38f   : > { %671 = vadd.xlane.f32.xlu0 %v670_v29 }
 0x391   : > { %v927_v33 = vpop.eup %926 }
 0x392   : > { %v673_v34 = vsel %vm232_vm2, %v927_v33, 0.0 }
 0x39c   : > { %536 = vrot.lane.b32.xlu1 %v1011_v28, %s952_s22 }
 0x3a5   : > { %390 = vrot.lane.b32.xlu0 %v1011_v28, %s950_s20 }
 0x3c0   : > { %674 = vadd.xlane.f32.xlu1 %v673_v34 }
 0x3d1   : > { %682 = vrot.lane.b32.xlu1 %v1011_v28, %s951_s21 }
 0x408   : > { %v380_v35 = vpop.xlane.xlu0 %379 }
 0x409   : > { %928 = vrcp.f32 %v380_v35 }
 0x40c   : > { %v383_v36 = vpop.xlane.xlu1 %382 }
 0x40d   : > { %930 = vrcp.f32 %v383_v36 }
 0x410   : > { %v526_v37 = vpop.xlane.xlu0 %525 }
 0x411   : > { %932 = vrcp.f32 %v526_v37 }
 0x414   : > { %v529_v38 = vpop.xlane.xlu1 %528 }
 0x415   : > { %934 = vrcp.f32 %v529_v38 }
 0x416   : > { %v929_v39 = vpop.eup %928 }
 0x417   : > { %v386_v42 = vmul.f32 %v929_v39, %v917_v18 }
 0x418   : > { %v672_v40 = vpop.xlane.xlu0 %671  ;;  %v537_v28 = vpop.permute.xlu1 %536 }
 0x419   : > { %936 = vrcp.f32 %v672_v40 }
 0x41a   : > { %v931_v41 = vpop.eup %930 }
 0x41b   : > { %v387_v43 = vmul.f32 %v931_v41, %v919_v21 }
 0x41c   : > { %v391_v44 = vpop.permute.xlu0 %390 }
 0x41d   : > { %866 = vmatpush3.bf16.msra.mxu0 %v391_v44  ;;  %v388_v45 = vpack.c.bf16 %v387_v43, %v386_v42 }
 0x41e   : > { %877 = vmatprep.subr.bf16.mxu0 %v948_v0  ;;  %v933_v46 = vpop.eup %932 }
 0x41f   : > { %v532_v48 = vmul.f32 %v933_v46, %v921_v23 }
 0x420   : > { %868 = vmatmul.mubr.msk.bf16.vlgmr.msra.gmra.mxu0 %vm232_vm2, %v388_v45 }
 0x421   : > { %878 = vmatpush3.bf16.msra.mxu0 %v537_v28  ;;  %879 = vmatprep.mubr.msk.bf16.mxu0 %vm949_vm0, %v948_v0 }
 0x422   : > { %v935_v47 = vpop.eup %934  ;;  %889 = vmatprep.subr.bf16.mxu0 %v948_v0 }
 0x423   : > { %v533_v49 = vmul.f32 %v935_v47, %v923_v25 }
 0x425   : > { %v534_v50 = vpack.c.bf16 %v533_v49, %v532_v48 }
 0x426   : > { %v937_v53 = vpop.eup %936 }
 0x427   : > { %v678_v55 = vmul.f32 %v937_v53, %v925_v27 }
 0x428   : > { %880 = vmatmul.mubr.msk.bf16.vlgmr.msra.gmra.mxu0 %vm232_vm2, %v534_v50 }
 0x429   : > { %891 = vmatprep.mubr.msk.bf16.mxu0 %vm949_vm0, %v948_v0 }
 0x449   : > { %v675_v51 = vpop.xlane.xlu1 %674 }
 0x44a   : > { %938 = vrcp.f32 %v675_v51 }
 0x44d   : > { %v683_v52 = vpop.permute.xlu1 %682 }
 0x44e   : > { %890 = vmatpush3.bf16.msra.mxu0 %v683_v52 }
 0x457   : > { %v939_v54 = vpop.eup %938 }
 0x458   : > { %v679_v56 = vmul.f32 %v939_v54, %v927_v33 }
 0x45a   : > { %v680_v57 = vpack.c.bf16 %v679_v56, %v678_v55 }
 0x45c   : > { %892 = vmatmul.mubr.msk.bf16.vlgmr.msra.gmra.mxu0 %vm232_vm2, %v680_v57 }
 0x4e0   : > { %v430_v58 = vpop.f32.mrf.mxu0 }
 0x4e1   : > { %439 = vrot.lane.b32.xlu1 %v430_v58, %s951_s21 }
 0x4e2   : > { %v869_v59 = vpop.f32.mrf.mxu0 }
 0x4e4   : > { %v433_v60 = vpop.f32.mrf.mxu0 }
 0x4e5   : > { %441 = vrot.lane.b32.xlu0 %v433_v60, %s951_s21 }
 0x4e6   : > { %v870_v0 = vpop.f32.mrf.mxu0 }
 0x4e8   : > { %v576_v61 = vpop.f32.mrf.mxu0 }
 0x4e9   : > { %585 = vrot.lane.b32.xlu1 %v576_v61, %s952_s22 }
 0x4ea   : > { %v881_v62 = vpop.f32.mrf.mxu0 }
 0x4ec   : > { %v579_v63 = vpop.f32.mrf.mxu0 }
 0x4ed   : > { %587 = vrot.lane.b32.xlu0 %v579_v63, %s952_s22 }
 0x4ee   : > { %v882_v1 = vpop.f32.mrf.mxu0 }
 0x51c   : > { %v722_v2 = vpop.f32.mrf.mxu0 }
 0x51d   : > { %731 = vrot.lane.b32.xlu1 %v722_v2, %s950_s20 }
 0x51e   : > { %v893_v3 = vpop.f32.mrf.mxu0 }
 0x520   : > { %v725_v4 = vpop.f32.mrf.mxu0 }
 0x521   : > { %733 = vrot.lane.b32.xlu0 %v725_v4, %s950_s20 }
 0x522   : > { %v894_v5 = vpop.f32.mrf.mxu0 }
 0x553   : > { %v440_v6 = vpop.permute.xlu1 %439 }
 0x554   : > { %446 = vst.msk [vmem:[%s1039_s25] sm:$0xff] %vm445_vm3, %v440_v6 }
 0x557   : > { %v442_v7 = vpop.permute.xlu0 %441 }
 0x558   : > { %447 = vst.msk [vmem:[%s1039_s25 + $0x8] sm:$0xff] %vm445_vm3, %v442_v7 }
 0x55b   : > { %v586_v8 = vpop.permute.xlu1 %585 }
 0x55c   : > { %592 = vst.msk [vmem:[%s1039_s25] sm:$0xff] %vm591_vm4, %v586_v8 }
 0x55f   : > { %v588_v9 = vpop.permute.xlu0 %587 }
 0x560   : > { %593 = vst.msk [vmem:[%s1039_s25 + $0x8] sm:$0xff] %vm591_vm4, %v588_v9 }
 0x58f   : > { %v732_v10 = vpop.permute.xlu1 %731 }
 0x590   : > { %738 = vst.msk [vmem:[%s1039_s25] sm:$0xff] %vm737_vm5, %v732_v10 }
 0x593   : > { %v734_v11 = vpop.permute.xlu0 %733 }
 0x594   : > { %739 = vst.msk [vmem:[%s1039_s25 + $0x8] sm:$0xff] %vm737_vm5, %v734_v11 }
 0x595 PF: > { %s12_s9 = sadd.s32 1, %s946_s9  }
 0x596   : > { %p9_p4 = scmp.ge.s32.totalorder %s12_s9, 4  }
 0x598   :  { %11 = sbr.rel (!%p9_p4) target bundleno = 1 (0x1), region = 61 }

// kernel: fwd.40
= control target key start
LH: loop header
LB: loop body
LE: loop exit
PB: predicated region body
PF: predicated region fallthrough
CT: control target
= control target key end

     0   :  { %s910_s6 = smov 0   ;;  %s1036_s0 = inlined_call_operand.vmem [shape: f32[32,384], index: 0, kind: input, shape index: {}]   ;;  %s1037_s1 = inlined_call_operand.vmem [shape: f32[32,128], index: 1, kind: output, shape index: {}]  }
   0x1 LB: > { %s756_s7 = sadd.s32 4294967295, %s892_s6   ;;  %p760_p0 = scmp.ge.s32.totalorder %s892_s6, 1  ;;  %s892_s6 = sphi %s910_s6, %s11_s6  }
   0x2   : > { %p89_p1 = scmp.lt.s32.totalorder %s892_s6, 3 }
   0x4   : > { %p90_p2 = pnand %p760_p0, %p89_p1 }
   0x5   : > { %s761_s8 = sshll.u32 (!%p90_p2), %s756_s7, 1  ;;  %s897_s13 = smov (!%p90_p2), 96  }
   0x6   : > { %93 = sbr.rel (%p90_p2) target bundleno = 1434 (0x59a), region = 24  ;;  %p111_p3 = scmp.lt.s32.totalorder (!%p90_p2), %s761_s8, 3 }
   0x7   : > { %s898_s14 = smov (!%p90_p2), 32   ;;  %s899_s15 = smov (!%p90_p2), 64  }
   0xb   : > { %v894_v0 = vmov 0.0   ;;  %vm895_vm0 = vmmov 0   ;;  %s1039_s8 = smov (!%p111_p3, %s761_s8), 3  ;;  %vm144_vm1 = vcmask 261120   ;;  %v124_v10 = vlaneseq }
   0xc   : > { %791 = vmatprep.subr.bf16.mxu0 %v894_v0  ;;  %793 = vmatprep.mubr.msk.bf16.mxu0 %vm895_vm0, %v894_v0  ;;  %s839_s9 = smul.u32 24, %s1039_s8  ;;  %v896_v14 = vmov -1e+09   ;;  %vm192_vm4 = vcmask 130048   ;;  %s764_s16 = sshll.u32 %s1039_s8, 3  ;;  %vm405_vm5 = vcmask 523520  }
   0xd   : > { %797 = vmatprep.subr.bf16.mxu1 %v894_v0  ;;  %799 = vmatprep.mubr.msk.bf16.mxu1 %vm895_vm0, %v894_v0  ;;  %v125_v11 = vshrl.u32 %v124_v10, 7  ;;  %v128_v12 = vand.u32 127, %v124_v10  ;;  %s982_s19 = scalar_lea.vmem %s1037_s1, %s764_s16  ;;  %vm551_vm6 = vcmask 785920   ;;  %vm697_vm7 = vcmask 1048320  }
   0xe   : > { %s930_s12 = scalar_lea.vmem %s1036_s0, %s839_s9 }
   0xf   : > { %v135_v1 = vld [vmem:[%s930_s12 + $0x8] sm:$0xff]  ;;  %v136_v2 = vld [vmem:[%s930_s12 + $0x20] sm:$0xff]  ;;  %v134_v5 = vld [vmem:[%s930_s12 + $0x18] sm:$0xff]  ;;  %vm129_vm2 = vcmp.le.s32.totalorder %v128_v12, %v125_v11  ;;  %v126_v13 = vadd.s32 8, %v125_v11 }
  0x10   : > { %v133_v3 = vld [vmem:[%s930_s12] sm:$0xff]  ;;  %v137_v4 = vpack.c.bf16 %v136_v2, %v135_v1  ;;  %v142_v8 = vmul.f32 0.17677669, %v134_v5  ;;  %v941_v15 = vsel %vm129_vm2, 0.0, %v896_v14  ;;  %v138_v35 = vld [vmem:[%s930_s12 + $0x10] sm:$0xff]  ;;  %v139_v36 = vld [vmem:[%s930_s12 + $0x28] sm:$0xff] }
  0x11   : > { %v141_v7 = vmul.f32 0.17677669, %v133_v3  ;;  %vm130_vm3 = vcmp.le.s32.totalorder %v128_v12, %v126_v13  ;;  %v955_v37 = vpack.c.bf16 %v139_v36, %v138_v35 }
  0x12   : > { %v149_v6 = vsel %vm144_vm1, %v137_v4, 0  ;;  %v944_v19 = vsel %vm130_vm3, 0.0, %v896_v14 }
  0x13   : > { %792 = vmatpush3.bf16.xpose.msra.mxu0 %v149_v6  ;;  %v143_v9 = vpack.c.bf16 %v142_v8, %v141_v7  ;;  %798 = vmatpush3.bf16.msra.mxu1 %v955_v37 }
  0x14   : > { %809 = vmatprep.subr.bf16.mxu0 %v894_v0  ;;  %803 = vmatprep.subr.bf16.mxu1 %v894_v0 }
  0x1a   : > { %794 = vmatmul.mubr.msk.bf16.vlgmr.msra.gmra.mxu0 %vm144_vm1, %v143_v9 }
  0x1b   : > { %811 = vmatprep.mubr.msk.bf16.mxu0 %vm895_vm0, %v894_v0 }
  0xda   : > { %v185_v16 = vpop.f32.mrf.mxu0 }
  0xdb   : > { %v186_v17 = vadd.f32 %v185_v16, %v941_v15 }
  0xdc   : > { %v795_v18 = vpop.f32.mrf.mxu0 }
  0xdd   : > { %v193_v20 = vsel %vm192_vm4, %v186_v17, -inf }
  0xde   : > { %194 = vmax.xlane.f32.xlu0 %v193_v20  ;;  %v188_v21 = vpop.f32.mrf.mxu0 }
  0xdf   : > { %v189_v22 = vadd.f32 %v188_v21, %v944_v19 }
  0xe0   : > { %v796_v23 = vpop.f32.mrf.mxu0 }
  0xe1   : > { %v196_v24 = vsel %vm192_vm4, %v189_v22, -inf }
  0xe2   : > { %197 = vmax.xlane.f32.xlu0 %v196_v24 }
  0xf8   : > { %277 = vrot.lane.b32.xlu0 %v137_v4, %s897_s13 }
  0xfc   : > { %569 = vrot.lane.b32.xlu0 %v137_v4, %s898_s14 }
 0x167   : > { %v195_v25 = vpop.xlane.xlu0 %194 }
 0x168   : > { %v199_v26 = vsub.f32 %v186_v17, %v195_v25 }
 0x16a   : > { %v201_v27 = vmul.f32 1.442695, %v199_v26 }
 0x16b   : > { %v198_v28 = vpop.xlane.xlu0 %197 }
 0x16c   : > { %854 = vpow2.f32 %v201_v27  ;;  %v200_v29 = vsub.f32 %v189_v22, %v198_v28 }
 0x16e   : > { %v203_v30 = vmul.f32 1.442695, %v200_v29 }
 0x16f   : > { %v278_v42 = vpop.permute.xlu0 %277 }
 0x170   : > { %856 = vpow2.f32 %v203_v30  ;;  %v283_v46 = vsel %vm144_vm1, %v278_v42, 0 }
 0x173   : > { %v570_v50 = vpop.permute.xlu0 %569 }
 0x174   : > { %v575_v52 = vsel %vm144_vm1, %v570_v50, 0 }
 0x179   : > { %v855_v31 = vpop.eup %854 }
 0x17a   : > { %v205_v32 = vsel %vm192_vm4, %v855_v31, 0.0 }
 0x17b   : > { %206 = vadd.xlane.f32.xlu1 %v205_v32 }
 0x17d   : > { %v857_v33 = vpop.eup %856 }
 0x17e   : > { %v208_v34 = vsel %vm192_vm4, %v857_v33, 0.0 }
 0x17f   : > { %209 = vadd.xlane.f32.xlu1 %v208_v34 }
 0x190   : > { %274 = vrot.lane.b32.xlu1 %v143_v9, %s897_s13 }
 0x194   : > { %423 = vrot.lane.b32.xlu1 %v137_v4, %s899_s15 }
 0x198   : > { %420 = vrot.lane.b32.xlu1 %v143_v9, %s899_s15 }
 0x19c   : > { %566 = vrot.lane.b32.xlu1 %v143_v9, %s898_s14 }
 0x204   : > { %v207_v38 = vpop.xlane.xlu1 %206 }
 0x205   : > { %858 = vrcp.f32 %v207_v38 }
 0x208   : > { %v210_v39 = vpop.xlane.xlu1 %209 }
 0x209   : > { %860 = vrcp.f32 %v210_v39 }
 0x20c   : > { %v275_v45 = vpop.permute.xlu1 %274 }
 0x210   : > { %v424_v48 = vpop.permute.xlu1 %423 }
 0x211   : > { %v429_v49 = vsel %vm144_vm1, %v424_v48, 0 }
 0x212   : > { %v859_v40 = vpop.eup %858 }
 0x213   : > { %v213_v43 = vmul.f32 %v859_v40, %v855_v31 }
 0x214   : > { %v421_v51 = vpop.permute.xlu1 %420 }
 0x216   : > { %v861_v41 = vpop.eup %860 }
 0x217   : > { %v214_v44 = vmul.f32 %v861_v41, %v857_v33 }
 0x218   : > { %v567_v53 = vpop.permute.xlu1 %566 }
 0x219   : > { %v215_v47 = vpack.c.bf16 %v214_v44, %v213_v43 }
 0x21b   : > { %800 = vmatmul.mubr.msk.bf16.vlgmr.msra.gmra.mxu1 %vm192_vm4, %v215_v47 }
 0x21c   : > { %804 = vmatpush3.bf16.xpose.msra.mxu1 %v283_v46  ;;  %805 = vmatprep.mubr.msk.bf16.mxu1 %vm895_vm0, %v894_v0 }
 0x21d   : > { %815 = vmatprep.subr.bf16.mxu1 %v894_v0 }
 0x223   : > { %806 = vmatmul.mubr.msk.bf16.vlgmr.msra.gmra.mxu1 %vm144_vm1, %v275_v45 }
 0x224   : > { %816 = vmatpush3.bf16.xpose.msra.mxu1 %v429_v49  ;;  %817 = vmatprep.mubr.msk.bf16.mxu1 %vm895_vm0, %v894_v0 }
 0x225   : > { %827 = vmatprep.subr.bf16.mxu1 %v894_v0 }
 0x22b   : > { %818 = vmatmul.mubr.msk.bf16.vlgmr.msra.gmra.mxu1 %vm144_vm1, %v421_v51 }
 0x22c   : > { %828 = vmatpush3.bf16.xpose.msra.mxu1 %v575_v52  ;;  %829 = vmatprep.mubr.msk.bf16.mxu1 %vm895_vm0, %v894_v0 }
 0x233   : > { %830 = vmatmul.mubr.msk.bf16.vlgmr.msra.gmra.mxu1 %vm144_vm1, %v567_v53 }
 0x2db   : > { %v253_v54 = vpop.f32.mrf.mxu1 }
 0x2dc   : > { %260 = vst.msk [vmem:[%s982_s19] sm:$0xff] %vm144_vm1, %v253_v54 }
 0x2dd   : > { %v801_v55 = vpop.f32.mrf.mxu1 }
 0x2df   : > { %v256_v56 = vpop.f32.mrf.mxu1 }
 0x2e0   : > { %261 = vst.msk [vmem:[%s982_s19 + $0x8] sm:$0xff] %vm144_vm1, %v256_v56 }
 0x2e1   : > { %v802_v57 = vpop.f32.mrf.mxu1 }
 0x2e3   : > { %v319_v58 = vpop.f32.mrf.mxu1 }
 0x2e4   : > { %v320_v59 = vadd.f32 %v319_v58, %v941_v15 }
 0x2e5   : > { %v807_v60 = vpop.f32.mrf.mxu1 }
 0x2e6   : > { %v326_v61 = vsel %vm192_vm4, %v320_v59, -inf }
 0x2e7   : > { %327 = vmax.xlane.f32.xlu0 %v326_v61  ;;  %v322_v62 = vpop.f32.mrf.mxu1 }
 0x2e8   : > { %v323_v63 = vadd.f32 %v322_v62, %v944_v19 }
 0x2e9   : > { %v808_v1 = vpop.f32.mrf.mxu1 }
 0x2ea   : > { %v329_v2 = vsel %vm192_vm4, %v323_v63, -inf }
 0x2eb   : > { %330 = vmax.xlane.f32.xlu1 %v329_v2  ;;  %v465_v3 = vpop.f32.mrf.mxu1 }
 0x2ec   : > { %v466_v4 = vadd.f32 %v465_v3, %v941_v15 }
 0x2ed   : > { %v819_v5 = vpop.f32.mrf.mxu1 }
 0x2ee   : > { %v472_v6 = vsel %vm192_vm4, %v466_v4, -inf }
 0x2ef   : > { %473 = vmax.xlane.f32.xlu0 %v472_v6  ;;  %v468_v7 = vpop.f32.mrf.mxu1 }
 0x2f0   : > { %v469_v8 = vadd.f32 %v468_v7, %v944_v19 }
 0x2f1   : > { %v820_v9 = vpop.f32.mrf.mxu1 }
 0x2f2   : > { %v475_v10 = vsel %vm192_vm4, %v469_v8, -inf }
 0x2f3   : > { %476 = vmax.xlane.f32.xlu0 %v475_v10  ;;  %v611_v11 = vpop.f32.mrf.mxu1 }
 0x2f4   : > { %v612_v12 = vadd.f32 %v611_v11, %v941_v15 }
 0x2f5   : > { %v831_v13 = vpop.f32.mrf.mxu1 }
 0x2f6   : > { %v618_v14 = vsel %vm192_vm4, %v612_v12, -inf }
 0x2f7   : > { %619 = vmax.xlane.f32.xlu0 %v618_v14  ;;  %v614_v16 = vpop.f32.mrf.mxu1 }
 0x2f8   : > { %v615_v17 = vadd.f32 %v614_v16, %v944_v19 }
 0x2f9   : > { %v832_v18 = vpop.f32.mrf.mxu1 }
 0x2fa   : > { %v621_v20 = vsel %vm192_vm4, %v615_v17, -inf }
 0x2fb   : > { %622 = vmax.xlane.f32.xlu1 %v621_v20 }
 0x370   : > { %v328_v21 = vpop.xlane.xlu0 %327 }
 0x371   : > { %v332_v22 = vsub.f32 %v320_v59, %v328_v21 }
 0x373   : > { %v334_v23 = vmul.f32 1.442695, %v332_v22 }
 0x374   : > { %v331_v24 = vpop.xlane.xlu1 %330 }
 0x375   : > { %862 = vpow2.f32 %v334_v23  ;;  %v333_v25 = vsub.f32 %v323_v63, %v331_v24 }
 0x377   : > { %v336_v26 = vmul.f32 1.442695, %v333_v25 }
 0x378   : > { %v474_v27 = vpop.xlane.xlu0 %473 }
 0x379   : > { %864 = vpow2.f32 %v336_v26  ;;  %v478_v15 = vsub.f32 %v466_v4, %v474_v27 }
 0x37b   : > { %v480_v28 = vmul.f32 1.442695, %v478_v15 }
 0x37c   : > { %v477_v29 = vpop.xlane.xlu0 %476 }
 0x37d   : > { %866 = vpow2.f32 %v480_v28  ;;  %v479_v30 = vsub.f32 %v469_v8, %v477_v29 }
 0x37f   : > { %v482_v31 = vmul.f32 1.442695, %v479_v30 }
 0x380   : > { %v620_v19 = vpop.xlane.xlu0 %619 }
 0x381   : > { %868 = vpow2.f32 %v482_v31  ;;  %v624_v32 = vsub.f32 %v612_v12, %v620_v19 }
 0x382   : > { %v863_v33 = vpop.eup %862 }
 0x383   : > { %v626_v34 = vmul.f32 1.442695, %v624_v32  ;;  %v338_v35 = vsel %vm192_vm4, %v863_v33, 0.0 }
 0x384   : > { %339 = vadd.xlane.f32.xlu0 %v338_v35  ;;  %v623_v45 = vpop.xlane.xlu1 %622 }
 0x385   : > { %870 = vpow2.f32 %v626_v34  ;;  %v625_v46 = vsub.f32 %v615_v17, %v623_v45 }
 0x386   : > { %v865_v36 = vpop.eup %864 }
 0x387   : > { %v341_v38 = vsel %vm192_vm4, %v865_v36, 0.0  ;;  %v628_v47 = vmul.f32 1.442695, %v625_v46 }
 0x388   : > { %342 = vadd.xlane.f32.xlu1 %v341_v38 }
 0x389   : > { %872 = vpow2.f32 %v628_v47 }
 0x38a   : > { %v867_v39 = vpop.eup %866 }
 0x38b   : > { %v484_v40 = vsel %vm192_vm4, %v867_v39, 0.0 }
 0x38c   : > { %485 = vadd.xlane.f32.xlu0 %v484_v40 }
 0x38e   : > { %v869_v41 = vpop.eup %868 }
 0x38f   : > { %v487_v42 = vsel %vm192_vm4, %v869_v41, 0.0 }
 0x390   : > { %488 = vadd.xlane.f32.xlu1 %v487_v42 }
 0x392   : > { %v871_v43 = vpop.eup %870 }
 0x393   : > { %v630_v44 = vsel %vm192_vm4, %v871_v43, 0.0 }
 0x394   : > { %631 = vadd.xlane.f32.xlu0 %v630_v44 }
 0x396   : > { %v873_v48 = vpop.eup %872 }
 0x397   : > { %v633_v49 = vsel %vm192_vm4, %v873_v48, 0.0 }
 0x3a1   : > { %496 = vrot.lane.b32.xlu1 %v955_v37, %s899_s15 }
 0x3aa   : > { %350 = vrot.lane.b32.xlu0 %v955_v37, %s897_s13 }
 0x3c5   : > { %634 = vadd.xlane.f32.xlu1 %v633_v49 }
 0x3d6   : > { %642 = vrot.lane.b32.xlu1 %v955_v37, %s898_s14 }
 0x40d   : > { %v340_v50 = vpop.xlane.xlu0 %339 }
 0x40e   : > { %874 = vrcp.f32 %v340_v50 }
 0x411   : > { %v343_v51 = vpop.xlane.xlu1 %342 }
 0x412   : > { %876 = vrcp.f32 %v343_v51 }
 0x415   : > { %v486_v52 = vpop.xlane.xlu0 %485 }
 0x416   : > { %878 = vrcp.f32 %v486_v52 }
 0x419   : > { %v489_v53 = vpop.xlane.xlu1 %488 }
 0x41a   : > { %880 = vrcp.f32 %v489_v53 }
 0x41b   : > { %v875_v54 = vpop.eup %874 }
 0x41c   : > { %v346_v57 = vmul.f32 %v875_v54, %v863_v33 }
 0x41d   : > { %v632_v55 = vpop.xlane.xlu0 %631  ;;  %v497_v37 = vpop.permute.xlu1 %496 }
 0x41e   : > { %882 = vrcp.f32 %v632_v55 }
 0x41f   : > { %v877_v56 = vpop.eup %876 }
 0x420   : > { %v347_v58 = vmul.f32 %v877_v56, %v865_v36 }
 0x421   : > { %v351_v59 = vpop.permute.xlu0 %350 }
 0x422   : > { %810 = vmatpush3.bf16.msra.mxu0 %v351_v59  ;;  %v348_v60 = vpack.c.bf16 %v347_v58, %v346_v57 }
 0x423   : > { %821 = vmatprep.subr.bf16.mxu0 %v894_v0  ;;  %v879_v61 = vpop.eup %878 }
 0x424   : > { %v492_v63 = vmul.f32 %v879_v61, %v867_v39 }
 0x425   : > { %812 = vmatmul.mubr.msk.bf16.vlgmr.msra.gmra.mxu0 %vm192_vm4, %v348_v60 }
 0x426   : > { %822 = vmatpush3.bf16.msra.mxu0 %v497_v37  ;;  %823 = vmatprep.mubr.msk.bf16.mxu0 %vm895_vm0, %v894_v0 }
 0x427   : > { %v881_v62 = vpop.eup %880  ;;  %833 = vmatprep.subr.bf16.mxu0 %v894_v0 }
 0x428   : > { %v493_v1 = vmul.f32 %v881_v62, %v869_v41 }
 0x42a   : > { %v494_v2 = vpack.c.bf16 %v493_v1, %v492_v63 }
 0x42b   : > { %v883_v5 = vpop.eup %882 }
 0x42c   : > { %v638_v7 = vmul.f32 %v883_v5, %v871_v43 }
 0x42d   : > { %824 = vmatmul.mubr.msk.bf16.vlgmr.msra.gmra.mxu0 %vm192_vm4, %v494_v2 }
 0x42e   : > { %835 = vmatprep.mubr.msk.bf16.mxu0 %vm895_vm0, %v894_v0 }
 0x44e   : > { %v635_v3 = vpop.xlane.xlu1 %634 }
 0x44f   : > { %884 = vrcp.f32 %v635_v3 }
 0x452   : > { %v643_v4 = vpop.permute.xlu1 %642 }
 0x453   : > { %834 = vmatpush3.bf16.msra.mxu0 %v643_v4 }
 0x45c   : > { %v885_v6 = vpop.eup %884 }
 0x45d   : > { %v639_v8 = vmul.f32 %v885_v6, %v873_v48 }
 0x45f   : > { %v640_v9 = vpack.c.bf16 %v639_v8, %v638_v7 }
 0x461   : > { %836 = vmatmul.mubr.msk.bf16.vlgmr.msra.gmra.mxu0 %vm192_vm4, %v640_v9 }
 0x4e5   : > { %v390_v10 = vpop.f32.mrf.mxu0 }
 0x4e6   : > { %399 = vrot.lane.b32.xlu1 %v390_v10, %s898_s14 }
 0x4e7   : > { %v813_v11 = vpop.f32.mrf.mxu0 }
 0x4e9   : > { %v393_v12 = vpop.f32.mrf.mxu0 }
 0x4ea   : > { %401 = vrot.lane.b32.xlu0 %v393_v12, %s898_s14 }
 0x4eb   : > { %v814_v0 = vpop.f32.mrf.mxu0 }
 0x4ed   : > { %v536_v13 = vpop.f32.mrf.mxu0 }
 0x4ee   : > { %545 = vrot.lane.b32.xlu1 %v536_v13, %s899_s15 }
 0x4ef   : > { %v825_v14 = vpop.f32.mrf.mxu0 }
 0x4f1   : > { %v539_v16 = vpop.f32.mrf.mxu0 }
 0x4f2   : > { %547 = vrot.lane.b32.xlu0 %v539_v16, %s899_s15 }
 0x4f3   : > { %v826_v17 = vpop.f32.mrf.mxu0 }
 0x521   : > { %v682_v18 = vpop.f32.mrf.mxu0 }
 0x522   : > { %691 = vrot.lane.b32.xlu1 %v682_v18, %s897_s13 }
 0x523   : > { %v837_v20 = vpop.f32.mrf.mxu0 }
 0x525   : > { %v685_v21 = vpop.f32.mrf.mxu0 }
 0x526   : > { %693 = vrot.lane.b32.xlu0 %v685_v21, %s897_s13 }
 0x527   : > { %v838_v22 = vpop.f32.mrf.mxu0 }
 0x558   : > { %v400_v23 = vpop.permute.xlu1 %399 }
 0x559   : > { %406 = vst.msk [vmem:[%s982_s19] sm:$0xff] %vm405_vm5, %v400_v23 }
 0x55c   : > { %v402_v24 = vpop.permute.xlu0 %401 }
 0x55d   : > { %407 = vst.msk [vmem:[%s982_s19 + $0x8] sm:$0xff] %vm405_vm5, %v402_v24 }
 0x560   : > { %v546_v25 = vpop.permute.xlu1 %545 }
 0x561   : > { %552 = vst.msk [vmem:[%s982_s19] sm:$0xff] %vm551_vm6, %v546_v25 }
 0x564   : > { %v548_v26 = vpop.permute.xlu0 %547 }
 0x565   : > { %553 = vst.msk [vmem:[%s982_s19 + $0x8] sm:$0xff] %vm551_vm6, %v548_v26 }
 0x594   : > { %v692_v27 = vpop.permute.xlu1 %691 }
 0x595   : > { %698 = vst.msk [vmem:[%s982_s19] sm:$0xff] %vm697_vm7, %v692_v27 }
 0x598   : > { %v694_v15 = vpop.permute.xlu0 %693 }
 0x599   : > { %699 = vst.msk [vmem:[%s982_s19 + $0x8] sm:$0xff] %vm697_vm7, %v694_v15 }
 0x59a PF: > { %s11_s6 = sadd.s32 1, %s892_s6  }
 0x59b   : > { %p8_p4 = scmp.ge.s32.totalorder %s11_s6, 4  }
 0x59d   :  { %10 = sbr.rel (!%p8_p4) target bundleno = 1 (0x1), region = 54 }

// kernel: fwd.57
= control target key start
LH: loop header
LB: loop body
LE: loop exit
PB: predicated region body
PF: predicated region fallthrough
CT: control target
= control target key end

     0   :  { %10 = vsyncpa [#allocation3], 0  ;;  %s898_s0 = inlined_call_operand.vmem [shape: f32[32,128], index: 0, kind: input, shape index: {}]   ;;  %s899_s1 = inlined_call_operand.vmem [shape: f32[1,128], index: 1, kind: input, shape index: {}]   ;;  %s900_s2 = inlined_call_operand.vmem [shape: f32[1,128], index: 2, kind: input, shape index: {}]   ;;  %s901_s3 = inlined_call_operand.vmem [shape: f32[128,128], index: 3, kind: input, shape index: {}]   ;;  %s902_s4 = inlined_call_operand.vmem [shape: f32[1,128], index: 4, kind: input, shape index: {}]   ;;  %s903_s5 = inlined_call_operand.hbm [shape: f32[32,128], index: 5, kind: output, shape index: {}]  }
   0x1   :  { %12 = vsyncpa [#allocation3 + $0x1], 0  ;;  %s728_s18 = smov 0   ;;  %s730_s19 = smov 0  }
   0x2   :  { %s732_s20 = smov 0   ;;  %s734_s21 = smov 0  }
   0x3   :  { %s736_s22 = smov 0   ;;  %s738_s23 = smov 0  }
   0x4 LB: > { %s504_s24 = sadd.s32 4294967295, %s691_s23   ;;  %s505_s25 = sadd.s32 4294967294, %s691_s23   ;;  %s691_s23 = sphi %s738_s23, %s18_s23   ;;  %s687_s22 = sphi %s736_s22, %s910_s22   ;;  %s683_s21 = sphi %s734_s21, %s909_s21   ;;  %s679_s20 = sphi %s732_s20, %s908_s20   ;;  %s675_s19 = sphi %s730_s19, %s907_s19   ;;  %s671_s18 = sphi %s728_s18, %s906_s18  }
   0x5   : > { %s30_s26 = sadd.s32 1, %s687_s22  ;;  %s159_s27 = sadd.s32 1, %s679_s20 }
   0x6   : > { %p32_p0 = scmp.ge.s32.totalorder %s30_s26, 2  ;;  %p169_p1 = scmp.ne.s32.totalorder %s679_s20, %s675_s19 }
   0x7   : > { %p170_p2 = scmp.eq.s32.totalorder %s504_s24, 1  ;;  %p175_p3 = scmp.ne.s32.totalorder %s675_s19, %s671_s18 }
   0x8   : > { %s912_s26 = smov (%p32_p0, %s30_s26), 0  ;;  %p176_p5 = scmp.eq.s32.totalorder %s505_s25, 1 }
   0x9   : > { %p768_p4 = por %p170_p2, %p169_p1  ;;  %s154_s29 = ssub.s32 %s687_s22, %s912_s26 }
   0xa   : > { %p510_p6 = scmp.ge.s32.totalorder %s691_s23, 1  ;;  %p157_p7 = scmp.eq.s32.totalorder %s154_s29, 0 }
   0xb   : > { %p775_p8 = por %p176_p5, %p175_p3  ;;  %p222_p9 = scmp.lt.s32.totalorder %s691_s23, 3 }
   0xc   : > { %s781_s6 = scalar_select %p157_p7, %s679_s20, %s159_s27  }
   0xd   : > { %p223_p10 = pnand %p510_p6, %p222_p9 }
   0xe   : > { %s512_s7 = sshll.u32 (!%p223_p10), %s683_s21, 1  ;;  %s254_s24 = sand.u32 (!%p223_p10), 1, %s675_s19  }
   0xf   : > { %226 = sbr.rel (%p223_p10) target bundleno = 549 (0x225), region = 40  ;;  %p258_p11 = scmp.lt.s32.totalorder (!%p223_p10), %s512_s7, 3 }
  0x10   : > { %s511_s25 = sshll.u32 (!%p223_p10), %s254_s24, 4  ;;  %s522_s9 = sshll.u32 (!%p223_p10), %s683_s21, 8 }
  0x11   : > { %s851_s12 = scalar_lea.hbm (!%p223_p10), %s903_s5, %s522_s9  ;;  %s853_s13 = scalar_lea.sflag (!%p223_p10), [#allocation3], %s254_s24 }
  0x12   : > { %s695_s21 = smov (!%p223_p10), [#allocation2]  }
  0x13   : > { %s619_s15 = sshll.u32 (!%p223_p10), %s695_s21, 4  ;;  %s620_s15 = int_to_ptr.vmem [resolvable:$false] %s619_s15 }
  0x14   : > { %s914_s7 = smov (!%p258_p11, %s512_s7), 3  ;;  %v330_v2 = vld [vmem:[%s901_s3 + $0x70] sm:$0xff]  ;;  %v331_v3 = vld [vmem:[%s901_s3 + $0x78] sm:$0xff]  ;;  %v693_v4 = vmov 0.0   ;;  %v328_v14 = vld [vmem:[%s901_s3 + $0x60] sm:$0xff]  ;;  %vm694_vm0 = vmmov 0  }
  0x15   : > { %s513_s8 = sshll.u32 %s914_s7, 3  ;;  %532 = vmatprep.subr.bf16.mxu0 %v693_v4  ;;  %v339_v5 = vpack.c.bf16 %v331_v3, %v330_v2  ;;  %v329_v15 = vld [vmem:[%s901_s3 + $0x68] sm:$0xff]  ;;  %v326_v17 = vld [vmem:[%s901_s3 + $0x50] sm:$0xff]  ;;  %v327_v18 = vld [vmem:[%s901_s3 + $0x58] sm:$0xff]  ;;  %548 = vmatprep.mubr.msk.bf16.mxu0 %vm694_vm0, %v693_v4  ;;  %s256_s7 = scalar_lea.vmem [#allocation2], %s511_s25 }
  0x16   : > { %s261_s11 = scalar_lea.vmem %s898_s0, %s513_s8  ;;  %v338_v16 = vpack.c.bf16 %v329_v15, %v328_v14  ;;  %v337_v19 = vpack.c.bf16 %v327_v18, %v326_v17  ;;  %v324_v20 = vld [vmem:[%s901_s3 + $0x40] sm:$0xff]  ;;  %v325_v21 = vld [vmem:[%s901_s3 + $0x48] sm:$0xff]  ;;  %v322_v22 = vld [vmem:[%s901_s3 + $0x30] sm:$0xff]  ;;  %s405_s8 = sshll.u32 %s256_s7, 4  ;;  %s846_s8 = int_to_ptr.vmem [resolvable:$true] %s405_s8 }
  0x17   : > { %v272_v0 = vld [vmem:[%s261_s11] sm:$0xff]  ;;  %v273_v1 = vld [vmem:[%s261_s11 + $0x8] sm:$0xff]  ;;  %533 = vmatpush3.bf16.msra.mxu0 %v339_v5  ;;  %v336_v23 = vpack.c.bf16 %v325_v21, %v324_v20  ;;  %v323_v24 = vld [vmem:[%s901_s3 + $0x38] sm:$0xff]  ;;  %s615_s14 = scalar_lea.vmem %s846_s8, 256  ;;  %s621_s16 = scalar_lea.vmem %s620_s15, 512 }
  0x18   : > { %274 = vadd.xlane.f32.xlu0 %v272_v0  ;;  %534 = vmatprep.subr.bf16.mxu0 %v693_v4  ;;  %v335_v25 = vpack.c.bf16 %v323_v24, %v322_v22  ;;  %v320_v26 = vld [vmem:[%s901_s3 + $0x20] sm:$0xff]  ;;  %v321_v27 = vld [vmem:[%s901_s3 + $0x28] sm:$0xff]  ;;  %v318_v29 = vld [vmem:[%s901_s3 + $0x10] sm:$0xff]  ;;  %p616_p12 = scmp.ne.s32.totalorder %s846_s8, %s615_s14  ;;  %p622_p1 = scmp.lt.s32.totalorder %s846_s8, %s620_s15 }
  0x19   : > { %v334_v28 = vpack.c.bf16 %v321_v27, %v320_v26  ;;  %v319_v30 = vld [vmem:[%s901_s3 + $0x18] sm:$0xff]  ;;  %v316_v32 = vld [vmem:[%s901_s3] sm:$0xff]  ;;  %v317_v33 = vld [vmem:[%s901_s3 + $0x8] sm:$0xff]  ;;  %p623_p2 = scmp.lt.s32.totalorder %s621_s16, %s615_s14 }
  0x1a   : > { %v333_v31 = vpack.c.bf16 %v319_v30, %v318_v29  ;;  %v332_v34 = vpack.c.bf16 %v317_v33, %v316_v32  ;;  %v514_v43 = vld [vmem:[%s899_s1] ss:$0 sm:$0xff]  ;;  %p617_p13 = pnand %p616_p12, %p768_p4 }
  0x1b   : > { %535 = vmatpush3.bf16.msra.mxu0 %v338_v16  ;;  %v515_v47 = vld [vmem:[%s900_s2] ss:$0 sm:$0xff]  ;;  %p624_p3 = por %p623_p2, %p622_p1 }
  0x1c   : > { %276 = vadd.xlane.f32.xlu0 %v273_v1  ;;  %536 = vmatprep.subr.bf16.mxu0 %v693_v4  ;;  %v516_v52 = vld [vmem:[%s902_s4] ss:$0 sm:$0xff]  ;;  %p618_p0 = pneg %p617_p13 }
  0x1e   : > { %p625_p5 = pnand %p624_p3, %p618_p0 }
  0x1f   : > { %537 = vmatpush3.bf16.msra.mxu0 %v337_v19 }
  0x20   : > { %538 = vmatprep.subr.bf16.mxu0 %v693_v4 }
  0x23   : > { %539 = vmatpush3.bf16.msra.mxu0 %v336_v23 }
  0x24   : > { %540 = vmatprep.subr.bf16.mxu0 %v693_v4 }
  0x27   : > { %541 = vmatpush3.bf16.msra.mxu0 %v335_v25 }
  0x28   : > { %542 = vmatprep.subr.bf16.mxu0 %v693_v4 }
  0x2b   : > { %543 = vmatpush3.bf16.msra.mxu0 %v334_v28 }
  0x2c   : > { %544 = vmatprep.subr.bf16.mxu0 %v693_v4 }
  0x2f   : > { %545 = vmatpush3.bf16.msra.mxu0 %v333_v31 }
  0x30   : > { %546 = vmatprep.subr.bf16.mxu0 %v693_v4 }
  0x33   : > { %547 = vmatpush3.bf16.msra.mxu0 %v332_v34 }
  0xa1   : > { %v275_v6 = vpop.xlane.xlu0 %274 }
  0xa2   : > { %v279_v7 = vmul.f32 0.0078125, %v275_v6 }
  0xa4   : > { %v281_v8 = vsub.f32 %v272_v0, %v279_v7 }
  0xa5   : > { %v277_v9 = vpop.xlane.xlu0 %276 }
  0xa6   : > { %v280_v10 = vmul.f32 0.0078125, %v277_v9  ;;  %v283_v11 = vmul.f32 %v281_v8, %v281_v8 }
  0xa8   : > { %v282_v12 = vsub.f32 %v273_v1, %v280_v10  ;;  %285 = vadd.xlane.f32.xlu1 %v283_v11 }
  0xaa   : > { %v284_v13 = vmul.f32 %v282_v12, %v282_v12 }
  0xac   : > { %287 = vadd.xlane.f32.xlu1 %v284_v13 }
 0x131   : > { %v286_v35 = vpop.xlane.xlu1 %285 }
 0x132   : > { %v289_v36 = vmul.f32 0.0078125, %v286_v35 }
 0x134   : > { %v291_v37 = vadd.f32 1e-05, %v289_v36 }
 0x135   : > { %v288_v38 = vpop.xlane.xlu1 %287 }
 0x136   : > { %611 = vrsqrt.f32 %v291_v37  ;;  %v290_v39 = vmul.f32 0.0078125, %v288_v38 }
 0x138   : > { %v292_v40 = vadd.f32 1e-05, %v290_v39 }
 0x13a   : > { %613 = vrsqrt.f32 %v292_v40 }
 0x143   : > { %v612_v41 = vpop.eup %611 }
 0x144   : > { %v295_v42 = vmul.f32 %v612_v41, %v281_v8 }
 0x146   : > { %v304_v46 = vmul.f32 %v514_v43, %v295_v42 }
 0x147   : > { %v614_v44 = vpop.eup %613 }
 0x148   : > { %v296_v45 = vmul.f32 %v614_v44, %v282_v12  ;;  %v313_v49 = vadd.f32 %v515_v47, %v304_v46 }
 0x14a   : > { %v305_v48 = vmul.f32 %v514_v43, %v296_v45 }
 0x14c   : > { %v314_v50 = vadd.f32 %v515_v47, %v305_v48 }
 0x14e   : > { %v315_v51 = vpack.c.bf16 %v314_v50, %v313_v49 }
 0x150   : > { %549 = vmatmul.mubr.bf16.vlgmr.msra.gmra.mxu0 %v315_v51 }
 0x210   : > { %v381_v53 = vpop.f32.mrf.mxu0 }
 0x211   : > { %v382_v54 = vadd.f32 %v516_v52, %v381_v53 }
 0x212   : > { %v550_v55 = vpop.f32.mrf.mxu0 }
 0x213   : > { %388 = vst [vmem:[%s256_s7] sm:$0xff] %v382_v54 }
 0x214   : > { %v384_v56 = vpop.f32.mrf.mxu0 }
 0x215   : > { %v385_v57 = vadd.f32 %v516_v52, %v384_v56 }
 0x216   : > { %v551_v58 = vpop.f32.mrf.mxu0 }
 0x217   : > { %389 = vst [vmem:[%s256_s7 + $0x8] sm:$0xff] %v385_v57 }
 0x218   : > { %628 = shalt.err (!%p625_p5)
}
 0x219   : > { %s629_s17 = scalar_lea.hbm %s851_s12, 256  ;;  %s633_s27 = scalar_lea.hbm %s903_s5, 512 }
 0x21a   : > { %p630_p6 = scmp.ne.s32.totalorder %s851_s12, %s629_s17  ;;  %p634_p10 = scmp.lt.s32.totalorder %s851_s12, %s903_s5 }
 0x21b   : > { %p635_p11 = scmp.lt.s32.totalorder %s633_s27, %s629_s17 }
 0x21c   : > { %p631_p7 = pnand %p630_p6, %p768_p4 }
 0x21d   : > { %p636_p12 = por %p635_p11, %p634_p10 }
 0x21e   : > { %p632_p9 = pneg %p631_p7 }
 0x220   : > { %p637_p13 = pnand %p636_p12, %p632_p9 }
 0x222   : > { %640 = shalt.err (!%p637_p13)
}
 0x223   : > { %s696_s9 = smov 128   ;;  %s697_s10 = smov 8  }
 0x224   : > { %552 = dma.vmem_to_hbm [thread:$0]  (%p768_p4), %s846_s8, 256, %s851_s12, %s853_s13, %s696_s9, %s696_s9, %s697_s10  }
 0x225 PF: > { %p558_p0 = scmp.ge.s32.totalorder %s691_s23, 2  ;;  %s420_s11 = sand.u32 1, %s671_s18  }
 0x226   : > { %s421_s14 = scalar_lea.sflag [#allocation3], %s420_s11 }
 0x227   : > { %p555_p1 = pnand %p558_p0, %p775_p8 }
 0x229   : > { %p556_p2 = pneg %p555_p1 }
 0x22b   : > { %666 = dma.done.wait (%p556_p2), %s421_s14, 256  }
 0x22c   : > { %668 = vsyncadd (%p556_p2), %s421_s14, 4294967040  ;;  %s18_s23 = sadd.s32 1, %s691_s23   ;;  %s906_s18 = smov %s675_s19 }
 0x22d   : > { %p15_p3 = scmp.ge.s32.totalorder %s18_s23, 4   ;;  %s907_s19 = smov %s679_s20 }
 0x22e   : > { %s908_s20 = smov %s781_s6  ;;  %s909_s21 = smov %s687_s22 }
 0x22f   : > { %s910_s22 = smov %s912_s26  ;;  %17 = sbr.rel (!%p15_p3) target bundleno = 4 (0x4), region = 81 }
 0x234   :  { %426 = vsyncpa [#allocation3], 1 }
 0x235   :  { %428 = vsyncpa [#allocation3 + $0x1], 1 }

</bundles_post_ra>
